<compile_context>
chip_gen: v7x
topology: tpu7x:2x2x1
jax: 0.10.0
libtpu: 0.0.40
codegen_flags: <defaults>
</compile_context>

<pallas_src>
import functools
import math

import jax
import jax.numpy as jnp
from jax import lax
from jax.experimental import pallas as pl
from jax.experimental.pallas import tpu as pltpu

BN_EPS = 1e-5


# --------------------------------------------------------------------------- #
# Pass 1: fused 1x1 convs (BN1 pre-folded) + temporal conv / max-pool / plain
#         branches + per-tile BN2 partial statistics.
# --------------------------------------------------------------------------- #
def _mstcn_main_kernel(x_ref, w1_ref, b1_ref, w2_ref, z_ref, stats_ref,
                       *, T, bc, dilations):
    TM = x_ref.shape[0]
    nd = len(dilations)
    nb = nd + 2

    # One wide MXU matmul for all six 1x1 convs (bf16 operands, f32 acc).
    H = jnp.dot(x_ref[...], w1_ref[...],
                preferred_element_type=jnp.float32) + b1_ref[...]   # (TM, nb*bc)

    # Temporal-position masks, built once per dilation (tile holds whole
    # (n, v) sequences, so the local row index modulo T is the time index).
    row_t = lax.broadcasted_iota(jnp.int32, (TM, 1), 0) % T
    ds = sorted(set(dilations) | {1})
    m_lo = {d: row_t >= d for d in ds}          # h[t-d] valid
    m_hi = {d: row_t < (T - d) for d in ds}     # h[t+d] valid

    def shifted(h, d):
        # h[t-d] / h[t+d] within each sequence, 0 outside [0, T).
        hm = jnp.where(m_lo[d], pltpu.roll(h, d, axis=0), 0.0)
        hp = jnp.where(m_hi[d], pltpu.roll(h, TM - d, axis=0), 0.0)
        return hm, hp

    sums, sqs = [], []

    def emit(i, z):
        z_ref[i] = z                                         # lane-contiguous store
        sums.append(jnp.sum(z, axis=0, keepdims=True))       # (1, bc)
        sqs.append(jnp.sum(z * z, axis=0, keepdims=True))

    # --- dilated temporal-conv branches (k=3) --------------------------------
    for i, d in enumerate(dilations):
        h = jnp.maximum(H[:, i * bc:(i + 1) * bc], 0.0)
        hm, hp = shifted(h, d)
        # Fuse the 3 taps into one K=3*bc matmul.
        hc = jnp.concatenate([hm, h, hp], axis=1).astype(w2_ref.dtype)
        z = jnp.dot(hc, w2_ref[i], preferred_element_type=jnp.float32)
        emit(i, z)

    # --- max-pool branch ------------------------------------------------------
    h = jnp.maximum(H[:, nd * bc:(nd + 1) * bc], 0.0)
    hm, hp = shifted(h, 1)          # 0-fill == -inf pad here because h >= 0
    emit(nd, jnp.maximum(jnp.maximum(hm, h), hp))

    # --- plain 1x1 branch (its BN is applied with the others in pass 2) ------
    emit(nd + 1, H[:, (nd + 1) * bc:(nd + 2) * bc])

    # Per-tile partial statistics: rows [0:nb] sums, rows [nb:2nb] sums of squares.
    stats_ref[0] = jnp.concatenate(sums + sqs, axis=0)       # (2*nb, bc)


# --------------------------------------------------------------------------- #
# Pass 2: apply the global per-channel BatchNorm scale/shift.
# --------------------------------------------------------------------------- #
def _bn_apply_kernel(z_ref, scale_ref, shift_ref, o_ref):
    o_ref[...] = z_ref[...] * scale_ref[...] + shift_ref[...]


# --------------------------------------------------------------------------- #
# Tiling helper: tile must hold whole (n, v) sequences (multiple of T), be
# sublane-aligned (multiple of 8 or == M), divide M, and fit a VMEM budget.
# --------------------------------------------------------------------------- #
def _pick_tile_rows(M, T, cin, c6, target_rows, budget_bytes=8 * 1024 * 1024):
    seqs = M // T
    cands = []
    for s in range(1, seqs + 1):
        if seqs % s:
            continue
        tm = s * T
        if tm % 8 != 0 and tm != M:
            continue
        cands.append(tm)
    if not cands:
        return M

    def est(tm):
        # double-buffered bf16 x tile + double-buffered f32 z tile
        # + resident f32 H tile + per-branch temporaries
        return tm * (2 * 2 * cin + 2 * 4 * c6 + 4 * c6 + 4 * c6)

    good = [tm for tm in cands if tm <= target_rows and est(tm) <= budget_bytes]
    if good:
        return max(good)
    good = [tm for tm in cands if est(tm) <= budget_bytes]
    if good:
        return min(good)
    return min(cands)


# --------------------------------------------------------------------------- #
# Parameter init matching the PyTorch module (kaiming_normal fan_out for convs,
# zero conv biases, BN gamma ~ N(1, 0.02), BN beta = 0).
# --------------------------------------------------------------------------- #
def init_params(key, in_channels, out_channels, kernel_size=3,
                dilations=(1, 2, 3, 4)):
    nb = len(dilations) + 2
    assert out_channels % nb == 0
    bc = out_channels // nb
    ks = kernel_size
    k0, k1, k2, k3 = jax.random.split(key, 4)

    std1 = math.sqrt(2.0 / (bc * 1 * 1))                    # 1x1 conv, fan_out = bc
    W1 = jax.random.normal(k0, (nb, in_channels, bc), jnp.float32) * std1
    b1 = jnp.zeros((nb, bc), jnp.float32)
    g1 = 1.0 + 0.02 * jax.random.normal(k1, (nb, bc), jnp.float32)
    be1 = jnp.zeros((nb, bc), jnp.float32)

    std2 = math.sqrt(2.0 / (bc * ks))                       # (ks,1) conv, fan_out = bc*ks
    W2 = jax.random.normal(k2, (len(dilations), ks, bc, bc), jnp.float32) * std2
    b2 = jnp.zeros((len(dilations), bc), jnp.float32)
    g2 = 1.0 + 0.02 * jax.random.normal(k3, (len(dilations) + 1, bc), jnp.float32)
    be2 = jnp.zeros((len(dilations) + 1, bc), jnp.float32)
    return (W1, b1, g1, be1, W2, b2, g2, be2)


# --------------------------------------------------------------------------- #
# Wrapper: NCHW -> (M, C) rows, analytic BN1 fold, two tiled Pallas passes,
# reshape back to NCHW.
# --------------------------------------------------------------------------- #
def multiscale_temporal_conv(x, params, *, dilations=(1, 2, 3, 4),
                             tile_rows_target=1024):
    """x: (N, C_in, T, V) float32 (PyTorch NCHW). Returns (N, C_out, T, V)."""
    N, Cin, T, V = x.shape
    W1, b1, g1, be1, W2, b2, g2, be2 = params
    nd = len(dilations)
    nb = nd + 2
    bc = W1.shape[-1]
    C6 = nb * bc
    M = N * V * T

    # NCHW -> (N, V, T, C) -> (M, Cin); t fastest within each (n, v) sequence.
    x2 = jnp.transpose(x, (0, 3, 2, 1)).reshape(M, Cin).astype(jnp.float32)

    # ---- BN1 folded analytically from x's sufficient statistics (exact: the
    #      1x1 conv is linear, so mean/var of its output follow from mean(x)
    #      and Cov(x); biased variance as in PyTorch training mode).
    mean_x = jnp.mean(x2, axis=0)
    xc = x2 - mean_x
    cov = jnp.matmul(xc.T, xc, precision=lax.Precision.HIGHEST) / M
    mean_y = jnp.einsum('c,ncb->nb', mean_x, W1,
                        precision=lax.Precision.HIGHEST) + b1
    var_y = jnp.einsum('ncb,cd,ndb->nb', W1, cov, W1,
                       precision=lax.Precision.HIGHEST)
    var_y = jnp.maximum(var_y, 0.0)
    scale1 = g1 * lax.rsqrt(var_y + BN_EPS)
    shift1 = be1 - mean_y * scale1
    # Fold only the branches followed by more work (0..nb-2); the plain 1x1
    # branch's BN is applied together with the others in pass 2.
    fold_scale = jnp.concatenate([scale1[:nb - 1],
                                  jnp.ones((1, bc), jnp.float32)], axis=0)
    fold_shift = jnp.concatenate([shift1[:nb - 1],
                                  jnp.zeros((1, bc), jnp.float32)], axis=0)
    W1f = W1 * fold_scale[:, None, :]
    b1f = b1 * fold_scale + fold_shift
    W1_all = jnp.transpose(W1f, (1, 0, 2)).reshape(Cin, C6).astype(jnp.bfloat16)
    b1_all = b1f.reshape(1, C6)                               # f32
    W2_all = W2.reshape(nd, 3 * bc, bc).astype(jnp.bfloat16)  # [tap0;tap1;tap2] rows
    # NOTE: b2 (and b1 of the plain branch) are per-channel constants added
    # right before a training-mode BatchNorm, so they cancel exactly; unused.
    del b2

    x2b = x2.astype(jnp.bfloat16)

    TM = _pick_tile_rows(M, T, Cin, C6, tile_rows_target)
    assert M % TM == 0 and TM % T == 0
    G = M // TM

    kernel = functools.partial(_mstcn_main_kernel, T=T, bc=bc,
                               dilations=tuple(dilations))
    z_raw, stats = pl.pallas_call(
        kernel,
        grid=(G,),
        in_specs=[
            pl.BlockSpec((TM, Cin), lambda i: (i, 0)),
            pl.BlockSpec((Cin, C6), lambda i: (0, 0)),
            pl.BlockSpec((1, C6), lambda i: (0, 0)),
            pl.BlockSpec((nd, 3 * bc, bc), lambda i: (0, 0, 0)),
        ],
        out_specs=(
            pl.BlockSpec((nb, TM, bc), lambda i: (0, i, 0)),
            pl.BlockSpec((1, 2 * nb, bc), lambda i: (i, 0, 0)),
        ),
        out_shape=(
            jax.ShapeDtypeStruct((nb, M, bc), jnp.float32),
            jax.ShapeDtypeStruct((G, 2 * nb, bc), jnp.float32),
        ),
        compiler_params=pltpu.CompilerParams(
            dimension_semantics=("parallel",)),
    )(x2b, W1_all, b1_all, W2_all)

    # ---- global batch statistics for the trailing BatchNorms (reduce the
    #      per-tile partials; biased variance, eps=1e-5).
    tot = jnp.sum(stats, axis=0)                      # (2*nb, bc)
    mean_z = tot[:nb] / M
    var_z = jnp.maximum(tot[nb:] / M - mean_z * mean_z, 0.0)
    gamma2 = jnp.concatenate([g2, g1[nb - 1:nb]], axis=0)     # (nb, bc)
    beta2 = jnp.concatenate([be2, be1[nb - 1:nb]], axis=0)
    scale2 = gamma2 * lax.rsqrt(var_z + BN_EPS)
    shift2 = beta2 - mean_z * scale2
    scale2 = scale2.reshape(nb, 1, bc)
    shift2 = shift2.reshape(nb, 1, bc)

    out6 = pl.pallas_call(
        _bn_apply_kernel,
        grid=(G,),
        in_specs=[
            pl.BlockSpec((nb, TM, bc), lambda i: (0, i, 0)),
            pl.BlockSpec((nb, 1, bc), lambda i: (0, 0, 0)),
            pl.BlockSpec((nb, 1, bc), lambda i: (0, 0, 0)),
        ],
        out_specs=pl.BlockSpec((nb, TM, bc), lambda i: (0, i, 0)),
        out_shape=jax.ShapeDtypeStruct((nb, M, bc), jnp.float32),
        compiler_params=pltpu.CompilerParams(
            dimension_semantics=("parallel",)),
    )(z_raw, scale2, shift2)

    # (nb, M, bc) -> (N, nb*bc, T, V)   (channel order = torch.cat over branches)
    out = out6.reshape(nb, N, V, T, bc).transpose(1, 0, 4, 3, 2)
    return out.reshape(N, nb * bc, T, V)


if __name__ == "__main__":
    key = jax.random.PRNGKey(0)
    kx, kp = jax.random.split(key)

    # small shapes consistent with the module: out_channels % 6 == 0
    N, Cin, T, V = 2, 4, 16, 16
    Cout = 24

    x = jax.random.normal(kx, (N, Cin, T, V), jnp.float32)
    params = init_params(kp, Cin, Cout)

    # small tile target so the multi-tile grid + partial-stats path is exercised
    fn = jax.jit(functools.partial(multiscale_temporal_conv, tile_rows_target=128))
    out = jax.block_until_ready(fn(x, params))

    assert out.shape == (N, Cout, T, V), out.shape
    assert bool(jnp.all(jnp.isfinite(out)))
    print("KERNEL_OK")
</pallas_src>

<mosaic_0001>
module attributes {stable_mosaic.version = 11 : i64} {
  func.func @_mstcn_main_kernel(%arg0: i32, %arg1: memref<128x4xbf16, #tpu.memory_space<vmem>>, %arg2: memref<4x24xbf16, #tpu.memory_space<vmem>>, %arg3: memref<1x24xf32, #tpu.memory_space<vmem>>, %arg4: memref<4x12x4xbf16, #tpu.memory_space<vmem>>, %arg5: memref<6x128x4xf32, #tpu.memory_space<vmem>>, %arg6: memref<1x12x4xf32, #tpu.memory_space<vmem>>) attributes {dimension_semantics = [#tpu.dimension_semantics<parallel>], iteration_bounds = array<i64: 4>, scalar_prefetch = 0 : i64, scratch_operands = 0 : i64, tpu.core_type = #tpu.core_type<tc>, window_params = [{transform_indices = @transform_0, window_bounds = array<i64: 128, 4>}, {pipeline_mode = #tpu.pipeline_mode<synchronous>, transform_indices = @transform_1, window_bounds = array<i64: 4, 24>}, {pipeline_mode = #tpu.pipeline_mode<synchronous>, transform_indices = @transform_2, window_bounds = array<i64: 1, 24>}, {pipeline_mode = #tpu.pipeline_mode<synchronous>, transform_indices = @transform_3, window_bounds = array<i64: 4, 12, 4>}, {transform_indices = @transform_4, window_bounds = array<i64: 6, 128, 4>}, {transform_indices = @transform_5, window_bounds = array<i64: 1, 12, 4>}]} {
    %c0 = arith.constant 0 : index
    %c0_0 = arith.constant 0 : index
    %0 = vector.load %arg1[%c0, %c0_0] : memref<128x4xbf16, #tpu.memory_space<vmem>>, vector<128x4xbf16>
    %c0_1 = arith.constant 0 : index
    %c0_2 = arith.constant 0 : index
    %1 = vector.load %arg2[%c0_1, %c0_2] : memref<4x24xbf16, #tpu.memory_space<vmem>>, vector<4x24xbf16>
    %cst = arith.constant dense<0.000000e+00> : vector<128x24xf32>
    %2 = tpu.matmul %0, %1, %cst {dimension_numbers = #tpu.dot_dimension_numbers<[1], [0], [0], [1], [0, 0, 1, 1], [], []>} : vector<128x4xbf16>, vector<4x24xbf16>, vector<128x24xf32> -> vector<128x24xf32>
    %c0_3 = arith.constant 0 : index
    %c0_4 = arith.constant 0 : index
    %3 = vector.load %arg3[%c0_3, %c0_4] : memref<1x24xf32, #tpu.memory_space<vmem>>, vector<1x24xf32>
    %4 = vector.broadcast %3 : vector<1x24xf32> to vector<128x24xf32>
    %5 = arith.addf %2, %4 : vector<128x24xf32>
    %6 = tpu.iota {dimensions = array<i32: 0>} : vector<128x1xi32>
    %c16_i32 = arith.constant 16 : i32
    %c0_i32 = arith.constant 0 : i32
    %7 = arith.cmpi eq, %c16_i32, %c0_i32 : i32
    %c1_i32 = arith.constant 1 : i32
    %8 = arith.select %7, %c1_i32, %c16_i32 : i32
    %9 = vector.broadcast %8 : i32 to vector<128x1xi32>
    %10 = arith.remsi %6, %9 : vector<128x1xi32>
    %c0_i32_5 = arith.constant 0 : i32
    %11 = vector.broadcast %c0_i32_5 : i32 to vector<128x1xi32>
    %12 = arith.cmpi ne, %10, %11 : vector<128x1xi32>
    %c0_i32_6 = arith.constant 0 : i32
    %13 = vector.broadcast %c0_i32_6 : i32 to vector<128x1xi32>
    %14 = arith.cmpi slt, %10, %13 : vector<128x1xi32>
    %c0_i32_7 = arith.constant 0 : i32
    %15 = arith.cmpi slt, %8, %c0_i32_7 : i32
    %16 = vector.broadcast %15 : i1 to vector<128x1xi1>
    %17 = vector.broadcast %16 : vector<128x1xi1> to vector<128x1xi1>
    %18 = arith.xori %14, %17 : vector<128x1xi1>
    %19 = arith.andi %18, %12 : vector<128x1xi1>
    %20 = vector.broadcast %8 : i32 to vector<128x1xi32>
    %21 = arith.addi %10, %20 : vector<128x1xi32>
    %22 = arith.select %19, %21, %10 : vector<128x1xi1>, vector<128x1xi32>
    %c1_i32_8 = arith.constant 1 : i32
    %23 = vector.broadcast %c1_i32_8 : i32 to vector<128x1xi32>
    %24 = arith.cmpi sge, %22, %23 : vector<128x1xi32>
    %c2_i32 = arith.constant 2 : i32
    %25 = vector.broadcast %c2_i32 : i32 to vector<128x1xi32>
    %26 = arith.cmpi sge, %22, %25 : vector<128x1xi32>
    %c3_i32 = arith.constant 3 : i32
    %27 = vector.broadcast %c3_i32 : i32 to vector<128x1xi32>
    %28 = arith.cmpi sge, %22, %27 : vector<128x1xi32>
    %c4_i32 = arith.constant 4 : i32
    %29 = vector.broadcast %c4_i32 : i32 to vector<128x1xi32>
    %30 = arith.cmpi sge, %22, %29 : vector<128x1xi32>
    %c15_i32 = arith.constant 15 : i32
    %31 = vector.broadcast %c15_i32 : i32 to vector<128x1xi32>
    %32 = arith.cmpi slt, %22, %31 : vector<128x1xi32>
    %c14_i32 = arith.constant 14 : i32
    %33 = vector.broadcast %c14_i32 : i32 to vector<128x1xi32>
    %34 = arith.cmpi slt, %22, %33 : vector<128x1xi32>
    %c13_i32 = arith.constant 13 : i32
    %35 = vector.broadcast %c13_i32 : i32 to vector<128x1xi32>
    %36 = arith.cmpi slt, %22, %35 : vector<128x1xi32>
    %c12_i32 = arith.constant 12 : i32
    %37 = vector.broadcast %c12_i32 : i32 to vector<128x1xi32>
    %38 = arith.cmpi slt, %22, %37 : vector<128x1xi32>
    %39 = vector.extract_strided_slice %5 {offsets = [0, 0], sizes = [128, 4], strides = [1, 1]} : vector<128x24xf32> to vector<128x4xf32>
    %cst_9 = arith.constant 0.000000e+00 : f32
    %40 = vector.broadcast %cst_9 : f32 to vector<128x4xf32>
    %41 = arith.maximumf %39, %40 : vector<128x4xf32>
    %c1_i32_10 = arith.constant 1 : i32
    %42 = tpu.dynamic_rotate %41 by %c1_i32_10 dim 0 : vector<128x4xf32>, i32 -> vector<128x4xf32>
    %cst_11 = arith.constant 0.000000e+00 : f32
    %43 = vector.shape_cast %24 : vector<128x1xi1> to vector<128x1xi1>
    %44 = vector.broadcast %43 : vector<128x1xi1> to vector<128x4xi1>
    %45 = vector.broadcast %cst_11 : f32 to vector<128x4xf32>
    %46 = arith.select %44, %42, %45 : vector<128x4xi1>, vector<128x4xf32>
    %c127_i32 = arith.constant 127 : i32
    %47 = tpu.dynamic_rotate %41 by %c127_i32 dim 0 : vector<128x4xf32>, i32 -> vector<128x4xf32>
    %cst_12 = arith.constant 0.000000e+00 : f32
    %48 = vector.shape_cast %32 : vector<128x1xi1> to vector<128x1xi1>
    %49 = vector.broadcast %48 : vector<128x1xi1> to vector<128x4xi1>
    %50 = vector.broadcast %cst_12 : f32 to vector<128x4xf32>
    %51 = arith.select %49, %47, %50 : vector<128x4xi1>, vector<128x4xf32>
    %52 = tpu.concatenate %46, %41, %51 in 1 : vector<128x4xf32>, vector<128x4xf32>, vector<128x4xf32> -> vector<128x12xf32>
    %53 = arith.truncf %52 : vector<128x12xf32> to vector<128x12xbf16>
    %c0_13 = arith.constant 0 : index
    %c0_14 = arith.constant 0 : index
    %c0_15 = arith.constant 0 : index
    %54 = vector.load %arg4[%c0_13, %c0_14, %c0_15] : memref<4x12x4xbf16, #tpu.memory_space<vmem>>, vector<1x12x4xbf16>
    %55 = vector.shape_cast %54 : vector<1x12x4xbf16> to vector<12x4xbf16>
    %cst_16 = arith.constant dense<0.000000e+00> : vector<128x4xf32>
    %56 = tpu.matmul %53, %55, %cst_16 {dimension_numbers = #tpu.dot_dimension_numbers<[1], [0], [0], [1], [0, 0, 1, 1], [], []>} : vector<128x12xbf16>, vector<12x4xbf16>, vector<128x4xf32> -> vector<128x4xf32>
    %c0_17 = arith.constant 0 : index
    %c0_18 = arith.constant 0 : index
    %c0_19 = arith.constant 0 : index
    %57 = vector.load %arg5[%c0_17, %c0_18, %c0_19] : memref<6x128x4xf32, #tpu.memory_space<vmem>>, vector<1x128x4xf32>
    %58 = vector.shape_cast %57 : vector<1x128x4xf32> to vector<128x4xf32>
    %59 = vector.shape_cast %56 : vector<128x4xf32> to vector<1x128x4xf32>
    tpu.vector_store %arg5[%c0_17, %c0_18, %c0_19], %59 {strides = array<i32>} : memref<6x128x4xf32, #tpu.memory_space<vmem>>, vector<1x128x4xf32>,
    %cst_20 = arith.constant dense<0.000000e+00> : vector<4xf32>
    %60 = vector.multi_reduction <add>, %56, %cst_20 [0] : vector<128x4xf32> to vector<4xf32>
    %61 = vector.shape_cast %60 : vector<4xf32> to vector<1x4xf32>
    %62 = arith.mulf %56, %56 : vector<128x4xf32>
    %cst_21 = arith.constant dense<0.000000e+00> : vector<4xf32>
    %63 = vector.multi_reduction <add>, %62, %cst_21 [0] : vector<128x4xf32> to vector<4xf32>
    %64 = vector.shape_cast %63 : vector<4xf32> to vector<1x4xf32>
    %65 = vector.extract_strided_slice %5 {offsets = [0, 4], sizes = [128, 4], strides = [1, 1]} : vector<128x24xf32> to vector<128x4xf32>
    %cst_22 = arith.constant 0.000000e+00 : f32
    %66 = vector.broadcast %cst_22 : f32 to vector<128x4xf32>
    %67 = arith.maximumf %65, %66 : vector<128x4xf32>
    %c2_i32_23 = arith.constant 2 : i32
    %68 = tpu.dynamic_rotate %67 by %c2_i32_23 dim 0 : vector<128x4xf32>, i32 -> vector<128x4xf32>
    %cst_24 = arith.constant 0.000000e+00 : f32
    %69 = vector.shape_cast %26 : vector<128x1xi1> to vector<128x1xi1>
    %70 = vector.broadcast %69 : vector<128x1xi1> to vector<128x4xi1>
    %71 = vector.broadcast %cst_24 : f32 to vector<128x4xf32>
    %72 = arith.select %70, %68, %71 : vector<128x4xi1>, vector<128x4xf32>
    %c126_i32 = arith.constant 126 : i32
    %73 = tpu.dynamic_rotate %67 by %c126_i32 dim 0 : vector<128x4xf32>, i32 -> vector<128x4xf32>
    %cst_25 = arith.constant 0.000000e+00 : f32
    %74 = vector.shape_cast %34 : vector<128x1xi1> to vector<128x1xi1>
    %75 = vector.broadcast %74 : vector<128x1xi1> to vector<128x4xi1>
    %76 = vector.broadcast %cst_25 : f32 to vector<128x4xf32>
    %77 = arith.select %75, %73, %76 : vector<128x4xi1>, vector<128x4xf32>
    %78 = tpu.concatenate %72, %67, %77 in 1 : vector<128x4xf32>, vector<128x4xf32>, vector<128x4xf32> -> vector<128x12xf32>
    %79 = arith.truncf %78 : vector<128x12xf32> to vector<128x12xbf16>
    %c1 = arith.constant 1 : index
    %c0_26 = arith.constant 0 : index
    %c0_27 = arith.constant 0 : index
    %80 = vector.load %arg4[%c1, %c0_26, %c0_27] : memref<4x12x4xbf16, #tpu.memory_space<vmem>>, vector<1x12x4xbf16>
    %81 = vector.shape_cast %80 : vector<1x12x4xbf16> to vector<12x4xbf16>
    %cst_28 = arith.constant dense<0.000000e+00> : vector<128x4xf32>
    %82 = tpu.matmul %79, %81, %cst_28 {dimension_numbers = #tpu.dot_dimension_numbers<[1], [0], [0], [1], [0, 0, 1, 1], [], []>} : vector<128x12xbf16>, vector<12x4xbf16>, vector<128x4xf32> -> vector<128x4xf32>
    %c1_29 = arith.constant 1 : index
    %c0_30 = arith.constant 0 : index
    %c0_31 = arith.constant 0 : index
    %83 = vector.load %arg5[%c1_29, %c0_30, %c0_31] : memref<6x128x4xf32, #tpu.memory_space<vmem>>, vector<1x128x4xf32>
    %84 = vector.shape_cast %83 : vector<1x128x4xf32> to vector<128x4xf32>
    %85 = vector.shape_cast %82 : vector<128x4xf32> to vector<1x128x4xf32>
    tpu.vector_store %arg5[%c1_29, %c0_30, %c0_31], %85 {strides = array<i32>} : memref<6x128x4xf32, #tpu.memory_space<vmem>>, vector<1x128x4xf32>,
    %cst_32 = arith.constant dense<0.000000e+00> : vector<4xf32>
    %86 = vector.multi_reduction <add>, %82, %cst_32 [0] : vector<128x4xf32> to vector<4xf32>
    %87 = vector.shape_cast %86 : vector<4xf32> to vector<1x4xf32>
    %88 = arith.mulf %82, %82 : vector<128x4xf32>
    %cst_33 = arith.constant dense<0.000000e+00> : vector<4xf32>
    %89 = vector.multi_reduction <add>, %88, %cst_33 [0] : vector<128x4xf32> to vector<4xf32>
    %90 = vector.shape_cast %89 : vector<4xf32> to vector<1x4xf32>
    %91 = vector.extract_strided_slice %5 {offsets = [0, 8], sizes = [128, 4], strides = [1, 1]} : vector<128x24xf32> to vector<128x4xf32>
    %cst_34 = arith.constant 0.000000e+00 : f32
    %92 = vector.broadcast %cst_34 : f32 to vector<128x4xf32>
    %93 = arith.maximumf %91, %92 : vector<128x4xf32>
    %c3_i32_35 = arith.constant 3 : i32
    %94 = tpu.dynamic_rotate %93 by %c3_i32_35 dim 0 : vector<128x4xf32>, i32 -> vector<128x4xf32>
    %cst_36 = arith.constant 0.000000e+00 : f32
    %95 = vector.shape_cast %28 : vector<128x1xi1> to vector<128x1xi1>
    %96 = vector.broadcast %95 : vector<128x1xi1> to vector<128x4xi1>
    %97 = vector.broadcast %cst_36 : f32 to vector<128x4xf32>
    %98 = arith.select %96, %94, %97 : vector<128x4xi1>, vector<128x4xf32>
    %c125_i32 = arith.constant 125 : i32
    %99 = tpu.dynamic_rotate %93 by %c125_i32 dim 0 : vector<128x4xf32>, i32 -> vector<128x4xf32>
    %cst_37 = arith.constant 0.000000e+00 : f32
    %100 = vector.shape_cast %36 : vector<128x1xi1> to vector<128x1xi1>
    %101 = vector.broadcast %100 : vector<128x1xi1> to vector<128x4xi1>
    %102 = vector.broadcast %cst_37 : f32 to vector<128x4xf32>
    %103 = arith.select %101, %99, %102 : vector<128x4xi1>, vector<128x4xf32>
    %104 = tpu.concatenate %98, %93, %103 in 1 : vector<128x4xf32>, vector<128x4xf32>, vector<128x4xf32> -> vector<128x12xf32>
    %105 = arith.truncf %104 : vector<128x12xf32> to vector<128x12xbf16>
    %c2 = arith.constant 2 : index
    %c0_38 = arith.constant 0 : index
    %c0_39 = arith.constant 0 : index
    %106 = vector.load %arg4[%c2, %c0_38, %c0_39] : memref<4x12x4xbf16, #tpu.memory_space<vmem>>, vector<1x12x4xbf16>
    %107 = vector.shape_cast %106 : vector<1x12x4xbf16> to vector<12x4xbf16>
    %cst_40 = arith.constant dense<0.000000e+00> : vector<128x4xf32>
    %108 = tpu.matmul %105, %107, %cst_40 {dimension_numbers = #tpu.dot_dimension_numbers<[1], [0], [0], [1], [0, 0, 1, 1], [], []>} : vector<128x12xbf16>, vector<12x4xbf16>, vector<128x4xf32> -> vector<128x4xf32>
    %c2_41 = arith.constant 2 : index
    %c0_42 = arith.constant 0 : index
    %c0_43 = arith.constant 0 : index
    %109 = vector.load %arg5[%c2_41, %c0_42, %c0_43] : memref<6x128x4xf32, #tpu.memory_space<vmem>>, vector<1x128x4xf32>
    %110 = vector.shape_cast %109 : vector<1x128x4xf32> to vector<128x4xf32>
    %111 = vector.shape_cast %108 : vector<128x4xf32> to vector<1x128x4xf32>
    tpu.vector_store %arg5[%c2_41, %c0_42, %c0_43], %111 {strides = array<i32>} : memref<6x128x4xf32, #tpu.memory_space<vmem>>, vector<1x128x4xf32>,
    %cst_44 = arith.constant dense<0.000000e+00> : vector<4xf32>
    %112 = vector.multi_reduction <add>, %108, %cst_44 [0] : vector<128x4xf32> to vector<4xf32>
    %113 = vector.shape_cast %112 : vector<4xf32> to vector<1x4xf32>
    %114 = arith.mulf %108, %108 : vector<128x4xf32>
    %cst_45 = arith.constant dense<0.000000e+00> : vector<4xf32>
    %115 = vector.multi_reduction <add>, %114, %cst_45 [0] : vector<128x4xf32> to vector<4xf32>
    %116 = vector.shape_cast %115 : vector<4xf32> to vector<1x4xf32>
    %117 = vector.extract_strided_slice %5 {offsets = [0, 12], sizes = [128, 4], strides = [1, 1]} : vector<128x24xf32> to vector<128x4xf32>
    %cst_46 = arith.constant 0.000000e+00 : f32
    %118 = vector.broadcast %cst_46 : f32 to vector<128x4xf32>
    %119 = arith.maximumf %117, %118 : vector<128x4xf32>
    %c4_i32_47 = arith.constant 4 : i32
    %120 = tpu.dynamic_rotate %119 by %c4_i32_47 dim 0 : vector<128x4xf32>, i32 -> vector<128x4xf32>
    %cst_48 = arith.constant 0.000000e+00 : f32
    %121 = vector.shape_cast %30 : vector<128x1xi1> to vector<128x1xi1>
    %122 = vector.broadcast %121 : vector<128x1xi1> to vector<128x4xi1>
    %123 = vector.broadcast %cst_48 : f32 to vector<128x4xf32>
    %124 = arith.select %122, %120, %123 : vector<128x4xi1>, vector<128x4xf32>
    %c124_i32 = arith.constant 124 : i32
    %125 = tpu.dynamic_rotate %119 by %c124_i32 dim 0 : vector<128x4xf32>, i32 -> vector<128x4xf32>
    %cst_49 = arith.constant 0.000000e+00 : f32
    %126 = vector.shape_cast %38 : vector<128x1xi1> to vector<128x1xi1>
    %127 = vector.broadcast %126 : vector<128x1xi1> to vector<128x4xi1>
    %128 = vector.broadcast %cst_49 : f32 to vector<128x4xf32>
    %129 = arith.select %127, %125, %128 : vector<128x4xi1>, vector<128x4xf32>
    %130 = tpu.concatenate %124, %119, %129 in 1 : vector<128x4xf32>, vector<128x4xf32>, vector<128x4xf32> -> vector<128x12xf32>
    %131 = arith.truncf %130 : vector<128x12xf32> to vector<128x12xbf16>
    %c3 = arith.constant 3 : index
    %c0_50 = arith.constant 0 : index
    %c0_51 = arith.constant 0 : index
    %132 = vector.load %arg4[%c3, %c0_50, %c0_51] : memref<4x12x4xbf16, #tpu.memory_space<vmem>>, vector<1x12x4xbf16>
    %133 = vector.shape_cast %132 : vector<1x12x4xbf16> to vector<12x4xbf16>
    %cst_52 = arith.constant dense<0.000000e+00> : vector<128x4xf32>
    %134 = tpu.matmul %131, %133, %cst_52 {dimension_numbers = #tpu.dot_dimension_numbers<[1], [0], [0], [1], [0, 0, 1, 1], [], []>} : vector<128x12xbf16>, vector<12x4xbf16>, vector<128x4xf32> -> vector<128x4xf32>
    %c3_53 = arith.constant 3 : index
    %c0_54 = arith.constant 0 : index
    %c0_55 = arith.constant 0 : index
    %135 = vector.load %arg5[%c3_53, %c0_54, %c0_55] : memref<6x128x4xf32, #tpu.memory_space<vmem>>, vector<1x128x4xf32>
    %136 = vector.shape_cast %135 : vector<1x128x4xf32> to vector<128x4xf32>
    %137 = vector.shape_cast %134 : vector<128x4xf32> to vector<1x128x4xf32>
    tpu.vector_store %arg5[%c3_53, %c0_54, %c0_55], %137 {strides = array<i32>} : memref<6x128x4xf32, #tpu.memory_space<vmem>>, vector<1x128x4xf32>,
    %cst_56 = arith.constant dense<0.000000e+00> : vector<4xf32>
    %138 = vector.multi_reduction <add>, %134, %cst_56 [0] : vector<128x4xf32> to vector<4xf32>
    %139 = vector.shape_cast %138 : vector<4xf32> to vector<1x4xf32>
    %140 = arith.mulf %134, %134 : vector<128x4xf32>
    %cst_57 = arith.constant dense<0.000000e+00> : vector<4xf32>
    %141 = vector.multi_reduction <add>, %140, %cst_57 [0] : vector<128x4xf32> to vector<4xf32>
    %142 = vector.shape_cast %141 : vector<4xf32> to vector<1x4xf32>
    %143 = vector.extract_strided_slice %5 {offsets = [0, 16], sizes = [128, 4], strides = [1, 1]} : vector<128x24xf32> to vector<128x4xf32>
    %cst_58 = arith.constant 0.000000e+00 : f32
    %144 = vector.broadcast %cst_58 : f32 to vector<128x4xf32>
    %145 = arith.maximumf %143, %144 : vector<128x4xf32>
    %c1_i32_59 = arith.constant 1 : i32
    %146 = tpu.dynamic_rotate %145 by %c1_i32_59 dim 0 : vector<128x4xf32>, i32 -> vector<128x4xf32>
    %cst_60 = arith.constant 0.000000e+00 : f32
    %147 = vector.shape_cast %24 : vector<128x1xi1> to vector<128x1xi1>
    %148 = vector.broadcast %147 : vector<128x1xi1> to vector<128x4xi1>
    %149 = vector.broadcast %cst_60 : f32 to vector<128x4xf32>
    %150 = arith.select %148, %146, %149 : vector<128x4xi1>, vector<128x4xf32>
    %c127_i32_61 = arith.constant 127 : i32
    %151 = tpu.dynamic_rotate %145 by %c127_i32_61 dim 0 : vector<128x4xf32>, i32 -> vector<128x4xf32>
    %cst_62 = arith.constant 0.000000e+00 : f32
    %152 = vector.shape_cast %32 : vector<128x1xi1> to vector<128x1xi1>
    %153 = vector.broadcast %152 : vector<128x1xi1> to vector<128x4xi1>
    %154 = vector.broadcast %cst_62 : f32 to vector<128x4xf32>
    %155 = arith.select %153, %151, %154 : vector<128x4xi1>, vector<128x4xf32>
    %156 = arith.maximumf %150, %145 : vector<128x4xf32>
    %157 = arith.maximumf %156, %155 : vector<128x4xf32>
    %c4 = arith.constant 4 : index
    %c0_63 = arith.constant 0 : index
    %c0_64 = arith.constant 0 : index
    %158 = vector.load %arg5[%c4, %c0_63, %c0_64] : memref<6x128x4xf32, #tpu.memory_space<vmem>>, vector<1x128x4xf32>
    %159 = vector.shape_cast %158 : vector<1x128x4xf32> to vector<128x4xf32>
    %160 = vector.shape_cast %157 : vector<128x4xf32> to vector<1x128x4xf32>
    tpu.vector_store %arg5[%c4, %c0_63, %c0_64], %160 {strides = array<i32>} : memref<6x128x4xf32, #tpu.memory_space<vmem>>, vector<1x128x4xf32>,
    %cst_65 = arith.constant dense<0.000000e+00> : vector<4xf32>
    %161 = vector.multi_reduction <add>, %157, %cst_65 [0] : vector<128x4xf32> to vector<4xf32>
    %162 = vector.shape_cast %161 : vector<4xf32> to vector<1x4xf32>
    %163 = arith.mulf %157, %157 : vector<128x4xf32>
    %cst_66 = arith.constant dense<0.000000e+00> : vector<4xf32>
    %164 = vector.multi_reduction <add>, %163, %cst_66 [0] : vector<128x4xf32> to vector<4xf32>
    %165 = vector.shape_cast %164 : vector<4xf32> to vector<1x4xf32>
    %166 = vector.extract_strided_slice %5 {offsets = [0, 20], sizes = [128, 4], strides = [1, 1]} : vector<128x24xf32> to vector<128x4xf32>
    %c5 = arith.constant 5 : index
    %c0_67 = arith.constant 0 : index
    %c0_68 = arith.constant 0 : index
    %167 = vector.load %arg5[%c5, %c0_67, %c0_68] : memref<6x128x4xf32, #tpu.memory_space<vmem>>, vector<1x128x4xf32>
    %168 = vector.shape_cast %167 : vector<1x128x4xf32> to vector<128x4xf32>
    %169 = vector.shape_cast %166 : vector<128x4xf32> to vector<1x128x4xf32>
    tpu.vector_store %arg5[%c5, %c0_67, %c0_68], %169 {strides = array<i32>} : memref<6x128x4xf32, #tpu.memory_space<vmem>>, vector<1x128x4xf32>,
    %cst_69 = arith.constant dense<0.000000e+00> : vector<4xf32>
    %170 = vector.multi_reduction <add>, %166, %cst_69 [0] : vector<128x4xf32> to vector<4xf32>
    %171 = vector.shape_cast %170 : vector<4xf32> to vector<1x4xf32>
    %172 = arith.mulf %166, %166 : vector<128x4xf32>
    %cst_70 = arith.constant dense<0.000000e+00> : vector<4xf32>
    %173 = vector.multi_reduction <add>, %172, %cst_70 [0] : vector<128x4xf32> to vector<4xf32>
    %174 = vector.shape_cast %173 : vector<4xf32> to vector<1x4xf32>
    %175 = tpu.concatenate %61, %87, %113, %139, %162, %171, %64, %90, %116, %142, %165, %174 in 0 : vector<1x4xf32>, vector<1x4xf32>, vector<1x4xf32>, vector<1x4xf32>, vector<1x4xf32>, vector<1x4xf32>, vector<1x4xf32>, vector<1x4xf32>, vector<1x4xf32>, vector<1x4xf32>, vector<1x4xf32>, vector<1x4xf32> -> vector<12x4xf32>
    %c0_71 = arith.constant 0 : index
    %c0_72 = arith.constant 0 : index
    %c0_73 = arith.constant 0 : index
    %176 = vector.load %arg6[%c0_71, %c0_72, %c0_73] : memref<1x12x4xf32, #tpu.memory_space<vmem>>, vector<1x12x4xf32>
    %177 = vector.shape_cast %176 : vector<1x12x4xf32> to vector<12x4xf32>
    %178 = vector.shape_cast %175 : vector<12x4xf32> to vector<1x12x4xf32>
    tpu.vector_store %arg6[%c0_71, %c0_72, %c0_73], %178 {strides = array<i32>} : memref<1x12x4xf32, #tpu.memory_space<vmem>>, vector<1x12x4xf32>,
    return
  }
  func.func @transform_0(%arg0: i32) -> (i32, i32) {
    %c0_i32 = arith.constant 0 : i32
    %c0_i32_0 = arith.constant 0 : i32
    return %arg0, %c0_i32 : i32, i32
  }
  func.func @transform_1(%arg0: i32) -> (i32, i32) {
    %c0_i32 = arith.constant 0 : i32
    %c0_i32_0 = arith.constant 0 : i32
    %c0_i32_1 = arith.constant 0 : i32
    return %c0_i32, %c0_i32_0 : i32, i32
  }
  func.func @transform_2(%arg0: i32) -> (i32, i32) {
    %c0_i32 = arith.constant 0 : i32
    %c0_i32_0 = arith.constant 0 : i32
    %c0_i32_1 = arith.constant 0 : i32
    return %c0_i32, %c0_i32_0 : i32, i32
  }
  func.func @transform_3(%arg0: i32) -> (i32, i32, i32) {
    %c0_i32 = arith.constant 0 : i32
    %c0_i32_0 = arith.constant 0 : i32
    %c0_i32_1 = arith.constant 0 : i32
    %c0_i32_2 = arith.constant 0 : i32
    return %c0_i32, %c0_i32_0, %c0_i32_1 : i32, i32, i32
  }
  func.func @transform_4(%arg0: i32) -> (i32, i32, i32) {
    %c0_i32 = arith.constant 0 : i32
    %c0_i32_0 = arith.constant 0 : i32
    %c0_i32_1 = arith.constant 0 : i32
    return %c0_i32, %arg0, %c0_i32_0 : i32, i32, i32
  }
  func.func @transform_5(%arg0: i32) -> (i32, i32, i32) {
    %c0_i32 = arith.constant 0 : i32
    %c0_i32_0 = arith.constant 0 : i32
    %c0_i32_1 = arith.constant 0 : i32
    return %arg0, %c0_i32, %c0_i32_0 : i32, i32, i32
  }
}

module attributes {stable_mosaic.version = 11 : i64} {
  func.func @_bn_apply_kernel(%arg0: i32, %arg1: memref<6x128x4xf32, #tpu.memory_space<vmem>>, %arg2: memref<6x1x4xf32, #tpu.memory_space<vmem>>, %arg3: memref<6x1x4xf32, #tpu.memory_space<vmem>>, %arg4: memref<6x128x4xf32, #tpu.memory_space<vmem>>) attributes {dimension_semantics = [#tpu.dimension_semantics<parallel>], iteration_bounds = array<i64: 4>, scalar_prefetch = 0 : i64, scratch_operands = 0 : i64, tpu.core_type = #tpu.core_type<tc>, window_params = [{transform_indices = @transform_0, window_bounds = array<i64: 6, 128, 4>}, {pipeline_mode = #tpu.pipeline_mode<synchronous>, transform_indices = @transform_1, window_bounds = array<i64: 6, 1, 4>}, {pipeline_mode = #tpu.pipeline_mode<synchronous>, transform_indices = @transform_2, window_bounds = array<i64: 6, 1, 4>}, {transform_indices = @transform_3, window_bounds = array<i64: 6, 128, 4>}]} {
    %c0 = arith.constant 0 : index
    %c0_0 = arith.constant 0 : index
    %c0_1 = arith.constant 0 : index
    %0 = vector.load %arg1[%c0, %c0_0, %c0_1] : memref<6x128x4xf32, #tpu.memory_space<vmem>>, vector<6x128x4xf32>
    %c0_2 = arith.constant 0 : index
    %c0_3 = arith.constant 0 : index
    %c0_4 = arith.constant 0 : index
    %1 = vector.load %arg2[%c0_2, %c0_3, %c0_4] : memref<6x1x4xf32, #tpu.memory_space<vmem>>, vector<6x1x4xf32>
    %2 = vector.broadcast %1 : vector<6x1x4xf32> to vector<6x128x4xf32>
    %3 = arith.mulf %0, %2 : vector<6x128x4xf32>
    %c0_5 = arith.constant 0 : index
    %c0_6 = arith.constant 0 : index
    %c0_7 = arith.constant 0 : index
    %4 = vector.load %arg3[%c0_5, %c0_6, %c0_7] : memref<6x1x4xf32, #tpu.memory_space<vmem>>, vector<6x1x4xf32>
    %5 = vector.broadcast %4 : vector<6x1x4xf32> to vector<6x128x4xf32>
    %6 = arith.addf %3, %5 : vector<6x128x4xf32>
    %c0_8 = arith.constant 0 : index
    %c0_9 = arith.constant 0 : index
    %c0_10 = arith.constant 0 : index
    %7 = vector.load %arg4[%c0_8, %c0_9, %c0_10] : memref<6x128x4xf32, #tpu.memory_space<vmem>>, vector<6x128x4xf32>
    tpu.vector_store %arg4[%c0_8, %c0_9, %c0_10], %6 {strides = array<i32>} : memref<6x128x4xf32, #tpu.memory_space<vmem>>, vector<6x128x4xf32>,
    return
  }
  func.func @transform_0(%arg0: i32) -> (i32, i32, i32) {
    %c0_i32 = arith.constant 0 : i32
    %c0_i32_0 = arith.constant 0 : i32
    %c0_i32_1 = arith.constant 0 : i32
    return %c0_i32, %arg0, %c0_i32_0 : i32, i32, i32
  }
  func.func @transform_1(%arg0: i32) -> (i32, i32, i32) {
    %c0_i32 = arith.constant 0 : i32
    %c0_i32_0 = arith.constant 0 : i32
    %c0_i32_1 = arith.constant 0 : i32
    %c0_i32_2 = arith.constant 0 : i32
    return %c0_i32, %c0_i32_0, %c0_i32_1 : i32, i32, i32
  }
  func.func @transform_2(%arg0: i32) -> (i32, i32, i32) {
    %c0_i32 = arith.constant 0 : i32
    %c0_i32_0 = arith.constant 0 : i32
    %c0_i32_1 = arith.constant 0 : i32
    %c0_i32_2 = arith.constant 0 : i32
    return %c0_i32, %c0_i32_0, %c0_i32_1 : i32, i32, i32
  }
  func.func @transform_3(%arg0: i32) -> (i32, i32, i32) {
    %c0_i32 = arith.constant 0 : i32
    %c0_i32_0 = arith.constant 0 : i32
    %c0_i32_1 = arith.constant 0 : i32
    return %c0_i32, %arg0, %c0_i32_0 : i32, i32, i32
  }
}

</mosaic_0001>

<bundles_post_ra>
// kernel: multiscale_temporal_conv.3
= control target key start
LH: loop header
LB: loop body
LE: loop exit
PB: predicated region body
PF: predicated region fallthrough
CT: control target
= control target key end

     0   :  { %s1624_s12 = smov 0   ;;  %s1626_s13 = smov 0   ;;  %s2622_s0 = inlined_call_operand.vmem [shape: f32[6,512,4], index: 0, kind: input, shape index: {}]   ;;  %s2623_s1 = inlined_call_operand.vmem [shape: f32[6,1,4], index: 1, kind: input, shape index: {}]   ;;  %s2624_s2 = inlined_call_operand.vmem [shape: f32[6,1,4], index: 2, kind: input, shape index: {}]   ;;  %s2625_s3 = inlined_call_operand.vmem [shape: f32[6,512,4], index: 3, kind: output, shape index: {}]  }
   0x1   :  { %s1628_s14 = smov 0  }
   0x2 LB: > { %s1529_s15 = sadd.s32 4294967295, %s1602_s14   ;;  %s1641_s16 = sadd.s32 1, %s1602_s14   ;;  %s1602_s14 = sphi %s1628_s14, %s2629_s14   ;;  %s1598_s13 = sphi %s1626_s13, %s2628_s13   ;;  %s1594_s12 = sphi %s1624_s12, %s2627_s12  }
   0x3   : > { %s17_s17 = ssub.s32 %s1602_s14, %s1641_s16  ;;  %s20_s18 = sadd.s32 1, %s1598_s13 }
   0x4   : > { %p18_p0 = scmp.eq.s32.totalorder %s17_s17, 0  ;;  %p27_p1 = scmp.ne.s32.totalorder %s1598_s13, %s1594_s12 }
   0x5   : > { %p28_p2 = scmp.eq.s32.totalorder %s1602_s14, 0  ;;  %p99_p3 = scmp.eq.s32.totalorder %s1529_s15, 3 }
   0x6   : > { %s1652_s19 = scalar_select %p18_p0, %s1598_s13, %s20_s18  }
   0x7   : > { %p29_p4 = por %p28_p2, %p27_p1  ;;  %p1654_p5 = por %p99_p3, %p27_p1 }
   0x8   : > { %p1532_p6 = scmp.ge.s32.totalorder %s1602_s14, 4 }
   0xa   : > { %127 = sbr.rel (%p1532_p6) target bundleno = 70 (0x46), region = 24 }
  0x11   : > { %130 = sbr.rel (!%p29_p4) target bundleno = 70 (0x46), region = 28  ;;  %s132_s21 = sand.u32 (%p29_p4), 1, %s1598_s13  }
  0x12   : > { %s1552_s22 = sshll.u32 (%p29_p4), %s1602_s14, 7  ;;  %s1554_s23 = smul.u32 (%p29_p4), 768, %s132_s21 }
  0x13   : > { %s1664_s26 = scalar_lea.vmem (%p29_p4), %s2622_s0, %s1552_s22 }
  0x14   : > { %v355_v0 = vld [vmem:[%s1664_s26] sm:$0xff] (%p29_p4)  ;;  %v357_v1 = vld [vmem:[%s1664_s26 + $0x8] sm:$0xff] (%p29_p4)  ;;  %v359_v2 = vld [vmem:[%s1664_s26 + $0x10] sm:$0xff] (%p29_p4)  ;;  %s1672_s27 = scalar_lea.vmem (%p29_p4), [#allocation2], %s1554_s23 }
  0x15   : > { %v361_v3 = vld [vmem:[%s1664_s26 + $0x18] sm:$0xff] (%p29_p4)  ;;  %v363_v4 = vld [vmem:[%s1664_s26 + $0x20] sm:$0xff] (%p29_p4)  ;;  %v365_v5 = vld [vmem:[%s1664_s26 + $0x28] sm:$0xff] (%p29_p4)  ;;  %356 = vst [vmem:[%s1672_s27] sm:$0xff] (%p29_p4), %v355_v0 }
  0x16   : > { %358 = vst [vmem:[%s1672_s27 + $0x8] sm:$0xff] (%p29_p4), %v357_v1  ;;  %360 = vst [vmem:[%s1672_s27 + $0x10] sm:$0xff] (%p29_p4), %v359_v2  ;;  %v367_v6 = vld [vmem:[%s1664_s26 + $0x30] sm:$0xff] (%p29_p4)  ;;  %v369_v7 = vld [vmem:[%s1664_s26 + $0x38] sm:$0xff] (%p29_p4) }
  0x17   : > { %362 = vst [vmem:[%s1672_s27 + $0x18] sm:$0xff] (%p29_p4), %v361_v3  ;;  %364 = vst [vmem:[%s1672_s27 + $0x20] sm:$0xff] (%p29_p4), %v363_v4  ;;  %v371_v8 = vld [vmem:[%s1664_s26 + $0x40] sm:$0xff] (%p29_p4)  ;;  %v373_v9 = vld [vmem:[%s1664_s26 + $0x48] sm:$0xff] (%p29_p4) }
  0x18   : > { %366 = vst [vmem:[%s1672_s27 + $0x28] sm:$0xff] %v365_v5  ;;  %368 = vst [vmem:[%s1672_s27 + $0x30] sm:$0xff] %v367_v6  ;;  %v375_v10 = vld [vmem:[%s1664_s26 + $0x50] sm:$0xff]  ;;  %v377_v11 = vld [vmem:[%s1664_s26 + $0x58] sm:$0xff] }
  0x19   : > { %370 = vst [vmem:[%s1672_s27 + $0x38] sm:$0xff] %v369_v7  ;;  %372 = vst [vmem:[%s1672_s27 + $0x40] sm:$0xff] %v371_v8  ;;  %v379_v12 = vld [vmem:[%s1664_s26 + $0x60] sm:$0xff]  ;;  %v381_v13 = vld [vmem:[%s1664_s26 + $0x68] sm:$0xff] }
  0x1a   : > { %374 = vst [vmem:[%s1672_s27 + $0x48] sm:$0xff] %v373_v9  ;;  %376 = vst [vmem:[%s1672_s27 + $0x50] sm:$0xff] %v375_v10  ;;  %v383_v14 = vld [vmem:[%s1664_s26 + $0x70] sm:$0xff]  ;;  %v385_v15 = vld [vmem:[%s1664_s26 + $0x78] sm:$0xff] }
  0x1b   : > { %378 = vst [vmem:[%s1672_s27 + $0x58] sm:$0xff] %v377_v11  ;;  %380 = vst [vmem:[%s1672_s27 + $0x60] sm:$0xff] %v379_v12  ;;  %v387_v16 = vld [vmem:[%s1664_s26 + $0x200] sm:$0xff]  ;;  %v389_v17 = vld [vmem:[%s1664_s26 + $0x208] sm:$0xff] }
  0x1c   : > { %382 = vst [vmem:[%s1672_s27 + $0x68] sm:$0xff] %v381_v13  ;;  %384 = vst [vmem:[%s1672_s27 + $0x70] sm:$0xff] %v383_v14  ;;  %v391_v18 = vld [vmem:[%s1664_s26 + $0x210] sm:$0xff]  ;;  %v393_v19 = vld [vmem:[%s1664_s26 + $0x218] sm:$0xff] }
  0x1d   : > { %386 = vst [vmem:[%s1672_s27 + $0x78] sm:$0xff] %v385_v15  ;;  %388 = vst [vmem:[%s1672_s27 + $0x80] sm:$0xff] %v387_v16  ;;  %v395_v20 = vld [vmem:[%s1664_s26 + $0x220] sm:$0xff]  ;;  %v397_v21 = vld [vmem:[%s1664_s26 + $0x228] sm:$0xff] }
  0x1e   : > { %390 = vst [vmem:[%s1672_s27 + $0x88] sm:$0xff] %v389_v17  ;;  %392 = vst [vmem:[%s1672_s27 + $0x90] sm:$0xff] %v391_v18  ;;  %v399_v22 = vld [vmem:[%s1664_s26 + $0x230] sm:$0xff]  ;;  %v401_v23 = vld [vmem:[%s1664_s26 + $0x238] sm:$0xff] }
  0x1f   : > { %394 = vst [vmem:[%s1672_s27 + $0x98] sm:$0xff] %v393_v19  ;;  %396 = vst [vmem:[%s1672_s27 + $0xa0] sm:$0xff] %v395_v20  ;;  %v403_v24 = vld [vmem:[%s1664_s26 + $0x240] sm:$0xff]  ;;  %v405_v25 = vld [vmem:[%s1664_s26 + $0x248] sm:$0xff] }
  0x20   : > { %398 = vst [vmem:[%s1672_s27 + $0xa8] sm:$0xff] %v397_v21  ;;  %400 = vst [vmem:[%s1672_s27 + $0xb0] sm:$0xff] %v399_v22  ;;  %v407_v26 = vld [vmem:[%s1664_s26 + $0x250] sm:$0xff]  ;;  %v409_v27 = vld [vmem:[%s1664_s26 + $0x258] sm:$0xff] }
  0x21   : > { %402 = vst [vmem:[%s1672_s27 + $0xb8] sm:$0xff] %v401_v23  ;;  %404 = vst [vmem:[%s1672_s27 + $0xc0] sm:$0xff] %v403_v24  ;;  %v411_v28 = vld [vmem:[%s1664_s26 + $0x260] sm:$0xff]  ;;  %v413_v29 = vld [vmem:[%s1664_s26 + $0x268] sm:$0xff] }
  0x22   : > { %406 = vst [vmem:[%s1672_s27 + $0xc8] sm:$0xff] %v405_v25  ;;  %408 = vst [vmem:[%s1672_s27 + $0xd0] sm:$0xff] %v407_v26  ;;  %v415_v30 = vld [vmem:[%s1664_s26 + $0x270] sm:$0xff]  ;;  %v417_v31 = vld [vmem:[%s1664_s26 + $0x278] sm:$0xff] }
  0x23   : > { %410 = vst [vmem:[%s1672_s27 + $0xd8] sm:$0xff] %v409_v27  ;;  %412 = vst [vmem:[%s1672_s27 + $0xe0] sm:$0xff] %v411_v28  ;;  %v419_v32 = vld [vmem:[%s1664_s26 + $0x400] sm:$0xff]  ;;  %v421_v33 = vld [vmem:[%s1664_s26 + $0x408] sm:$0xff] }
  0x24   : > { %414 = vst [vmem:[%s1672_s27 + $0xe8] sm:$0xff] %v413_v29  ;;  %416 = vst [vmem:[%s1672_s27 + $0xf0] sm:$0xff] %v415_v30  ;;  %v423_v34 = vld [vmem:[%s1664_s26 + $0x410] sm:$0xff]  ;;  %v425_v35 = vld [vmem:[%s1664_s26 + $0x418] sm:$0xff] }
  0x25   : > { %418 = vst [vmem:[%s1672_s27 + $0xf8] sm:$0xff] %v417_v31  ;;  %420 = vst [vmem:[%s1672_s27 + $0x100] sm:$0xff] %v419_v32  ;;  %v427_v36 = vld [vmem:[%s1664_s26 + $0x420] sm:$0xff]  ;;  %v429_v37 = vld [vmem:[%s1664_s26 + $0x428] sm:$0xff] }
  0x26   : > { %422 = vst [vmem:[%s1672_s27 + $0x108] sm:$0xff] %v421_v33  ;;  %424 = vst [vmem:[%s1672_s27 + $0x110] sm:$0xff] %v423_v34  ;;  %v431_v38 = vld [vmem:[%s1664_s26 + $0x430] sm:$0xff]  ;;  %v433_v39 = vld [vmem:[%s1664_s26 + $0x438] sm:$0xff] }
  0x27   : > { %426 = vst [vmem:[%s1672_s27 + $0x118] sm:$0xff] %v425_v35  ;;  %428 = vst [vmem:[%s1672_s27 + $0x120] sm:$0xff] %v427_v36  ;;  %v435_v40 = vld [vmem:[%s1664_s26 + $0x440] sm:$0xff]  ;;  %v437_v41 = vld [vmem:[%s1664_s26 + $0x448] sm:$0xff] }
  0x28   : > { %430 = vst [vmem:[%s1672_s27 + $0x128] sm:$0xff] %v429_v37  ;;  %432 = vst [vmem:[%s1672_s27 + $0x130] sm:$0xff] %v431_v38  ;;  %v439_v42 = vld [vmem:[%s1664_s26 + $0x450] sm:$0xff]  ;;  %v441_v43 = vld [vmem:[%s1664_s26 + $0x458] sm:$0xff] }
  0x29   : > { %434 = vst [vmem:[%s1672_s27 + $0x138] sm:$0xff] %v433_v39  ;;  %436 = vst [vmem:[%s1672_s27 + $0x140] sm:$0xff] %v435_v40  ;;  %v443_v44 = vld [vmem:[%s1664_s26 + $0x460] sm:$0xff]  ;;  %v445_v45 = vld [vmem:[%s1664_s26 + $0x468] sm:$0xff] }
  0x2a   : > { %438 = vst [vmem:[%s1672_s27 + $0x148] sm:$0xff] %v437_v41  ;;  %440 = vst [vmem:[%s1672_s27 + $0x150] sm:$0xff] %v439_v42  ;;  %v447_v46 = vld [vmem:[%s1664_s26 + $0x470] sm:$0xff]  ;;  %v449_v47 = vld [vmem:[%s1664_s26 + $0x478] sm:$0xff] }
  0x2b   : > { %442 = vst [vmem:[%s1672_s27 + $0x158] sm:$0xff] %v441_v43  ;;  %444 = vst [vmem:[%s1672_s27 + $0x160] sm:$0xff] %v443_v44  ;;  %v451_v48 = vld [vmem:[%s1664_s26 + $0x600] sm:$0xff]  ;;  %v453_v49 = vld [vmem:[%s1664_s26 + $0x608] sm:$0xff] }
  0x2c   : > { %446 = vst [vmem:[%s1672_s27 + $0x168] sm:$0xff] %v445_v45  ;;  %448 = vst [vmem:[%s1672_s27 + $0x170] sm:$0xff] %v447_v46  ;;  %v455_v50 = vld [vmem:[%s1664_s26 + $0x610] sm:$0xff]  ;;  %v457_v51 = vld [vmem:[%s1664_s26 + $0x618] sm:$0xff] }
  0x2d   : > { %450 = vst [vmem:[%s1672_s27 + $0x178] sm:$0xff] %v449_v47  ;;  %452 = vst [vmem:[%s1672_s27 + $0x180] sm:$0xff] %v451_v48  ;;  %v459_v52 = vld [vmem:[%s1664_s26 + $0x620] sm:$0xff]  ;;  %v461_v53 = vld [vmem:[%s1664_s26 + $0x628] sm:$0xff] }
  0x2e   : > { %454 = vst [vmem:[%s1672_s27 + $0x188] sm:$0xff] %v453_v49  ;;  %456 = vst [vmem:[%s1672_s27 + $0x190] sm:$0xff] %v455_v50  ;;  %v463_v54 = vld [vmem:[%s1664_s26 + $0x630] sm:$0xff]  ;;  %v465_v55 = vld [vmem:[%s1664_s26 + $0x638] sm:$0xff] }
  0x2f   : > { %458 = vst [vmem:[%s1672_s27 + $0x198] sm:$0xff] %v457_v51  ;;  %460 = vst [vmem:[%s1672_s27 + $0x1a0] sm:$0xff] %v459_v52  ;;  %v467_v56 = vld [vmem:[%s1664_s26 + $0x640] sm:$0xff]  ;;  %v469_v57 = vld [vmem:[%s1664_s26 + $0x648] sm:$0xff] }
  0x30   : > { %462 = vst [vmem:[%s1672_s27 + $0x1a8] sm:$0xff] %v461_v53  ;;  %464 = vst [vmem:[%s1672_s27 + $0x1b0] sm:$0xff] %v463_v54  ;;  %v471_v58 = vld [vmem:[%s1664_s26 + $0x650] sm:$0xff]  ;;  %v473_v59 = vld [vmem:[%s1664_s26 + $0x658] sm:$0xff] }
  0x31   : > { %466 = vst [vmem:[%s1672_s27 + $0x1b8] sm:$0xff] %v465_v55  ;;  %468 = vst [vmem:[%s1672_s27 + $0x1c0] sm:$0xff] %v467_v56  ;;  %v475_v60 = vld [vmem:[%s1664_s26 + $0x660] sm:$0xff]  ;;  %v477_v61 = vld [vmem:[%s1664_s26 + $0x668] sm:$0xff] }
  0x32   : > { %470 = vst [vmem:[%s1672_s27 + $0x1c8] sm:$0xff] %v469_v57  ;;  %472 = vst [vmem:[%s1672_s27 + $0x1d0] sm:$0xff] %v471_v58  ;;  %v479_v62 = vld [vmem:[%s1664_s26 + $0x670] sm:$0xff]  ;;  %v481_v63 = vld [vmem:[%s1664_s26 + $0x678] sm:$0xff] }
  0x33   : > { %474 = vst [vmem:[%s1672_s27 + $0x1d8] sm:$0xff] %v473_v59  ;;  %476 = vst [vmem:[%s1672_s27 + $0x1e0] sm:$0xff] %v475_v60  ;;  %v483_v0 = vld [vmem:[%s1664_s26 + $0x800] sm:$0xff]  ;;  %v485_v1 = vld [vmem:[%s1664_s26 + $0x808] sm:$0xff] }
  0x34   : > { %478 = vst [vmem:[%s1672_s27 + $0x1e8] sm:$0xff] %v477_v61  ;;  %480 = vst [vmem:[%s1672_s27 + $0x1f0] sm:$0xff] %v479_v62  ;;  %v487_v2 = vld [vmem:[%s1664_s26 + $0x810] sm:$0xff]  ;;  %v489_v3 = vld [vmem:[%s1664_s26 + $0x818] sm:$0xff] }
  0x35   : > { %482 = vst [vmem:[%s1672_s27 + $0x1f8] sm:$0xff] %v481_v63  ;;  %484 = vst [vmem:[%s1672_s27 + $0x200] sm:$0xff] %v483_v0  ;;  %v491_v4 = vld [vmem:[%s1664_s26 + $0x820] sm:$0xff]  ;;  %v493_v5 = vld [vmem:[%s1664_s26 + $0x828] sm:$0xff] }
  0x36   : > { %486 = vst [vmem:[%s1672_s27 + $0x208] sm:$0xff] %v485_v1  ;;  %488 = vst [vmem:[%s1672_s27 + $0x210] sm:$0xff] %v487_v2  ;;  %v495_v6 = vld [vmem:[%s1664_s26 + $0x830] sm:$0xff]  ;;  %v497_v7 = vld [vmem:[%s1664_s26 + $0x838] sm:$0xff] }
  0x37   : > { %490 = vst [vmem:[%s1672_s27 + $0x218] sm:$0xff] %v489_v3  ;;  %492 = vst [vmem:[%s1672_s27 + $0x220] sm:$0xff] %v491_v4  ;;  %v499_v8 = vld [vmem:[%s1664_s26 + $0x840] sm:$0xff]  ;;  %v501_v9 = vld [vmem:[%s1664_s26 + $0x848] sm:$0xff] }
  0x38   : > { %494 = vst [vmem:[%s1672_s27 + $0x228] sm:$0xff] %v493_v5  ;;  %496 = vst [vmem:[%s1672_s27 + $0x230] sm:$0xff] %v495_v6  ;;  %v503_v10 = vld [vmem:[%s1664_s26 + $0x850] sm:$0xff]  ;;  %v505_v11 = vld [vmem:[%s1664_s26 + $0x858] sm:$0xff] }
  0x39   : > { %498 = vst [vmem:[%s1672_s27 + $0x238] sm:$0xff] %v497_v7  ;;  %500 = vst [vmem:[%s1672_s27 + $0x240] sm:$0xff] %v499_v8  ;;  %v507_v12 = vld [vmem:[%s1664_s26 + $0x860] sm:$0xff]  ;;  %v509_v13 = vld [vmem:[%s1664_s26 + $0x868] sm:$0xff] }
  0x3a   : > { %502 = vst [vmem:[%s1672_s27 + $0x248] sm:$0xff] %v501_v9  ;;  %504 = vst [vmem:[%s1672_s27 + $0x250] sm:$0xff] %v503_v10  ;;  %v511_v14 = vld [vmem:[%s1664_s26 + $0x870] sm:$0xff]  ;;  %v513_v15 = vld [vmem:[%s1664_s26 + $0x878] sm:$0xff] }
  0x3b   : > { %506 = vst [vmem:[%s1672_s27 + $0x258] sm:$0xff] %v505_v11  ;;  %508 = vst [vmem:[%s1672_s27 + $0x260] sm:$0xff] %v507_v12  ;;  %v515_v16 = vld [vmem:[%s1664_s26 + $0xa00] sm:$0xff]  ;;  %v517_v17 = vld [vmem:[%s1664_s26 + $0xa08] sm:$0xff] }
  0x3c   : > { %510 = vst [vmem:[%s1672_s27 + $0x268] sm:$0xff] %v509_v13  ;;  %512 = vst [vmem:[%s1672_s27 + $0x270] sm:$0xff] %v511_v14  ;;  %v519_v18 = vld [vmem:[%s1664_s26 + $0xa10] sm:$0xff]  ;;  %v521_v19 = vld [vmem:[%s1664_s26 + $0xa18] sm:$0xff] }
  0x3d   : > { %514 = vst [vmem:[%s1672_s27 + $0x278] sm:$0xff] %v513_v15  ;;  %516 = vst [vmem:[%s1672_s27 + $0x280] sm:$0xff] %v515_v16  ;;  %v523_v20 = vld [vmem:[%s1664_s26 + $0xa20] sm:$0xff]  ;;  %v525_v21 = vld [vmem:[%s1664_s26 + $0xa28] sm:$0xff] }
  0x3e   : > { %518 = vst [vmem:[%s1672_s27 + $0x288] sm:$0xff] %v517_v17  ;;  %520 = vst [vmem:[%s1672_s27 + $0x290] sm:$0xff] %v519_v18  ;;  %v527_v22 = vld [vmem:[%s1664_s26 + $0xa30] sm:$0xff]  ;;  %v529_v23 = vld [vmem:[%s1664_s26 + $0xa38] sm:$0xff] }
  0x3f   : > { %522 = vst [vmem:[%s1672_s27 + $0x298] sm:$0xff] %v521_v19  ;;  %524 = vst [vmem:[%s1672_s27 + $0x2a0] sm:$0xff] %v523_v20  ;;  %v531_v24 = vld [vmem:[%s1664_s26 + $0xa40] sm:$0xff]  ;;  %v533_v25 = vld [vmem:[%s1664_s26 + $0xa48] sm:$0xff] }
  0x40   : > { %526 = vst [vmem:[%s1672_s27 + $0x2a8] sm:$0xff] %v525_v21  ;;  %528 = vst [vmem:[%s1672_s27 + $0x2b0] sm:$0xff] %v527_v22  ;;  %v535_v26 = vld [vmem:[%s1664_s26 + $0xa50] sm:$0xff]  ;;  %v537_v27 = vld [vmem:[%s1664_s26 + $0xa58] sm:$0xff] }
  0x41   : > { %530 = vst [vmem:[%s1672_s27 + $0x2b8] sm:$0xff] %v529_v23  ;;  %532 = vst [vmem:[%s1672_s27 + $0x2c0] sm:$0xff] %v531_v24  ;;  %v539_v28 = vld [vmem:[%s1664_s26 + $0xa60] sm:$0xff]  ;;  %v541_v29 = vld [vmem:[%s1664_s26 + $0xa68] sm:$0xff] }
  0x42   : > { %534 = vst [vmem:[%s1672_s27 + $0x2c8] sm:$0xff] %v533_v25  ;;  %536 = vst [vmem:[%s1672_s27 + $0x2d0] sm:$0xff] %v535_v26  ;;  %v543_v30 = vld [vmem:[%s1664_s26 + $0xa70] sm:$0xff]  ;;  %v545_v31 = vld [vmem:[%s1664_s26 + $0xa78] sm:$0xff] }
  0x43   : > { %538 = vst [vmem:[%s1672_s27 + $0x2d8] sm:$0xff] %v537_v27  ;;  %540 = vst [vmem:[%s1672_s27 + $0x2e0] sm:$0xff] %v539_v28 }
  0x44   : > { %542 = vst [vmem:[%s1672_s27 + $0x2e8] sm:$0xff] %v541_v29  ;;  %544 = vst [vmem:[%s1672_s27 + $0x2f0] sm:$0xff] %v543_v30 }
  0x45   : > { %546 = vst [vmem:[%s1672_s27 + $0x2f8] sm:$0xff] %v545_v31 }
  0x46 PF: > { %p1535_p7 = scmp.ge.s32.totalorder %s1602_s14, 1  ;;  %p551_p8 = scmp.lt.s32.totalorder %s1602_s14, 5 }
  0x48   : > { %p552_p9 = pnand %p1535_p7, %p551_p8 }
  0x49   : > { %s558_s28 = sand.u32 (!%p552_p9), 1, %s1594_s12   ;;  %v1868_v32 = vld [vmem:[%s2623_s1] ss:$0 sm:$0xff] (!%p552_p9)  ;;  %vm954_vm0 = vcmask (!%p552_p9), 31744   ;;  %v1924_v4 = vld [vmem:[%s2623_s1 + $0x1] ss:$0 sm:$0xff] (!%p552_p9) }
  0x4a   : > { %555 = sbr.rel (%p552_p9) target bundleno = 188 (0xbc), region = 66  ;;  %v1873_v33 = vld [vmem:[%s2624_s2] ss:$0 sm:$0xff] (!%p552_p9)  ;;  %v1957_v23 = vld [vmem:[%s2624_s2 + $0x1] ss:$0 sm:$0xff] (!%p552_p9) }
  0x4b   : > { %s1863_s29 = smul.u32 (!%p552_p9), 768, %s558_s28 }
  0x4d   : > { %s1876_s7 = scalar_lea.vmem (!%p552_p9), [#allocation2], %s1863_s29  ;;  %s1908_s8 = scalar_lea.vmem (!%p552_p9), [#allocation3], %s1863_s29 }
  0x4e   : > { %v582_v34 = vld [vmem:[%s1876_s7] sm:$0xff] (!%p552_p9)  ;;  %v583_v35 = vld [vmem:[%s1876_s7 + $0x8] sm:$0xff] (!%p552_p9)  ;;  %v584_v36 = vld [vmem:[%s1876_s7 + $0x10] sm:$0xff] (!%p552_p9) }
  0x4f   : > { %v720_v37 = vmul.f32 (!%p552_p9), %v1868_v32, %v582_v34  ;;  %v721_v38 = vmul.f32 (!%p552_p9), %v1868_v32, %v583_v35  ;;  %v722_v39 = vmul.f32 (!%p552_p9), %v1868_v32, %v584_v36  ;;  %v585_v40 = vld [vmem:[%s1876_s7 + $0x18] sm:$0xff] (!%p552_p9)  ;;  %v586_v41 = vld [vmem:[%s1876_s7 + $0x20] sm:$0xff] (!%p552_p9)  ;;  %v587_v42 = vld [vmem:[%s1876_s7 + $0x28] sm:$0xff] (!%p552_p9) }
  0x50   : > { %v723_v43 = vmul.f32 (!%p552_p9), %v1868_v32, %v585_v40  ;;  %v724_v44 = vmul.f32 (!%p552_p9), %v1868_v32, %v586_v41  ;;  %v725_v45 = vmul.f32 (!%p552_p9), %v1868_v32, %v587_v42  ;;  %v588_v46 = vld [vmem:[%s1876_s7 + $0x30] sm:$0xff] (!%p552_p9)  ;;  %v589_v47 = vld [vmem:[%s1876_s7 + $0x38] sm:$0xff] (!%p552_p9)  ;;  %v590_v48 = vld [vmem:[%s1876_s7 + $0x40] sm:$0xff] (!%p552_p9) }
  0x51   : > { %v858_v49 = vadd.f32 %v1873_v33, %v720_v37  ;;  %v859_v50 = vadd.f32 %v1873_v33, %v721_v38  ;;  %v860_v51 = vadd.f32 %v1873_v33, %v722_v39  ;;  %v726_v52 = vmul.f32 %v1868_v32, %v588_v46  ;;  %v591_v53 = vld [vmem:[%s1876_s7 + $0x48] sm:$0xff]  ;;  %v592_v54 = vld [vmem:[%s1876_s7 + $0x50] sm:$0xff]  ;;  %v593_v55 = vld [vmem:[%s1876_s7 + $0x58] sm:$0xff] }
  0x52   : > { %v861_v56 = vadd.f32 %v1873_v33, %v723_v43  ;;  %v862_v57 = vadd.f32 %v1873_v33, %v724_v44  ;;  %v863_v58 = vadd.f32 %v1873_v33, %v725_v45  ;;  %v727_v59 = vmul.f32 %v1868_v32, %v589_v47  ;;  %v594_v60 = vld [vmem:[%s1876_s7 + $0x60] sm:$0xff]  ;;  %v595_v61 = vld [vmem:[%s1876_s7 + $0x68] sm:$0xff]  ;;  %v596_v62 = vld [vmem:[%s1876_s7 + $0x70] sm:$0xff] }
  0x53   : > { %955 = vst.msk [vmem:[%s1908_s8] sm:$0xff] %vm954_vm0, %v858_v49  ;;  %956 = vst.msk [vmem:[%s1908_s8 + $0x8] sm:$0xff] %vm954_vm0, %v859_v50  ;;  %v864_v63 = vadd.f32 %v1873_v33, %v726_v52  ;;  %v728_v0 = vmul.f32 %v1868_v32, %v590_v48  ;;  %v729_v1 = vmul.f32 %v1868_v32, %v591_v53  ;;  %v597_v3 = vld [vmem:[%s1876_s7 + $0x78] sm:$0xff]  ;;  %v598_v9 = vld [vmem:[%s1876_s7 + $0x80] sm:$0xff] }
  0x54   : > { %957 = vst.msk [vmem:[%s1908_s8 + $0x10] sm:$0xff] %vm954_vm0, %v860_v51  ;;  %v730_v2 = vmul.f32 %v1868_v32, %v592_v54  ;;  %958 = vst.msk [vmem:[%s1908_s8 + $0x18] sm:$0xff] %vm954_vm0, %v861_v56  ;;  %v865_v5 = vadd.f32 %v1873_v33, %v727_v59  ;;  %v731_v6 = vmul.f32 %v1868_v32, %v593_v55  ;;  %v599_v10 = vld [vmem:[%s1876_s7 + $0x88] sm:$0xff]  ;;  %v600_v11 = vld [vmem:[%s1876_s7 + $0x90] sm:$0xff] }
  0x55   : > { %959 = vst.msk [vmem:[%s1908_s8 + $0x20] sm:$0xff] %vm954_vm0, %v862_v57  ;;  %960 = vst.msk [vmem:[%s1908_s8 + $0x28] sm:$0xff] %vm954_vm0, %v863_v58  ;;  %v732_v7 = vmul.f32 %v1868_v32, %v594_v60  ;;  %v733_v8 = vmul.f32 %v1868_v32, %v595_v61  ;;  %v866_v12 = vadd.f32 %v1873_v33, %v728_v0  ;;  %v601_v16 = vld [vmem:[%s1876_s7 + $0x98] sm:$0xff]  ;;  %v602_v17 = vld [vmem:[%s1876_s7 + $0xa0] sm:$0xff] }
  0x56   : > { %961 = vst.msk [vmem:[%s1908_s8 + $0x30] sm:$0xff] %vm954_vm0, %v864_v63  ;;  %v867_v13 = vadd.f32 %v1873_v33, %v729_v1  ;;  %v868_v14 = vadd.f32 %v1873_v33, %v730_v2  ;;  %v734_v15 = vmul.f32 %v1868_v32, %v596_v62  ;;  %v603_v18 = vld [vmem:[%s1876_s7 + $0xa8] sm:$0xff]  ;;  %962 = vst.msk [vmem:[%s1908_s8 + $0x38] sm:$0xff] %vm954_vm0, %v865_v5  ;;  %v604_v24 = vld [vmem:[%s1876_s7 + $0xb0] sm:$0xff] }
  0x57   : > { %v869_v19 = vadd.f32 %v1873_v33, %v731_v6  ;;  %v870_v20 = vadd.f32 %v1873_v33, %v732_v7  ;;  %v871_v21 = vadd.f32 %v1873_v33, %v733_v8  ;;  %v735_v22 = vmul.f32 %v1868_v32, %v597_v3  ;;  %963 = vst.msk [vmem:[%s1908_s8 + $0x40] sm:$0xff] %vm954_vm0, %v866_v12  ;;  %v605_v29 = vld [vmem:[%s1876_s7 + $0xb8] sm:$0xff]  ;;  %v606_v35 = vld [vmem:[%s1876_s7 + $0xc0] sm:$0xff]  ;;  %v607_v36 = vld [vmem:[%s1876_s7 + $0xc8] sm:$0xff] }
  0x58   : > { %964 = vst.msk [vmem:[%s1908_s8 + $0x48] sm:$0xff] %vm954_vm0, %v867_v13  ;;  %965 = vst.msk [vmem:[%s1908_s8 + $0x50] sm:$0xff] %vm954_vm0, %v868_v14  ;;  %v872_v25 = vadd.f32 %v1873_v33, %v734_v15  ;;  %v736_v26 = vmul.f32 %v1924_v4, %v598_v9  ;;  %v737_v27 = vmul.f32 %v1924_v4, %v599_v10  ;;  %v608_v37 = vld [vmem:[%s1876_s7 + $0xd0] sm:$0xff]  ;;  %v609_v41 = vld [vmem:[%s1876_s7 + $0xd8] sm:$0xff] }
  0x59   : > { %v738_v28 = vmul.f32 %v1924_v4, %v600_v11  ;;  %966 = vst.msk [vmem:[%s1908_s8 + $0x58] sm:$0xff] %vm954_vm0, %v869_v19  ;;  %967 = vst.msk [vmem:[%s1908_s8 + $0x60] sm:$0xff] %vm954_vm0, %v870_v20  ;;  %v873_v30 = vadd.f32 %v1873_v33, %v735_v22  ;;  %v739_v31 = vmul.f32 %v1924_v4, %v601_v16  ;;  %v610_v42 = vld [vmem:[%s1876_s7 + $0xe0] sm:$0xff]  ;;  %v611_v43 = vld [vmem:[%s1876_s7 + $0xe8] sm:$0xff] }
  0x5a   : > { %968 = vst.msk [vmem:[%s1908_s8 + $0x68] sm:$0xff] %vm954_vm0, %v871_v21  ;;  %v740_v32 = vmul.f32 %v1924_v4, %v602_v17  ;;  %v741_v34 = vmul.f32 %v1924_v4, %v603_v18  ;;  %969 = vst.msk [vmem:[%s1908_s8 + $0x70] sm:$0xff] %vm954_vm0, %v872_v25  ;;  %v874_v38 = vadd.f32 %v1957_v23, %v736_v26  ;;  %v612_v48 = vld [vmem:[%s1876_s7 + $0xf0] sm:$0xff]  ;;  %v613_v53 = vld [vmem:[%s1876_s7 + $0xf8] sm:$0xff] }
  0x5b   : > { %v875_v39 = vadd.f32 %v1957_v23, %v737_v27  ;;  %v876_v33 = vadd.f32 %v1957_v23, %v738_v28  ;;  %v742_v40 = vmul.f32 %v1924_v4, %v604_v24  ;;  %970 = vst.msk [vmem:[%s1908_s8 + $0x78] sm:$0xff] %vm954_vm0, %v873_v30  ;;  %v877_v44 = vadd.f32 %v1957_v23, %v739_v31  ;;  %v2014_v54 = vld [vmem:[%s2623_s1 + $0x2] ss:$0 sm:$0xff]  ;;  %v615_v60 = vld [vmem:[%s1876_s7 + $0x108] sm:$0xff]  ;;  %v616_v61 = vld [vmem:[%s1876_s7 + $0x110] sm:$0xff] }
  0x5c   : > { %v878_v45 = vadd.f32 %v1957_v23, %v740_v32  ;;  %v879_v46 = vadd.f32 %v1957_v23, %v741_v34  ;;  %v743_v47 = vmul.f32 %v1924_v4, %v605_v29  ;;  %971 = vst.msk [vmem:[%s1908_s8 + $0x80] sm:$0xff] %vm954_vm0, %v874_v38  ;;  %v744_v50 = vmul.f32 %v1924_v4, %v606_v35  ;;  %v614_v59 = vld [vmem:[%s1876_s7 + $0x100] sm:$0xff]  ;;  %v617_v2 = vld [vmem:[%s1876_s7 + $0x118] sm:$0xff]  ;;  %v619_v5 = vld [vmem:[%s1876_s7 + $0x128] sm:$0xff] }
  0x5d   : > { %972 = vst.msk [vmem:[%s1908_s8 + $0x88] sm:$0xff] %vm954_vm0, %v875_v39  ;;  %973 = vst.msk [vmem:[%s1908_s8 + $0x90] sm:$0xff] %vm954_vm0, %v876_v33  ;;  %v880_v49 = vadd.f32 %v1957_v23, %v742_v40  ;;  %v745_v51 = vmul.f32 %v1924_v4, %v607_v36  ;;  %v746_v52 = vmul.f32 %v1924_v4, %v608_v37  ;;  %v618_v3 = vld [vmem:[%s1876_s7 + $0x120] sm:$0xff]  ;;  %v620_v11 = vld [vmem:[%s1876_s7 + $0x130] sm:$0xff] }
  0x5e   : > { %974 = vst.msk [vmem:[%s1908_s8 + $0x98] sm:$0xff] %vm954_vm0, %v877_v44  ;;  %975 = vst.msk [vmem:[%s1908_s8 + $0xa0] sm:$0xff] %vm954_vm0, %v878_v45  ;;  %v881_v55 = vadd.f32 %v1957_v23, %v743_v47  ;;  %v747_v56 = vmul.f32 %v1924_v4, %v609_v41  ;;  %v748_v57 = vmul.f32 %v1924_v4, %v610_v42  ;;  %v2047_v10 = vld [vmem:[%s2624_s2 + $0x2] ss:$0 sm:$0xff]  ;;  %v621_v15 = vld [vmem:[%s1876_s7 + $0x138] sm:$0xff] }
  0x5f   : > { %976 = vst.msk [vmem:[%s1908_s8 + $0xa8] sm:$0xff] %vm954_vm0, %v879_v46  ;;  %v749_v58 = vmul.f32 %v1924_v4, %v611_v43  ;;  %977 = vst.msk [vmem:[%s1908_s8 + $0xb0] sm:$0xff] %vm954_vm0, %v880_v49  ;;  %v882_v62 = vadd.f32 %v1957_v23, %v744_v50  ;;  %v883_v63 = vadd.f32 %v1957_v23, %v745_v51  ;;  %v622_v20 = vld [vmem:[%s1876_s7 + $0x140] sm:$0xff]  ;;  %v623_v21 = vld [vmem:[%s1876_s7 + $0x148] sm:$0xff] }
  0x60   : > { %v884_v0 = vadd.f32 %v1957_v23, %v746_v52  ;;  %v750_v1 = vmul.f32 %v1924_v4, %v612_v48  ;;  %978 = vst.msk [vmem:[%s1908_s8 + $0xb8] sm:$0xff] %vm954_vm0, %v881_v55  ;;  %v885_v6 = vadd.f32 %v1957_v23, %v747_v56  ;;  %v886_v7 = vadd.f32 %v1957_v23, %v748_v57  ;;  %v624_v22 = vld [vmem:[%s1876_s7 + $0x150] sm:$0xff]  ;;  %v625_v27 = vld [vmem:[%s1876_s7 + $0x158] sm:$0xff]  ;;  %v626_v28 = vld [vmem:[%s1876_s7 + $0x160] sm:$0xff] }
  0x61   : > { %v887_v8 = vadd.f32 %v1957_v23, %v749_v58  ;;  %v751_v9 = vmul.f32 %v1924_v4, %v613_v53  ;;  %979 = vst.msk [vmem:[%s1908_s8 + $0xc0] sm:$0xff] %vm954_vm0, %v882_v62  ;;  %980 = vst.msk [vmem:[%s1908_s8 + $0xc8] sm:$0xff] %vm954_vm0, %v883_v63  ;;  %v752_v4 = vmul.f32 %v2014_v54, %v614_v59  ;;  %v627_v29 = vld [vmem:[%s1876_s7 + $0x168] sm:$0xff]  ;;  %v628_v35 = vld [vmem:[%s1876_s7 + $0x170] sm:$0xff] }
  0x62   : > { %981 = vst.msk [vmem:[%s1908_s8 + $0xd0] sm:$0xff] %vm954_vm0, %v884_v0  ;;  %v888_v12 = vadd.f32 %v1957_v23, %v750_v1  ;;  %v753_v13 = vmul.f32 %v2014_v54, %v615_v60  ;;  %v754_v14 = vmul.f32 %v2014_v54, %v616_v61  ;;  %982 = vst.msk [vmem:[%s1908_s8 + $0xd8] sm:$0xff] %vm954_vm0, %v885_v6  ;;  %v629_v33 = vld [vmem:[%s1876_s7 + $0x178] sm:$0xff]  ;;  %v2104_v40 = vld [vmem:[%s2623_s1 + $0x3] ss:$0 sm:$0xff] }
  0x63   : > { %983 = vst.msk [vmem:[%s1908_s8 + $0xe0] sm:$0xff] %vm954_vm0, %v886_v7  ;;  %984 = vst.msk [vmem:[%s1908_s8 + $0xe8] sm:$0xff] %vm954_vm0, %v887_v8  ;;  %v889_v16 = vadd.f32 %v1957_v23, %v751_v9  ;;  %v755_v17 = vmul.f32 %v2014_v54, %v617_v2  ;;  %v756_v18 = vmul.f32 %v2014_v54, %v618_v3  ;;  %v630_v45 = vld [vmem:[%s1876_s7 + $0x180] sm:$0xff]  ;;  %v631_v46 = vld [vmem:[%s1876_s7 + $0x188] sm:$0xff] }
  0x64   : > { %v757_v19 = vmul.f32 %v2014_v54, %v619_v5  ;;  %985 = vst.msk [vmem:[%s1908_s8 + $0xf0] sm:$0xff] %vm954_vm0, %v888_v12  ;;  %v890_v24 = vadd.f32 %v2047_v10, %v752_v4  ;;  %v891_v25 = vadd.f32 %v2047_v10, %v753_v13  ;;  %v892_v23 = vadd.f32 %v2047_v10, %v754_v14  ;;  %v632_v47 = vld [vmem:[%s1876_s7 + $0x190] sm:$0xff]  ;;  %v633_v52 = vld [vmem:[%s1876_s7 + $0x198] sm:$0xff]  ;;  %v634_v53 = vld [vmem:[%s1876_s7 + $0x1a0] sm:$0xff] }
  0x65   : > { %v758_v26 = vmul.f32 %v2014_v54, %v620_v11  ;;  %986 = vst.msk [vmem:[%s1908_s8 + $0xf8] sm:$0xff] %vm954_vm0, %v889_v16  ;;  %v893_v30 = vadd.f32 %v2047_v10, %v755_v17  ;;  %v894_v31 = vadd.f32 %v2047_v10, %v756_v18  ;;  %v759_v34 = vmul.f32 %v2014_v54, %v621_v15  ;;  %v635_v55 = vld [vmem:[%s1876_s7 + $0x1a8] sm:$0xff]  ;;  %v2137_v60 = vld [vmem:[%s2624_s2 + $0x3] ss:$0 sm:$0xff]  ;;  %v636_v61 = vld [vmem:[%s1876_s7 + $0x1b0] sm:$0xff] }
  0x66   : > { %v895_v32 = vadd.f32 %v2047_v10, %v757_v19  ;;  %987 = vst.msk [vmem:[%s1908_s8 + $0x100] sm:$0xff] %vm954_vm0, %v890_v24  ;;  %988 = vst.msk [vmem:[%s1908_s8 + $0x108] sm:$0xff] %vm954_vm0, %v891_v25  ;;  %v760_v37 = vmul.f32 %v2014_v54, %v622_v20  ;;  %v761_v38 = vmul.f32 %v2014_v54, %v623_v21  ;;  %v637_v1 = vld [vmem:[%s1876_s7 + $0x1b8] sm:$0xff]  ;;  %v638_v7 = vld [vmem:[%s1876_s7 + $0x1c0] sm:$0xff] }
  0x67   : > { %989 = vst.msk [vmem:[%s1908_s8 + $0x110] sm:$0xff] %vm954_vm0, %v892_v23  ;;  %v896_v36 = vadd.f32 %v2047_v10, %v758_v26  ;;  %v762_v39 = vmul.f32 %v2014_v54, %v624_v22  ;;  %990 = vst.msk [vmem:[%s1908_s8 + $0x118] sm:$0xff] %vm954_vm0, %v893_v30  ;;  %v897_v41 = vadd.f32 %v2047_v10, %v759_v34  ;;  %v639_v8 = vld [vmem:[%s1876_s7 + $0x1c8] sm:$0xff]  ;;  %v640_v9 = vld [vmem:[%s1876_s7 + $0x1d0] sm:$0xff] }
  0x68   : > { %991 = vst.msk [vmem:[%s1908_s8 + $0x120] sm:$0xff] %vm954_vm0, %v894_v31  ;;  %992 = vst.msk [vmem:[%s1908_s8 + $0x128] sm:$0xff] %vm954_vm0, %v895_v32  ;;  %v763_v42 = vmul.f32 %v2014_v54, %v625_v27  ;;  %v764_v43 = vmul.f32 %v2014_v54, %v626_v28  ;;  %v765_v44 = vmul.f32 %v2014_v54, %v627_v29  ;;  %v641_v13 = vld [vmem:[%s1876_s7 + $0x1d8] sm:$0xff]  ;;  %v642_v14 = vld [vmem:[%s1876_s7 + $0x1e0] sm:$0xff] }
  0x69   : > { %993 = vst.msk [vmem:[%s1908_s8 + $0x130] sm:$0xff] %vm954_vm0, %v896_v36  ;;  %v898_v48 = vadd.f32 %v2047_v10, %v760_v37  ;;  %v899_v49 = vadd.f32 %v2047_v10, %v761_v38  ;;  %v900_v50 = vadd.f32 %v2047_v10, %v762_v39  ;;  %v766_v51 = vmul.f32 %v2014_v54, %v628_v35  ;;  %v643_v15 = vld [vmem:[%s1876_s7 + $0x1e8] sm:$0xff]  ;;  %v644_v20 = vld [vmem:[%s1876_s7 + $0x1f0] sm:$0xff]  ;;  %v645_v23 = vld [vmem:[%s1876_s7 + $0x1f8] sm:$0xff] }
  0x6a   : > { %994 = vst.msk [vmem:[%s1908_s8 + $0x138] sm:$0xff] %vm954_vm0, %v897_v41  ;;  %v901_v56 = vadd.f32 %v2047_v10, %v763_v42  ;;  %v902_v57 = vadd.f32 %v2047_v10, %v764_v43  ;;  %v903_v58 = vadd.f32 %v2047_v10, %v765_v44  ;;  %v767_v59 = vmul.f32 %v2014_v54, %v629_v33  ;;  %v2194_v26 = vld [vmem:[%s2623_s1 + $0x4] ss:$0 sm:$0xff]  ;;  %v647_v32 = vld [vmem:[%s1876_s7 + $0x208] sm:$0xff]  ;;  %v648_v34 = vld [vmem:[%s1876_s7 + $0x210] sm:$0xff] }
  0x6b   : > { %995 = vst.msk [vmem:[%s1908_s8 + $0x140] sm:$0xff] %vm954_vm0, %v898_v48  ;;  %996 = vst.msk [vmem:[%s1908_s8 + $0x148] sm:$0xff] %vm954_vm0, %v899_v49  ;;  %v904_v62 = vadd.f32 %v2047_v10, %v766_v51  ;;  %v768_v54 = vmul.f32 %v2104_v40, %v630_v45  ;;  %v769_v63 = vmul.f32 %v2104_v40, %v631_v46  ;;  %v646_v31 = vld [vmem:[%s1876_s7 + $0x200] sm:$0xff]  ;;  %v649_v39 = vld [vmem:[%s1876_s7 + $0x218] sm:$0xff] }
  0x6c   : > { %997 = vst.msk [vmem:[%s1908_s8 + $0x150] sm:$0xff] %vm954_vm0, %v900_v50  ;;  %v770_v0 = vmul.f32 %v2104_v40, %v632_v47  ;;  %998 = vst.msk [vmem:[%s1908_s8 + $0x158] sm:$0xff] %vm954_vm0, %v901_v56  ;;  %v905_v2 = vadd.f32 %v2047_v10, %v767_v59  ;;  %v771_v3 = vmul.f32 %v2104_v40, %v633_v52  ;;  %v650_v33 = vld [vmem:[%s1876_s7 + $0x220] sm:$0xff]  ;;  %v651_v41 = vld [vmem:[%s1876_s7 + $0x228] sm:$0xff] }
  0x6d   : > { %999 = vst.msk [vmem:[%s1908_s8 + $0x160] sm:$0xff] %vm954_vm0, %v902_v57  ;;  %1000 = vst.msk [vmem:[%s1908_s8 + $0x168] sm:$0xff] %vm954_vm0, %v903_v58  ;;  %v772_v5 = vmul.f32 %v2104_v40, %v634_v53  ;;  %v773_v6 = vmul.f32 %v2104_v40, %v635_v55  ;;  %v906_v11 = vadd.f32 %v2137_v60, %v768_v54  ;;  %v2227_v46 = vld [vmem:[%s2624_s2 + $0x4] ss:$0 sm:$0xff]  ;;  %v652_v47 = vld [vmem:[%s1876_s7 + $0x230] sm:$0xff] }
  0x6e   : > { %1001 = vst.msk [vmem:[%s1908_s8 + $0x170] sm:$0xff] %vm954_vm0, %v904_v62  ;;  %v907_v12 = vadd.f32 %v2137_v60, %v769_v63  ;;  %v908_v10 = vadd.f32 %v2137_v60, %v770_v0  ;;  %v774_v4 = vmul.f32 %v2104_v40, %v636_v61  ;;  %1002 = vst.msk [vmem:[%s1908_s8 + $0x178] sm:$0xff] %vm954_vm0, %v905_v2  ;;  %v653_v51 = vld [vmem:[%s1876_s7 + $0x238] sm:$0xff]  ;;  %v654_v57 = vld [vmem:[%s1876_s7 + $0x240] sm:$0xff] }
  0x6f   : > { %v909_v16 = vadd.f32 %v2137_v60, %v771_v3  ;;  %v910_v17 = vadd.f32 %v2137_v60, %v772_v5  ;;  %v911_v18 = vadd.f32 %v2137_v60, %v773_v6  ;;  %v775_v19 = vmul.f32 %v2104_v40, %v637_v1  ;;  %1003 = vst.msk [vmem:[%s1908_s8 + $0x180] sm:$0xff] %vm954_vm0, %v906_v11  ;;  %v655_v58 = vld [vmem:[%s1876_s7 + $0x248] sm:$0xff]  ;;  %v656_v59 = vld [vmem:[%s1876_s7 + $0x250] sm:$0xff]  ;;  %v657_v63 = vld [vmem:[%s1876_s7 + $0x258] sm:$0xff] }
  0x70   : > { %1004 = vst.msk [vmem:[%s1908_s8 + $0x188] sm:$0xff] %vm954_vm0, %v907_v12  ;;  %1005 = vst.msk [vmem:[%s1908_s8 + $0x190] sm:$0xff] %vm954_vm0, %v908_v10  ;;  %v912_v21 = vadd.f32 %v2137_v60, %v774_v4  ;;  %v776_v22 = vmul.f32 %v2104_v40, %v638_v7  ;;  %v777_v24 = vmul.f32 %v2104_v40, %v639_v8  ;;  %v658_v0 = vld [vmem:[%s1876_s7 + $0x260] sm:$0xff]  ;;  %v659_v1 = vld [vmem:[%s1876_s7 + $0x268] sm:$0xff] }
  0x71   : > { %v778_v25 = vmul.f32 %v2104_v40, %v640_v9  ;;  %1006 = vst.msk [vmem:[%s1908_s8 + $0x198] sm:$0xff] %vm954_vm0, %v909_v16  ;;  %1007 = vst.msk [vmem:[%s1908_s8 + $0x1a0] sm:$0xff] %vm954_vm0, %v910_v17  ;;  %v913_v27 = vadd.f32 %v2137_v60, %v775_v19  ;;  %v779_v28 = vmul.f32 %v2104_v40, %v641_v13  ;;  %v660_v7 = vld [vmem:[%s1876_s7 + $0x270] sm:$0xff]  ;;  %v661_v10 = vld [vmem:[%s1876_s7 + $0x278] sm:$0xff] }
  0x72   : > { %1008 = vst.msk [vmem:[%s1908_s8 + $0x1a8] sm:$0xff] %vm954_vm0, %v911_v18  ;;  %v780_v29 = vmul.f32 %v2104_v40, %v642_v14  ;;  %v781_v30 = vmul.f32 %v2104_v40, %v643_v15  ;;  %1009 = vst.msk [vmem:[%s1908_s8 + $0x1b0] sm:$0xff] %vm954_vm0, %v912_v21  ;;  %v914_v35 = vadd.f32 %v2137_v60, %v776_v22  ;;  %v662_v4 = vld [vmem:[%s1876_s7 + $0x280] sm:$0xff]  ;;  %v663_v18 = vld [vmem:[%s1876_s7 + $0x288] sm:$0xff] }
  0x73   : > { %v915_v36 = vadd.f32 %v2137_v60, %v777_v24  ;;  %v916_v37 = vadd.f32 %v2137_v60, %v778_v25  ;;  %v782_v38 = vmul.f32 %v2104_v40, %v644_v20  ;;  %1010 = vst.msk [vmem:[%s1908_s8 + $0x1b8] sm:$0xff] %vm954_vm0, %v913_v27  ;;  %v917_v42 = vadd.f32 %v2137_v60, %v779_v28  ;;  %v2295_v17 = vld [vmem:[%s2623_s1 + $0x5] ss:$0 sm:$0xff]  ;;  %v664_v19 = vld [vmem:[%s1876_s7 + $0x290] sm:$0xff]  ;;  %v665_v25 = vld [vmem:[%s1876_s7 + $0x298] sm:$0xff] }
  0x74   : > { %v918_v43 = vadd.f32 %v2137_v60, %v780_v29  ;;  %v919_v44 = vadd.f32 %v2137_v60, %v781_v30  ;;  %v783_v45 = vmul.f32 %v2104_v40, %v645_v23  ;;  %1011 = vst.msk [vmem:[%s1908_s8 + $0x1c0] sm:$0xff] %vm954_vm0, %v914_v35  ;;  %v784_v40 = vmul.f32 %v2194_v26, %v646_v31  ;;  %v666_v23 = vld [vmem:[%s1876_s7 + $0x2a0] sm:$0xff]  ;;  %v667_v27 = vld [vmem:[%s1876_s7 + $0x2a8] sm:$0xff] }
  0x75   : > { %1012 = vst.msk [vmem:[%s1908_s8 + $0x1c8] sm:$0xff] %vm954_vm0, %v915_v36  ;;  %1013 = vst.msk [vmem:[%s1908_s8 + $0x1d0] sm:$0xff] %vm954_vm0, %v916_v37  ;;  %v920_v48 = vadd.f32 %v2137_v60, %v782_v38  ;;  %v785_v49 = vmul.f32 %v2194_v26, %v647_v32  ;;  %v786_v50 = vmul.f32 %v2194_v26, %v648_v34  ;;  %v2317_v32 = vld [vmem:[%s2624_s2 + $0x5] ss:$0 sm:$0xff]  ;;  %v668_v34 = vld [vmem:[%s1876_s7 + $0x2b0] sm:$0xff] }
  0x76   : > { %1014 = vst.msk [vmem:[%s1908_s8 + $0x1d8] sm:$0xff] %vm954_vm0, %v917_v42  ;;  %1015 = vst.msk [vmem:[%s1908_s8 + $0x1e0] sm:$0xff] %vm954_vm0, %v918_v43  ;;  %v921_v52 = vadd.f32 %v2137_v60, %v783_v45  ;;  %v787_v53 = vmul.f32 %v2194_v26, %v649_v39  ;;  %v788_v55 = vmul.f32 %v2194_v26, %v650_v33  ;;  %v669_v38 = vld [vmem:[%s1876_s7 + $0x2b8] sm:$0xff]  ;;  %v670_v43 = vld [vmem:[%s1876_s7 + $0x2c0] sm:$0xff] }
  0x77   : > { %1016 = vst.msk [vmem:[%s1908_s8 + $0x1e8] sm:$0xff] %vm954_vm0, %v919_v44  ;;  %v789_v56 = vmul.f32 %v2194_v26, %v651_v41  ;;  %1017 = vst.msk [vmem:[%s1908_s8 + $0x1f0] sm:$0xff] %vm954_vm0, %v920_v48  ;;  %v922_v61 = vadd.f32 %v2227_v46, %v784_v40  ;;  %v923_v62 = vadd.f32 %v2227_v46, %v785_v49  ;;  %v671_v44 = vld [vmem:[%s1876_s7 + $0x2c8] sm:$0xff]  ;;  %v672_v45 = vld [vmem:[%s1876_s7 + $0x2d0] sm:$0xff] }
  0x78   : > { %v924_v60 = vadd.f32 %v2227_v46, %v786_v50  ;;  %v790_v54 = vmul.f32 %v2194_v26, %v652_v47  ;;  %1018 = vst.msk [vmem:[%s1908_s8 + $0x1f8] sm:$0xff] %vm954_vm0, %v921_v52  ;;  %v925_v2 = vadd.f32 %v2227_v46, %v787_v53  ;;  %v926_v3 = vadd.f32 %v2227_v46, %v788_v55  ;;  %v673_v49 = vld [vmem:[%s1876_s7 + $0x2d8] sm:$0xff]  ;;  %v674_v50 = vld [vmem:[%s1876_s7 + $0x2e0] sm:$0xff] }
  0x79   : > { %v927_v5 = vadd.f32 %v2227_v46, %v789_v56  ;;  %v791_v6 = vmul.f32 %v2194_v26, %v653_v51  ;;  %1019 = vst.msk [vmem:[%s1908_s8 + $0x200] sm:$0xff] %vm954_vm0, %v922_v61  ;;  %1020 = vst.msk [vmem:[%s1908_s8 + $0x208] sm:$0xff] %vm954_vm0, %v923_v62  ;;  %v792_v9 = vmul.f32 %v2194_v26, %v654_v57  ;;  %v675_v51 = vld [vmem:[%s1876_s7 + $0x2e8] sm:$0xff]  ;;  %v676_v57 = vld [vmem:[%s1876_s7 + $0x2f0] sm:$0xff] }
  0x7a   : > { %1021 = vst.msk [vmem:[%s1908_s8 + $0x210] sm:$0xff] %vm954_vm0, %v924_v60  ;;  %v928_v8 = vadd.f32 %v2227_v46, %v790_v54  ;;  %v793_v11 = vmul.f32 %v2194_v26, %v655_v58  ;;  %v794_v12 = vmul.f32 %v2194_v26, %v656_v59  ;;  %1022 = vst.msk [vmem:[%s1908_s8 + $0x218] sm:$0xff] %vm954_vm0, %v925_v2  ;;  %v677_v60 = vld [vmem:[%s1876_s7 + $0x2f8] sm:$0xff]  ;;  %s1553_s7 = sshll.u32 (%p1654_p5), %s1529_s15, 7 }
  0x7b   : > { %1023 = vst.msk [vmem:[%s1908_s8 + $0x220] sm:$0xff] %vm954_vm0, %v926_v3  ;;  %1024 = vst.msk [vmem:[%s1908_s8 + $0x228] sm:$0xff] %vm954_vm0, %v927_v5  ;;  %v929_v13 = vadd.f32 %v2227_v46, %v791_v6  ;;  %v795_v14 = vmul.f32 %v2194_v26, %v657_v63  ;;  %v796_v15 = vmul.f32 %v2194_v26, %v658_v0  ;;  %s2421_s20 = scalar_lea.vmem (%p1654_p5), %s2625_s3, %s1553_s7 }
  0x7c   : > { %v797_v16 = vmul.f32 %v2194_v26, %v659_v1  ;;  %1025 = vst.msk [vmem:[%s1908_s8 + $0x230] sm:$0xff] %vm954_vm0, %v928_v8  ;;  %v930_v20 = vadd.f32 %v2227_v46, %v792_v9  ;;  %v931_v21 = vadd.f32 %v2227_v46, %v793_v11  ;;  %v932_v22 = vadd.f32 %v2227_v46, %v794_v12 }
  0x7d   : > { %v798_v24 = vmul.f32 %v2194_v26, %v660_v7  ;;  %1026 = vst.msk [vmem:[%s1908_s8 + $0x238] sm:$0xff] %vm954_vm0, %v929_v13  ;;  %v933_v28 = vadd.f32 %v2227_v46, %v795_v14  ;;  %v934_v29 = vadd.f32 %v2227_v46, %v796_v15  ;;  %v799_v31 = vmul.f32 %v2194_v26, %v661_v10  ;;  %v1280_v13 = vld [vmem:[%s1908_s8 + $0x8] sm:$0xff] (%p1654_p5)  ;;  %v1282_v14 = vld [vmem:[%s1908_s8 + $0x10] sm:$0xff] (%p1654_p5)  ;;  %v1284_v15 = vld [vmem:[%s1908_s8 + $0x18] sm:$0xff] (%p1654_p5) }
  0x7e   : > { %v935_v30 = vadd.f32 %v2227_v46, %v797_v16  ;;  %1027 = vst.msk [vmem:[%s1908_s8 + $0x240] sm:$0xff] %vm954_vm0, %v930_v20  ;;  %1028 = vst.msk [vmem:[%s1908_s8 + $0x248] sm:$0xff] %vm954_vm0, %v931_v21  ;;  %v800_v26 = vmul.f32 %v2295_v17, %v662_v4  ;;  %v801_v36 = vmul.f32 %v2295_v17, %v663_v18  ;;  %v1278_v4 = vld [vmem:[%s1908_s8] sm:$0xff] (%p1654_p5)  ;;  %v1290_v18 = vld [vmem:[%s1908_s8 + $0x30] sm:$0xff] (%p1654_p5) }
  0x7f   : > { %1029 = vst.msk [vmem:[%s1908_s8 + $0x250] sm:$0xff] %vm954_vm0, %v932_v22  ;;  %v936_v35 = vadd.f32 %v2227_v46, %v798_v24  ;;  %v802_v37 = vmul.f32 %v2295_v17, %v664_v19  ;;  %1030 = vst.msk [vmem:[%s1908_s8 + $0x258] sm:$0xff] %vm954_vm0, %v933_v28  ;;  %v937_v39 = vadd.f32 %v2227_v46, %v799_v31  ;;  %v1286_v16 = vld [vmem:[%s1908_s8 + $0x20] sm:$0xff] (%p1654_p5)  ;;  %v1292_v19 = vld [vmem:[%s1908_s8 + $0x38] sm:$0xff] (%p1654_p5) }
  0x80   : > { %1031 = vst.msk [vmem:[%s1908_s8 + $0x260] sm:$0xff] %vm954_vm0, %v934_v29  ;;  %1032 = vst.msk [vmem:[%s1908_s8 + $0x268] sm:$0xff] %vm954_vm0, %v935_v30  ;;  %v803_v33 = vmul.f32 %v2295_v17, %v665_v25  ;;  %v804_v41 = vmul.f32 %v2295_v17, %v666_v23  ;;  %v805_v42 = vmul.f32 %v2295_v17, %v667_v27  ;;  %v1294_v20 = vld [vmem:[%s1908_s8 + $0x40] sm:$0xff] (%p1654_p5)  ;;  %v1296_v21 = vld [vmem:[%s1908_s8 + $0x48] sm:$0xff] (%p1654_p5) }
  0x81   : > { %1033 = vst.msk [vmem:[%s1908_s8 + $0x270] sm:$0xff] %vm954_vm0, %v936_v35  ;;  %v938_v47 = vadd.f32 %v2317_v32, %v800_v26  ;;  %v939_v48 = vadd.f32 %v2317_v32, %v801_v36  ;;  %v940_v46 = vadd.f32 %v2317_v32, %v802_v37  ;;  %v806_v40 = vmul.f32 %v2295_v17, %v668_v34  ;;  %v1298_v22 = vld [vmem:[%s1908_s8 + $0x50] sm:$0xff] (%p1654_p5)  ;;  %v1300_v24 = vld [vmem:[%s1908_s8 + $0x58] sm:$0xff] (%p1654_p5)  ;;  %v1302_v25 = vld [vmem:[%s1908_s8 + $0x60] sm:$0xff] (%p1654_p5) }
  0x82   : > { %1034 = vst.msk [vmem:[%s1908_s8 + $0x278] sm:$0xff] %vm954_vm0, %v937_v39  ;;  %v941_v52 = vadd.f32 %v2317_v32, %v803_v33  ;;  %v942_v53 = vadd.f32 %v2317_v32, %v804_v41  ;;  %v943_v55 = vadd.f32 %v2317_v32, %v805_v42  ;;  %v807_v56 = vmul.f32 %v2295_v17, %v669_v38  ;;  %v1304_v23 = vld [vmem:[%s1908_s8 + $0x68] sm:$0xff] (%p1654_p5)  ;;  %v1306_v27 = vld [vmem:[%s1908_s8 + $0x70] sm:$0xff] (%p1654_p5)  ;;  %v1308_v28 = vld [vmem:[%s1908_s8 + $0x78] sm:$0xff] (%p1654_p5) }
  0x83   : > { %1035 = vst.msk [vmem:[%s1908_s8 + $0x280] sm:$0xff] %vm954_vm0, %v938_v47  ;;  %1036 = vst.msk [vmem:[%s1908_s8 + $0x288] sm:$0xff] %vm954_vm0, %v939_v48  ;;  %v944_v58 = vadd.f32 %v2317_v32, %v806_v40  ;;  %v808_v59 = vmul.f32 %v2295_v17, %v670_v43  ;;  %v809_v61 = vmul.f32 %v2295_v17, %v671_v44  ;;  %v1310_v29 = vld [vmem:[%s1908_s8 + $0x80] sm:$0xff] (%p1654_p5)  ;;  %v1312_v30 = vld [vmem:[%s1908_s8 + $0x88] sm:$0xff] (%p1654_p5) }
  0x84   : > { %1037 = vst.msk [vmem:[%s1908_s8 + $0x290] sm:$0xff] %vm954_vm0, %v940_v46  ;;  %v810_v62 = vmul.f32 %v2295_v17, %v672_v45  ;;  %1038 = vst.msk [vmem:[%s1908_s8 + $0x298] sm:$0xff] %vm954_vm0, %v941_v52  ;;  %v945_v54 = vadd.f32 %v2317_v32, %v807_v56  ;;  %v811_v63 = vmul.f32 %v2295_v17, %v673_v49  ;;  %v1314_v31 = vld [vmem:[%s1908_s8 + $0x90] sm:$0xff] (%p1654_p5)  ;;  %v1318_v34 = vld [vmem:[%s1908_s8 + $0xa0] sm:$0xff] (%p1654_p5) }
  0x85   : > { %1039 = vst.msk [vmem:[%s1908_s8 + $0x2a0] sm:$0xff] %vm954_vm0, %v942_v53  ;;  %1040 = vst.msk [vmem:[%s1908_s8 + $0x2a8] sm:$0xff] %vm954_vm0, %v943_v55  ;;  %v812_v0 = vmul.f32 %v2295_v17, %v674_v50  ;;  %v813_v1 = vmul.f32 %v2295_v17, %v675_v51  ;;  %v946_v2 = vadd.f32 %v2317_v32, %v808_v59  ;;  %1057 = sbr.rel (!%p1654_p5) target bundleno = 188 (0xbc), region = 74  ;;  %v1320_v35 = vld [vmem:[%s1908_s8 + $0xa8] sm:$0xff] (%p1654_p5)  ;;  %v1322_v26 = vld [vmem:[%s1908_s8 + $0xb0] sm:$0xff] (%p1654_p5) }
  0x86   : > { %1041 = vst.msk [vmem:[%s1908_s8 + $0x2b0] sm:$0xff] %vm954_vm0, %v944_v58  ;;  %v947_v3 = vadd.f32 %v2317_v32, %v809_v61  ;;  %v948_v5 = vadd.f32 %v2317_v32, %v810_v62  ;;  %v814_v6 = vmul.f32 %v2295_v17, %v676_v57  ;;  %1042 = vst.msk [vmem:[%s1908_s8 + $0x2b8] sm:$0xff] %vm954_vm0, %v945_v54  ;;  %v1324_v36 = vld [vmem:[%s1908_s8 + $0xb8] sm:$0xff] (%p1654_p5)  ;;  %v1326_v37 = vld [vmem:[%s1908_s8 + $0xc0] sm:$0xff] (%p1654_p5) }
  0x87   : > { %v949_v7 = vadd.f32 %v2317_v32, %v811_v63  ;;  %v950_v8 = vadd.f32 %v2317_v32, %v812_v0  ;;  %v951_v9 = vadd.f32 %v2317_v32, %v813_v1  ;;  %v815_v11 = vmul.f32 %v2295_v17, %v677_v60  ;;  %1043 = vst.msk [vmem:[%s1908_s8 + $0x2c0] sm:$0xff] %vm954_vm0, %v946_v2  ;;  %v1288_v17 = vld [vmem:[%s1908_s8 + $0x28] sm:$0xff] (%p1654_p5)  ;;  %v1330_v39 = vld [vmem:[%s1908_s8 + $0xd0] sm:$0xff] (%p1654_p5)  ;;  %v1332_v33 = vld [vmem:[%s1908_s8 + $0xd8] sm:$0xff] (%p1654_p5) }
  0x88   : > { %1044 = vst.msk [vmem:[%s1908_s8 + $0x2c8] sm:$0xff] %vm954_vm0, %v947_v3  ;;  %1045 = vst.msk [vmem:[%s1908_s8 + $0x2d0] sm:$0xff] %vm954_vm0, %v948_v5  ;;  %v952_v12 = vadd.f32 %v2317_v32, %v814_v6  ;;  %v1328_v38 = vld [vmem:[%s1908_s8 + $0xc8] sm:$0xff] (%p1654_p5)  ;;  %v1334_v41 = vld [vmem:[%s1908_s8 + $0xe0] sm:$0xff] (%p1654_p5) }
  0x89   : > { %1046 = vst.msk [vmem:[%s1908_s8 + $0x2d8] sm:$0xff] %vm954_vm0, %v949_v7  ;;  %1047 = vst.msk [vmem:[%s1908_s8 + $0x2e0] sm:$0xff] %vm954_vm0, %v950_v8  ;;  %v953_v10 = vadd.f32 %v2317_v32, %v815_v11  ;;  %v1316_v32 = vld [vmem:[%s1908_s8 + $0x98] sm:$0xff] (%p1654_p5)  ;;  %v1336_v42 = vld [vmem:[%s1908_s8 + $0xe8] sm:$0xff] (%p1654_p5) }
  0x8a   : > { %1048 = vst.msk [vmem:[%s1908_s8 + $0x2e8] sm:$0xff] %vm954_vm0, %v951_v9  ;;  %1049 = vst.msk [vmem:[%s1908_s8 + $0x2f0] sm:$0xff] %vm954_vm0, %v952_v12  ;;  %v1338_v43 = vld [vmem:[%s1908_s8 + $0xf0] sm:$0xff] (%p1654_p5)  ;;  %v1340_v44 = vld [vmem:[%s1908_s8 + $0xf8] sm:$0xff] (%p1654_p5) }
  0x8b   : > { %1050 = vst.msk [vmem:[%s1908_s8 + $0x2f8] sm:$0xff] %vm954_vm0, %v953_v10  ;;  %1279 = vst [vmem:[%s2421_s20] sm:$0xff] (%p1654_p5), %v1278_v4  ;;  %v1342_v45 = vld [vmem:[%s1908_s8 + $0x100] sm:$0xff] (%p1654_p5)  ;;  %v1344_v47 = vld [vmem:[%s1908_s8 + $0x108] sm:$0xff] (%p1654_p5) }
  0x8c   : > { %1281 = vst [vmem:[%s2421_s20 + $0x8] sm:$0xff] %v1280_v13  ;;  %1283 = vst [vmem:[%s2421_s20 + $0x10] sm:$0xff] %v1282_v14  ;;  %v1346_v48 = vld [vmem:[%s1908_s8 + $0x110] sm:$0xff]  ;;  %v1348_v46 = vld [vmem:[%s1908_s8 + $0x118] sm:$0xff] }
  0x8d   : > { %1285 = vst [vmem:[%s2421_s20 + $0x18] sm:$0xff] %v1284_v15  ;;  %1287 = vst [vmem:[%s2421_s20 + $0x20] sm:$0xff] %v1286_v16  ;;  %v1350_v40 = vld [vmem:[%s1908_s8 + $0x120] sm:$0xff]  ;;  %v1352_v49 = vld [vmem:[%s1908_s8 + $0x128] sm:$0xff] }
  0x8e   : > { %1289 = vst [vmem:[%s2421_s20 + $0x28] sm:$0xff] %v1288_v17  ;;  %1291 = vst [vmem:[%s2421_s20 + $0x30] sm:$0xff] %v1290_v18  ;;  %v1354_v50 = vld [vmem:[%s1908_s8 + $0x130] sm:$0xff]  ;;  %v1356_v51 = vld [vmem:[%s1908_s8 + $0x138] sm:$0xff] }
  0x8f   : > { %1293 = vst [vmem:[%s2421_s20 + $0x38] sm:$0xff] %v1292_v19  ;;  %1295 = vst [vmem:[%s2421_s20 + $0x40] sm:$0xff] %v1294_v20  ;;  %v1358_v52 = vld [vmem:[%s1908_s8 + $0x140] sm:$0xff]  ;;  %v1360_v53 = vld [vmem:[%s1908_s8 + $0x148] sm:$0xff] }
  0x90   : > { %1297 = vst [vmem:[%s2421_s20 + $0x48] sm:$0xff] %v1296_v21  ;;  %1299 = vst [vmem:[%s2421_s20 + $0x50] sm:$0xff] %v1298_v22  ;;  %v1362_v55 = vld [vmem:[%s1908_s8 + $0x150] sm:$0xff]  ;;  %v1364_v56 = vld [vmem:[%s1908_s8 + $0x158] sm:$0xff] }
  0x91   : > { %1301 = vst [vmem:[%s2421_s20 + $0x58] sm:$0xff] %v1300_v24  ;;  %1303 = vst [vmem:[%s2421_s20 + $0x60] sm:$0xff] %v1302_v25  ;;  %v1366_v57 = vld [vmem:[%s1908_s8 + $0x160] sm:$0xff]  ;;  %v1368_v58 = vld [vmem:[%s1908_s8 + $0x168] sm:$0xff] }
  0x92   : > { %1305 = vst [vmem:[%s2421_s20 + $0x68] sm:$0xff] %v1304_v23  ;;  %1307 = vst [vmem:[%s2421_s20 + $0x70] sm:$0xff] %v1306_v27  ;;  %v1370_v59 = vld [vmem:[%s1908_s8 + $0x170] sm:$0xff]  ;;  %v1372_v61 = vld [vmem:[%s1908_s8 + $0x178] sm:$0xff] }
  0x93   : > { %1309 = vst [vmem:[%s2421_s20 + $0x78] sm:$0xff] %v1308_v28  ;;  %1311 = vst [vmem:[%s2421_s20 + $0x200] sm:$0xff] %v1310_v29  ;;  %v1374_v62 = vld [vmem:[%s1908_s8 + $0x180] sm:$0xff]  ;;  %v1376_v60 = vld [vmem:[%s1908_s8 + $0x188] sm:$0xff] }
  0x94   : > { %1313 = vst [vmem:[%s2421_s20 + $0x208] sm:$0xff] %v1312_v30  ;;  %1315 = vst [vmem:[%s2421_s20 + $0x210] sm:$0xff] %v1314_v31  ;;  %v1378_v54 = vld [vmem:[%s1908_s8 + $0x190] sm:$0xff]  ;;  %v1380_v63 = vld [vmem:[%s1908_s8 + $0x198] sm:$0xff] }
  0x95   : > { %1317 = vst [vmem:[%s2421_s20 + $0x218] sm:$0xff] %v1316_v32  ;;  %1319 = vst [vmem:[%s2421_s20 + $0x220] sm:$0xff] %v1318_v34  ;;  %v1382_v0 = vld [vmem:[%s1908_s8 + $0x1a0] sm:$0xff]  ;;  %v1384_v1 = vld [vmem:[%s1908_s8 + $0x1a8] sm:$0xff] }
  0x96   : > { %1321 = vst [vmem:[%s2421_s20 + $0x228] sm:$0xff] %v1320_v35  ;;  %1323 = vst [vmem:[%s2421_s20 + $0x230] sm:$0xff] %v1322_v26  ;;  %v1386_v2 = vld [vmem:[%s1908_s8 + $0x1b0] sm:$0xff]  ;;  %v1388_v3 = vld [vmem:[%s1908_s8 + $0x1b8] sm:$0xff] }
  0x97   : > { %1325 = vst [vmem:[%s2421_s20 + $0x238] sm:$0xff] %v1324_v36  ;;  %1327 = vst [vmem:[%s2421_s20 + $0x240] sm:$0xff] %v1326_v37  ;;  %v1390_v5 = vld [vmem:[%s1908_s8 + $0x1c0] sm:$0xff]  ;;  %v1392_v6 = vld [vmem:[%s1908_s8 + $0x1c8] sm:$0xff] }
  0x98   : > { %1329 = vst [vmem:[%s2421_s20 + $0x248] sm:$0xff] %v1328_v38  ;;  %1331 = vst [vmem:[%s2421_s20 + $0x250] sm:$0xff] %v1330_v39  ;;  %v1394_v7 = vld [vmem:[%s1908_s8 + $0x1d0] sm:$0xff]  ;;  %v1396_v8 = vld [vmem:[%s1908_s8 + $0x1d8] sm:$0xff] }
  0x99   : > { %1333 = vst [vmem:[%s2421_s20 + $0x258] sm:$0xff] %v1332_v33  ;;  %1335 = vst [vmem:[%s2421_s20 + $0x260] sm:$0xff] %v1334_v41  ;;  %v1398_v9 = vld [vmem:[%s1908_s8 + $0x1e0] sm:$0xff]  ;;  %v1400_v11 = vld [vmem:[%s1908_s8 + $0x1e8] sm:$0xff] }
  0x9a   : > { %1337 = vst [vmem:[%s2421_s20 + $0x268] sm:$0xff] %v1336_v42  ;;  %1339 = vst [vmem:[%s2421_s20 + $0x270] sm:$0xff] %v1338_v43  ;;  %v1402_v12 = vld [vmem:[%s1908_s8 + $0x1f0] sm:$0xff]  ;;  %v1404_v10 = vld [vmem:[%s1908_s8 + $0x1f8] sm:$0xff] }
  0x9b   : > { %1341 = vst [vmem:[%s2421_s20 + $0x278] sm:$0xff] %v1340_v44  ;;  %1343 = vst [vmem:[%s2421_s20 + $0x400] sm:$0xff] %v1342_v45  ;;  %v1406_v4 = vld [vmem:[%s1908_s8 + $0x200] sm:$0xff]  ;;  %v1408_v13 = vld [vmem:[%s1908_s8 + $0x208] sm:$0xff] }
  0x9c   : > { %1345 = vst [vmem:[%s2421_s20 + $0x408] sm:$0xff] %v1344_v47  ;;  %1347 = vst [vmem:[%s2421_s20 + $0x410] sm:$0xff] %v1346_v48  ;;  %v1410_v14 = vld [vmem:[%s1908_s8 + $0x210] sm:$0xff]  ;;  %v1412_v15 = vld [vmem:[%s1908_s8 + $0x218] sm:$0xff] }
  0x9d   : > { %1349 = vst [vmem:[%s2421_s20 + $0x418] sm:$0xff] %v1348_v46  ;;  %1351 = vst [vmem:[%s2421_s20 + $0x420] sm:$0xff] %v1350_v40  ;;  %v1414_v16 = vld [vmem:[%s1908_s8 + $0x220] sm:$0xff]  ;;  %v1416_v17 = vld [vmem:[%s1908_s8 + $0x228] sm:$0xff] }
  0x9e   : > { %1353 = vst [vmem:[%s2421_s20 + $0x428] sm:$0xff] %v1352_v49  ;;  %1355 = vst [vmem:[%s2421_s20 + $0x430] sm:$0xff] %v1354_v50  ;;  %v1418_v18 = vld [vmem:[%s1908_s8 + $0x230] sm:$0xff]  ;;  %v1420_v19 = vld [vmem:[%s1908_s8 + $0x238] sm:$0xff] }
  0x9f   : > { %1357 = vst [vmem:[%s2421_s20 + $0x438] sm:$0xff] %v1356_v51  ;;  %1359 = vst [vmem:[%s2421_s20 + $0x440] sm:$0xff] %v1358_v52  ;;  %v1422_v20 = vld [vmem:[%s1908_s8 + $0x240] sm:$0xff]  ;;  %v1424_v21 = vld [vmem:[%s1908_s8 + $0x248] sm:$0xff] }
  0xa0   : > { %1361 = vst [vmem:[%s2421_s20 + $0x448] sm:$0xff] %v1360_v53  ;;  %1363 = vst [vmem:[%s2421_s20 + $0x450] sm:$0xff] %v1362_v55  ;;  %v1426_v22 = vld [vmem:[%s1908_s8 + $0x250] sm:$0xff]  ;;  %v1428_v24 = vld [vmem:[%s1908_s8 + $0x258] sm:$0xff] }
  0xa1   : > { %1365 = vst [vmem:[%s2421_s20 + $0x458] sm:$0xff] %v1364_v56  ;;  %1367 = vst [vmem:[%s2421_s20 + $0x460] sm:$0xff] %v1366_v57  ;;  %v1430_v25 = vld [vmem:[%s1908_s8 + $0x260] sm:$0xff]  ;;  %v1432_v23 = vld [vmem:[%s1908_s8 + $0x268] sm:$0xff] }
  0xa2   : > { %1369 = vst [vmem:[%s2421_s20 + $0x468] sm:$0xff] %v1368_v58  ;;  %1371 = vst [vmem:[%s2421_s20 + $0x470] sm:$0xff] %v1370_v59  ;;  %v1434_v27 = vld [vmem:[%s1908_s8 + $0x270] sm:$0xff]  ;;  %v1436_v28 = vld [vmem:[%s1908_s8 + $0x278] sm:$0xff] }
  0xa3   : > { %1373 = vst [vmem:[%s2421_s20 + $0x478] sm:$0xff] %v1372_v61  ;;  %1375 = vst [vmem:[%s2421_s20 + $0x600] sm:$0xff] %v1374_v62  ;;  %v1438_v29 = vld [vmem:[%s1908_s8 + $0x280] sm:$0xff]  ;;  %v1440_v30 = vld [vmem:[%s1908_s8 + $0x288] sm:$0xff] }
  0xa4   : > { %1377 = vst [vmem:[%s2421_s20 + $0x608] sm:$0xff] %v1376_v60  ;;  %1379 = vst [vmem:[%s2421_s20 + $0x610] sm:$0xff] %v1378_v54  ;;  %v1442_v31 = vld [vmem:[%s1908_s8 + $0x290] sm:$0xff]  ;;  %v1444_v32 = vld [vmem:[%s1908_s8 + $0x298] sm:$0xff] }
  0xa5   : > { %1381 = vst [vmem:[%s2421_s20 + $0x618] sm:$0xff] %v1380_v63  ;;  %1383 = vst [vmem:[%s2421_s20 + $0x620] sm:$0xff] %v1382_v0  ;;  %v1446_v34 = vld [vmem:[%s1908_s8 + $0x2a0] sm:$0xff]  ;;  %v1448_v35 = vld [vmem:[%s1908_s8 + $0x2a8] sm:$0xff] }
  0xa6   : > { %1385 = vst [vmem:[%s2421_s20 + $0x628] sm:$0xff] %v1384_v1  ;;  %1387 = vst [vmem:[%s2421_s20 + $0x630] sm:$0xff] %v1386_v2  ;;  %v1450_v26 = vld [vmem:[%s1908_s8 + $0x2b0] sm:$0xff]  ;;  %v1452_v36 = vld [vmem:[%s1908_s8 + $0x2b8] sm:$0xff] }
  0xa7   : > { %1389 = vst [vmem:[%s2421_s20 + $0x638] sm:$0xff] %v1388_v3  ;;  %1391 = vst [vmem:[%s2421_s20 + $0x640] sm:$0xff] %v1390_v5  ;;  %v1454_v37 = vld [vmem:[%s1908_s8 + $0x2c0] sm:$0xff]  ;;  %v1456_v38 = vld [vmem:[%s1908_s8 + $0x2c8] sm:$0xff] }
  0xa8   : > { %1393 = vst [vmem:[%s2421_s20 + $0x648] sm:$0xff] %v1392_v6  ;;  %1395 = vst [vmem:[%s2421_s20 + $0x650] sm:$0xff] %v1394_v7  ;;  %v1458_v39 = vld [vmem:[%s1908_s8 + $0x2d0] sm:$0xff]  ;;  %v1460_v33 = vld [vmem:[%s1908_s8 + $0x2d8] sm:$0xff] }
  0xa9   : > { %1397 = vst [vmem:[%s2421_s20 + $0x658] sm:$0xff] %v1396_v8  ;;  %1399 = vst [vmem:[%s2421_s20 + $0x660] sm:$0xff] %v1398_v9  ;;  %v1462_v41 = vld [vmem:[%s1908_s8 + $0x2e0] sm:$0xff]  ;;  %v1464_v42 = vld [vmem:[%s1908_s8 + $0x2e8] sm:$0xff] }
  0xaa   : > { %1401 = vst [vmem:[%s2421_s20 + $0x668] sm:$0xff] %v1400_v11  ;;  %1403 = vst [vmem:[%s2421_s20 + $0x670] sm:$0xff] %v1402_v12  ;;  %v1466_v43 = vld [vmem:[%s1908_s8 + $0x2f0] sm:$0xff]  ;;  %v1468_v44 = vld [vmem:[%s1908_s8 + $0x2f8] sm:$0xff] }
  0xab   : > { %1405 = vst [vmem:[%s2421_s20 + $0x678] sm:$0xff] %v1404_v10  ;;  %1407 = vst [vmem:[%s2421_s20 + $0x800] sm:$0xff] %v1406_v4 }
  0xac   : > { %1409 = vst [vmem:[%s2421_s20 + $0x808] sm:$0xff] %v1408_v13  ;;  %1411 = vst [vmem:[%s2421_s20 + $0x810] sm:$0xff] %v1410_v14 }
  0xad   : > { %1413 = vst [vmem:[%s2421_s20 + $0x818] sm:$0xff] %v1412_v15  ;;  %1415 = vst [vmem:[%s2421_s20 + $0x820] sm:$0xff] %v1414_v16 }
  0xae   : > { %1417 = vst [vmem:[%s2421_s20 + $0x828] sm:$0xff] %v1416_v17  ;;  %1419 = vst [vmem:[%s2421_s20 + $0x830] sm:$0xff] %v1418_v18 }
  0xaf   : > { %1421 = vst [vmem:[%s2421_s20 + $0x838] sm:$0xff] %v1420_v19  ;;  %1423 = vst [vmem:[%s2421_s20 + $0x840] sm:$0xff] %v1422_v20 }
  0xb0   : > { %1425 = vst [vmem:[%s2421_s20 + $0x848] sm:$0xff] %v1424_v21  ;;  %1427 = vst [vmem:[%s2421_s20 + $0x850] sm:$0xff] %v1426_v22 }
  0xb1   : > { %1429 = vst [vmem:[%s2421_s20 + $0x858] sm:$0xff] %v1428_v24  ;;  %1431 = vst [vmem:[%s2421_s20 + $0x860] sm:$0xff] %v1430_v25 }
  0xb2   : > { %1433 = vst [vmem:[%s2421_s20 + $0x868] sm:$0xff] %v1432_v23  ;;  %1435 = vst [vmem:[%s2421_s20 + $0x870] sm:$0xff] %v1434_v27 }
  0xb3   : > { %1437 = vst [vmem:[%s2421_s20 + $0x878] sm:$0xff] %v1436_v28  ;;  %1439 = vst [vmem:[%s2421_s20 + $0xa00] sm:$0xff] %v1438_v29 }
  0xb4   : > { %1441 = vst [vmem:[%s2421_s20 + $0xa08] sm:$0xff] %v1440_v30  ;;  %1443 = vst [vmem:[%s2421_s20 + $0xa10] sm:$0xff] %v1442_v31 }
  0xb5   : > { %1445 = vst [vmem:[%s2421_s20 + $0xa18] sm:$0xff] %v1444_v32  ;;  %1447 = vst [vmem:[%s2421_s20 + $0xa20] sm:$0xff] %v1446_v34 }
  0xb6   : > { %1449 = vst [vmem:[%s2421_s20 + $0xa28] sm:$0xff] %v1448_v35  ;;  %1451 = vst [vmem:[%s2421_s20 + $0xa30] sm:$0xff] %v1450_v26 }
  0xb7   : > { %1453 = vst [vmem:[%s2421_s20 + $0xa38] sm:$0xff] %v1452_v36  ;;  %1455 = vst [vmem:[%s2421_s20 + $0xa40] sm:$0xff] %v1454_v37 }
  0xb8   : > { %1457 = vst [vmem:[%s2421_s20 + $0xa48] sm:$0xff] %v1456_v38  ;;  %1459 = vst [vmem:[%s2421_s20 + $0xa50] sm:$0xff] %v1458_v39 }
  0xb9   : > { %1461 = vst [vmem:[%s2421_s20 + $0xa58] sm:$0xff] %v1460_v33  ;;  %1463 = vst [vmem:[%s2421_s20 + $0xa60] sm:$0xff] %v1462_v41 }
  0xba   : > { %1465 = vst [vmem:[%s2421_s20 + $0xa68] sm:$0xff] %v1464_v42  ;;  %1467 = vst [vmem:[%s2421_s20 + $0xa70] sm:$0xff] %v1466_v43 }
  0xbb   : > { %1469 = vst [vmem:[%s2421_s20 + $0xa78] sm:$0xff] %v1468_v44 }
  0xbc PF: > { %p10_p10 = scmp.ge.s32.totalorder %s1641_s16, 6   ;;  %s2627_s12 = smov %s1598_s13 }
  0xbd   : > { %s2628_s13 = smov %s1652_s19  ;;  %s2629_s14 = smov %s1641_s16 }
  0xbe   :  { %12 = sbr.rel (!%p10_p10) target bundleno = 2 (0x2), region = 143 }

// kernel: multiscale_temporal_conv.2
= control target key start
LH: loop header
LB: loop body
LE: loop exit
PB: predicated region body
PF: predicated region fallthrough
CT: control target
= control target key end

     0   :  { %s4683_s18 = smov 0   ;;  %s4685_s19 = smov 0   ;;  %s7233_s0 = inlined_call_operand.vmem [shape: bf16[512,4], index: 0, kind: input, shape index: {}]   ;;  %s7234_s1 = inlined_call_operand.vmem [shape: bf16[4,24], index: 1, kind: input, shape index: {}]   ;;  %s7235_s2 = inlined_call_operand.vmem [shape: f32[1,24], index: 2, kind: input, shape index: {}]   ;;  %s7236_s3 = inlined_call_operand.vmem [shape: bf16[4,12,4], index: 3, kind: input, shape index: {}]   ;;  %s7237_s4 = inlined_call_operand.vmem [shape: f32[6,512,4], index: 4, kind: output, shape index: {0}]   ;;  %s7238_s5 = inlined_call_operand.vmem [shape: f32[4,12,4], index: 5, kind: output, shape index: {1}]  }
   0x1   :  { %s4687_s20 = smov 0  }
   0x2 LB: > { %s4696_s21 = sadd.s32 4294967295, %s4644_s20   ;;  %s4698_s22 = sadd.s32 1, %s4644_s20   ;;  %s4644_s20 = sphi %s4687_s20, %s7659_s20   ;;  %s4640_s19 = sphi %s4685_s19, %s7658_s19   ;;  %s4636_s18 = sphi %s4683_s18, %s7657_s18  }
   0x3   : > { %s109_s23 = ssub.s32 %s4644_s20, %s4698_s22  ;;  %s112_s24 = sadd.s32 1, %s4640_s19 }
   0x4   : > { %p110_p0 = scmp.eq.s32.totalorder %s109_s23, 0  ;;  %p122_p1 = scmp.ne.s32.totalorder %s4640_s19, %s4636_s18 }
   0x5   : > { %p123_p2 = scmp.eq.s32.totalorder %s4696_s21, 3  ;;  %p3965_p3 = scmp.ge.s32.totalorder %s4644_s20, 1 }
   0x6   : > { %s4706_s25 = scalar_select %p110_p0, %s4640_s19, %s112_s24  }
   0x7   : > { %p4708_p4 = por %p123_p2, %p122_p1  ;;  %p191_p5 = scmp.lt.s32.totalorder %s4644_s20, 5 }
   0x9   : > { %p192_p6 = pnand %p3965_p3, %p191_p5 }
   0xb   : > { %195 = sbr.rel (%p192_p6) target bundleno = 850 (0x352), region = 36 }
  0x12   : > { %v252_v0 = vld [vmem:[%s7234_s1] sm:$0x3]  ;;  %vm7247_vm0 = vcmask 1041408   ;;  %s3966_s29 = sshll.u32 %s4696_s21, 4  ;;  %vm300_vm1 = vcmask 31744   ;;  %s4646_s11 = smov 124  }
  0x13   : > { %4252 = vmatprep.subr.msk.bf16.mxu0 %vm7247_vm0, %v252_v0  ;;  %4253 = vmatprep.subr.msk.bf16.mxu1 %vm7247_vm0, %v252_v0  ;;  %v327_v1 = vsel %vm7247_vm0, %v252_v0, 0  ;;  %p224_p7 = scmp.lt.s32.totalorder %s3966_s29, 63  ;;  %v3970_v17 = vld [vmem:[%s7235_s2] ss:$0 sm:$0xff]  ;;  %s4647_s12 = smov 120   ;;  %vm1142_vm7 = vcmask 1045504  }
  0x14   : > { %4161 = vmatpush3.bf16.msra.mxu0 %v327_v1  ;;  %4251 = vmatpush3.bf16.msra.mxu1 %v327_v1  ;;  %s4648_s13 = smov 116   ;;  %s4649_s14 = smov 4   ;;  %vm3339_vm8 = vcmask 195744  }
  0x15   : > { %s7661_s29 = smov (!%p224_p7, %s3966_s29), 63  ;;  %s4650_s15 = smov 8  }
  0x16   : > { %s3967_s30 = sshll.u32 %s7661_s29, 2  ;;  %s4652_s6 = smov 108  }
  0x17   : > { %s227_s8 = scalar_lea.vmem %s7233_s0, %s3967_s30  ;;  %s4651_s30 = smov 112  }
  0x18   : > { %v4610_v2 = vld [vmem:[%s227_s8] sm:$0xff]   ;;  %v4612_v4 = vld [vmem:[%s227_s8 + $0x8] sm:$0xff]   ;;  %v4614_v6 = vld [vmem:[%s227_s8 + $0x10] sm:$0xff]   ;;  %s213_s7 = sand.u32 1, %s4636_s18   ;;  %p230_p8 = scmp.lt.s32.totalorder %s4696_s21, 3 }
  0x19   : > { %v4611_v3 = vld [vmem:[%s227_s8 + $0x20] sm:$0xff]   ;;  %4162 = vmatprep.mubr.msk.bf16.mxu0 %vm300_vm1, %v4610_v2  ;;  %v4613_v5 = vld [vmem:[%s227_s8 + $0x28] sm:$0xff]   ;;  %v4615_v7 = vld [vmem:[%s227_s8 + $0x30] sm:$0xff]  }
  0x1a   : > { %4170 = vmatprep.mubr.msk.bf16.mxu1 %vm300_vm1, %v4611_v3  ;;  %4163 = vmatmul.mubr.msk.bf16.vlgmr.msra.gmra.mrb[0].mxu0 %vm300_vm1, %v4612_v4  ;;  %v4616_v8 = vld [vmem:[%s227_s8 + $0x18] sm:$0xff]   ;;  %v426_v3 = vlaneseq  ;;  %s231_s9 = scalar_select %p230_p8, %s4696_s21, 3 }
  0x1b   : > { %4171 = vmatmul.mubr.msk.bf16.vlgmr.msra.gmra.mrb[0].mxu1 %vm300_vm1, %v4613_v5  ;;  %4166 = vmatprep.mubr.msk.bf16.mxu0 %vm300_vm1, %v4614_v6  ;;  %v4617_v9 = vld [vmem:[%s227_s8 + $0x38] sm:$0xff]   ;;  %s4258_s8 = smul.u32 768, %s213_s7 }
  0x1c   : > { %4174 = vmatprep.mubr.msk.bf16.mxu1 %vm300_vm1, %v4615_v7  ;;  %v4862_v4 = vshrl.u32 %v426_v3, 7  ;;  %s4113_s10 = sshll.u32 %s231_s9, 4 }
  0x1d   : > { %s6390_s18 = scalar_lea.vmem [#allocation2], %s4258_s8 }
  0x1e   : > { %v428_v5 = vadd.s32 8, %v4862_v4  ;;  %vm7347_vm2 = vcmp.lt.s32.totalorder %v4862_v4, 7  ;;  %vm1494_vm13 = vcmp.lt.s32.totalorder %v4862_v4, 6  ;;  %vm795_vm14 = vcmp.lt.s32.totalorder %v4862_v4, 1 }
  0x20   : > { %v4873_v6 = vand.u32 15, %v428_v5 }
  0x22   : > { %4167 = vmatmul.mubr.msk.bf16.gmra.mrb[4].mxu0 %vm300_vm1, %v4616_v8  ;;  %7401 = vst [vmem:[#allocation33_spill] sm:$0xff] %v4873_v6  ;;  %vm7326_vm3 = vcmp.lt.s32.totalorder %v4873_v6, 15  ;;  %vm716_vm15 = vcmp.lt.s32.totalorder %v4873_v6, 14 }
  0x23   : > { %4175 = vmatmul.mubr.msk.bf16.gmra.mrb[4].mxu1 %vm300_vm1, %v4617_v9 }
  0xed   : > { %v4164_v10 = vpop.f32.mrb[0].mxu0 }
  0xee   : > { %v363_v11 = vpop.f32.mrb[1].mxu0  ;;  %v4172_v12 = vpop.f32.mrb[0].mxu1  ;;  %v4745_v32 = vadd.f32 %v4164_v10, %v3970_v17 }
  0xef   : > { %v4165_v13 = vpop.f32.mrb[2].mxu0  ;;  %v395_v14 = vpop.f32.mrb[1].mxu1  ;;  %v4733_v19 = vadd.f32 %v3970_v17, %v363_v11  ;;  %v4783_v47 = vadd.f32 %v4172_v12, %v3970_v17 }
  0xf0   : > { %v366_v15 = vpop.f32.mrb[3].mxu0  ;;  %v4173_v16 = vpop.f32.mrb[2].mxu1  ;;  %v4735_v20 = vadd.f32 %v4165_v13, %v3970_v17  ;;  %7375 = vst [vmem:[#allocation7_spill] sm:$0xff] %v4745_v32  ;;  %v4750_v34 = vadd.f32 %v3970_v17, %v395_v14  ;;  %v4759_v38 = vmax.f32 %v4745_v32, 0.0 }
  0xf1   : > { %v398_v18 = vpop.f32.mrb[3].mxu1  ;;  %7371 = vst [vmem:[#allocation3_spill] sm:$0xff] %v4733_v19  ;;  %v4738_v26 = vmax.f32 %v4733_v19, 0.0  ;;  %v4743_v28 = vadd.f32 %v3970_v17, %v366_v15  ;;  %7388 = vst [vmem:[#allocation20_spill] sm:$0xff] %v4783_v47  ;;  %v4785_v48 = vadd.f32 %v4173_v16, %v3970_v17  ;;  %v4803_v53 = vmax.f32 %v4783_v47, 0.0 }
  0xf2   : > { %7372 = vst [vmem:[#allocation4_spill] sm:$0xff] %v4735_v20  ;;  %v4741_v27 = vmax.f32 %v4735_v20, 0.0  ;;  %7377 = vst [vmem:[#allocation9_spill] sm:$0xff] %v4750_v34  ;;  %v4752_v35 = vadd.f32 %v3970_v17, %v398_v18  ;;  %v4765_v40 = vmax.f32 %v4750_v34, 0.0  ;;  %v862_v8 = vrot.slane %v4759_v38, 1 }
  0xf3   : > { %7374 = vst [vmem:[#allocation6_spill] sm:$0xff] %v4743_v28  ;;  %v4748_v33 = vmax.f32 %v4743_v28, 0.0  ;;  %7380 = vst [vmem:[#allocation12_spill] sm:$0xff] %v4759_v38  ;;  %v4806_v54 = vmax.f32 %v4785_v48, 0.0  ;;  %v7239_v11 = vrot.slane %v4738_v26, 1  ;;  %v432_v15 = vadd.s32 40, %v4862_v4 }
  0xf4   : > { %7373 = vst [vmem:[#allocation5_spill] sm:$0xff] %v4741_v27  ;;  %7378 = vst [vmem:[#allocation10_spill] sm:$0xff] %v4752_v35  ;;  %v4290_v36 = vpack.i.bf16 %v4741_v27, %v4738_v26  ;;  %v4768_v41 = vmax.f32 %v4752_v35, 0.0  ;;  %v4405_v10 = vpack.i.bf16 %v4741_v27, %v4759_v38  ;;  %v7240_v3 = vrot.slane %v4765_v40, 1 }
  0xf5   : > { %v4168_v21 = vpop.f32.mrb[4].mxu0  ;;  %7376 = vst [vmem:[#allocation8_spill] sm:$0xff] %v4748_v33  ;;  %7382 = vst [vmem:[#allocation14_spill] sm:$0xff] %v4765_v40  ;;  %v4295_v43 = vpack.i.bf16 %v4759_v38, %v4748_v33  ;;  %v4825_v60 = vpack.i.bf16 %v4806_v54, %v4803_v53  ;;  %v861_v7 = vrot.slane %v4748_v33, 1  ;;  %v4395_v12 = vpack.i.bf16 %v4748_v33, %v4738_v26 }
  0xf6   : > { %v4176_v22 = vpop.f32.mrb[4].mxu1  ;;  %v379_v23 = vpop.f32.mrb[5].mxu0  ;;  %v4756_v37 = vadd.f32 %v4168_v21, %v3970_v17  ;;  %4291 = vrot.lane.b32.xlu0 %v4290_v36, %s4646_s11  ;;  %7383 = vst [vmem:[#allocation15_spill] sm:$0xff] %v4768_v41  ;;  %7389 = vst [vmem:[#allocation21_spill] sm:$0xff] %v4785_v48  ;;  %v4794_v51 = vpack.i.bf16 %v4768_v41, %v4765_v40  ;;  %v4902_v18 = vand.u32 15, %v432_v15  ;;  %v3341_v15 = vsel %vm3339_vm8, %v4743_v28, 0.0 }
  0xf7   : > { %v411_v24 = vpop.f32.mrb[5].mxu1  ;;  %v4169_v25 = vpop.f32.mrb[6].mxu0  ;;  %v4777_v45 = vadd.f32 %v3970_v17, %v379_v23  ;;  %7392 = vst [vmem:[#allocation24_spill] sm:$0xff] %v4803_v53  ;;  %7393 = vst [vmem:[#allocation25_spill] sm:$0xff] %v4806_v54  ;;  %v4814_v57 = vadd.f32 %v4176_v22, %v3970_v17  ;;  %v890_v9 = vsel %vm7347_vm2, %v861_v7, %v862_v8 }
  0xf8   : > { %v4177_v29 = vpop.f32.mrb[6].mxu1  ;;  %v382_v30 = vpop.f32.mrb[7].mxu0  ;;  %7379 = vst [vmem:[#allocation11_spill] sm:$0xff] %v4756_v37  ;;  %v4762_v39 = vadd.f32 %v4169_v25, %v3970_v17  ;;  %v4775_v44 = vmax.f32 %v4756_v37, 0.0  ;;  %v4820_v59 = vadd.f32 %v3970_v17, %v411_v24  ;;  %v891_v13 = vsel %vm7347_vm2, %v7239_v11, %v861_v7  ;;  %7402 = vst [vmem:[#allocation34_spill] sm:$0xff] %v4902_v18 }
  0xf9   : > { %v414_v31 = vpop.f32.mrb[7].mxu1  ;;  %v4770_v42 = vadd.f32 %v3970_v17, %v382_v30  ;;  %7386 = vst [vmem:[#allocation18_spill] sm:$0xff] %v4777_v45  ;;  %v4797_v52 = vmax.f32 %v4777_v45, 0.0  ;;  %7394 = vst [vmem:[#allocation26_spill] sm:$0xff] %v4814_v57  ;;  %v4816_v58 = vadd.f32 %v4177_v29, %v3970_v17  ;;  %v4831_v62 = vmax.f32 %v4814_v57, 0.0 }
  0xfa   : > { %7381 = vst [vmem:[#allocation13_spill] sm:$0xff] %v4762_v39  ;;  %7385 = vst [vmem:[#allocation17_spill] sm:$0xff] %v4775_v44  ;;  %v4780_v46 = vmax.f32 %v4762_v39, 0.0  ;;  %4296 = vrot.lane.b32.xlu0 %v4295_v43, %s4646_s11  ;;  %v4812_v56 = vadd.f32 %v3970_v17, %v414_v31  ;;  %v4839_v0 = vmax.f32 %v4820_v59, 0.0  ;;  %v926_v14 = vsel %vm7326_vm3, %v890_v9, 0.0 }
  0xfb   : > { %7384 = vst [vmem:[#allocation16_spill] sm:$0xff] %v4770_v42  ;;  %v4788_v49 = vmax.f32 %v4770_v42, 0.0  ;;  %7391 = vst [vmem:[#allocation23_spill] sm:$0xff] %v4797_v52  ;;  %v4834_v63 = vmax.f32 %v4816_v58, 0.0  ;;  %v4410_v16 = vpack.i.bf16 %v926_v14, %v891_v13  ;;  %v430_v17 = vadd.s32 24, %v4862_v4 }
  0xfc   : > { %7387 = vst [vmem:[#allocation19_spill] sm:$0xff] %v4780_v46  ;;  %v4305_v50 = vpack.i.bf16 %v4780_v46, %v4775_v44  ;;  %7395 = vst [vmem:[#allocation27_spill] sm:$0xff] %v4816_v58  ;;  %v4828_v61 = vmax.f32 %v4812_v56, 0.0  ;;  %v866_v22 = vrot.slane %v4775_v44, 1  ;;  %v434_v24 = vadd.s32 56, %v4862_v4 }
  0xfd   : > { %7390 = vst [vmem:[#allocation22_spill] sm:$0xff] %v4788_v49  ;;  %v4810_v55 = vpack.i.bf16 %v4788_v49, %v4797_v52  ;;  %7396 = vst [vmem:[#allocation28_spill] sm:$0xff] %v4820_v59  ;;  %v4844_v1 = vpack.i.bf16 %v4834_v63, %v4831_v62  ;;  %v865_v21 = vrot.slane %v4788_v49, 1  ;;  %v4906_v23 = vand.u32 15, %v430_v17 }
  0xfe   : > { %4306 = vrot.lane.b32.xlu1 %v4305_v50, %s4646_s11  ;;  %4301 = vrot.lane.b32.xlu0 %v4794_v51, %s4646_s11  ;;  %7397 = vst [vmem:[#allocation29_spill] sm:$0xff] %v4828_v61  ;;  %7398 = vst [vmem:[#allocation30_spill] sm:$0xff] %v4831_v62  ;;  %v4848_v2 = vpack.i.bf16 %v4828_v61, %v4839_v0  ;;  %v864_v25 = vrot.slane %v4797_v52, 1  ;;  %vm7256_vm4 = vcmp.lt.s32.totalorder %v4902_v18, 15  ;;  %v863_v30 = vrot.slane %v4741_v27, 1 }
  0xff   : > { %7399 = vst [vmem:[#allocation31_spill] sm:$0xff] %v4834_v63  ;;  %7400 = vst [vmem:[#allocation32_spill] sm:$0xff] %v4839_v0  ;;  %v886_v29 = vsel %vm7347_vm2, %v865_v21, %v866_v22  ;;  %vm7305_vm5 = vcmp.lt.s32.totalorder %v4906_v23, 15  ;;  %v3340_v17 = vsel %vm3339_vm8, %v4733_v19, 0.0  ;;  %v872_v11 = vrot.slane %v4839_v0, 1 }
 0x100   : > { %7403 = vst [vmem:[#allocation35_spill] sm:$0xff] %v4906_v23  ;;  %v887_v31 = vsel %vm7347_vm2, %v864_v25, %v865_v21  ;;  %v3377_v21 = vmul.f32 %v4733_v19, %v4733_v19  ;;  %vm718_vm0 = vcmp.lt.s32.totalorder %v4906_v23, 14  ;;  %v780_v19 = vrot.slane %v4748_v33, 7 }
 0x101   : > { %v783_v0 = vrot.slane %v4797_v52, 7  ;;  %vm736_vm3 = vcmp.lt.s32.totalorder %v4902_v18, 13 }
 0x102   : > { %4311 = vrot.lane.b32.xlu1 %v4810_v55, %s4646_s11  ;;  %4326 = vrot.lane.b32.xlu0 %v4295_v43, %s4647_s12 }
 0x106   : > { %4316 = vrot.lane.b32.xlu1 %v4825_v60, %s4646_s11  ;;  %4341 = vrot.lane.b32.xlu0 %v4290_v36, %s4648_s13 }
 0x10a   : > { %4321 = vrot.lane.b32.xlu1 %v4844_v1, %s4646_s11  ;;  %4346 = vrot.lane.b32.xlu0 %v4848_v2, %s4646_s11 }
 0x10e   : > { %4331 = vrot.lane.b32.xlu1 %v4290_v36, %s4647_s12  ;;  %4351 = vrot.lane.b32.xlu0 %v4305_v50, %s4647_s12  ;;  %v4921_v36 = vand.u32 15, %v434_v24 }
 0x110   : > { %7404 = vst [vmem:[#allocation36_spill] sm:$0xff] %v4921_v36  ;;  %vm7248_vm6 = vcmp.lt.s32.totalorder %v4921_v36, 15 }
 0x112   : > { %4336 = vrot.lane.b32.xlu1 %v4295_v43, %s4648_s13  ;;  %4361 = vrot.lane.b32.xlu0 %v4305_v50, %s4648_s13  ;;  %v930_v43 = vsel %vm7256_vm4, %v886_v29, 0.0  ;;  %v3379_v29 = vmul.f32 %v4745_v32, %v4745_v32 }
 0x113   : > { %v4455_v5 = vpack.i.bf16 %v930_v43, %v887_v31 }
 0x116   : > { %4356 = vrot.lane.b32.xlu1 %v4794_v51, %s4647_s12  ;;  %4371 = vrot.lane.b32.xlu0 %v4825_v60, %s4647_s12 }
 0x11a   : > { %4366 = vrot.lane.b32.xlu1 %v4794_v51, %s4648_s13  ;;  %4376 = vrot.lane.b32.xlu0 %v4810_v55, %s4647_s12 }
 0x11e   : > { %4391 = vrot.lane.b32.xlu1 %v4844_v1, %s4648_s13  ;;  %4381 = vrot.lane.b32.xlu0 %v4825_v60, %s4648_s13 }
 0x122   : > { %4401 = vrot.lane.b32.xlu1 %v4810_v55, %s4648_s13  ;;  %4386 = vrot.lane.b32.xlu0 %v4844_v1, %s4647_s12 }
 0x126   : > { %4406 = vrot.lane.b32.xlu1 %v4405_v10, %s4649_s14  ;;  %4396 = vrot.lane.b32.xlu0 %v4395_v12, %s4649_s14  ;;  %v889_v10 = vsel %vm7347_vm2, %v862_v8, %v863_v30 }
 0x12a   : > { %4416 = vrot.lane.b32.xlu1 %v4305_v50, %s4649_s14  ;;  %4411 = vrot.lane.b32.xlu0 %v4410_v16, %s4650_s15  ;;  %v888_v50 = vsel %vm7347_vm2, %v863_v30, %v864_v25  ;;  %v3378_v16 = vmul.f32 %v4743_v28, %v4743_v28  ;;  %v3343_v25 = vsel %vm3339_vm8, %v4745_v32, 0.0  ;;  %v3393_v30 = vsel %vm3339_vm8, %v3377_v21, 0.0 }
 0x12b   : > { %v928_v7 = vsel %vm7305_vm5, %v888_v50, 0.0  ;;  %v3396_v50 = vsel %vm3339_vm8, %v3379_v29, 0.0  ;;  %vm2047_vm5 = vcmp.lt.s32.totalorder %v4862_v4, 5 }
 0x12c   : > { %v4445_v12 = vpack.i.bf16 %v928_v7, %v889_v10  ;;  %v3394_v24 = vsel %vm3339_vm8, %v3378_v16, 0.0  ;;  %v3347_v10 = vsel %vm3339_vm8, %v4777_v45, 0.0 }
 0x12d   : > { %v3395_v43 = vadd.f32 %v3394_v24, %v3393_v30  ;;  %v3383_v24 = vmul.f32 %v4756_v37, %v4756_v37 }
 0x12e   : > { %4426 = vrot.lane.b32.xlu1 %v4848_v2, %s4647_s12  ;;  %4421 = vrot.lane.b32.xlu0 %v4794_v51, %s4649_s14  ;;  %v867_v51 = vrot.slane %v4780_v46, 1 }
 0x12f   : > { %v3397_v7 = vadd.f32 %v3396_v50, %v3395_v43  ;;  %v3404_v30 = vsel %vm3339_vm8, %v3383_v24, 0.0  ;;  %v3384_v43 = vmul.f32 %v4762_v39, %v4762_v39 }
 0x130   : > { %v884_v9 = vsel %vm7347_vm2, %v867_v51, %v7240_v3 }
 0x131   : > { %v932_v13 = vsel %vm7248_vm6, %v884_v9, 0.0 }
 0x132   : > { %4431 = vrot.lane.b32.xlu1 %v4848_v2, %s4648_s13  ;;  %4441 = vrot.lane.b32.xlu0 %v4810_v55, %s4649_s14  ;;  %v4618_v55 = vld [vmem:[%s7236_s3] sm:$0x3f]   ;;  %s234_s13 = scalar_lea.vmem %s7238_s5, %s4113_s10 }
 0x133   : > { %4254 = vmatprep.subr.msk.bf16.mxu1 %vm1142_vm7, %v4618_v55  ;;  %v1144_v14 = vsel %vm1142_vm7, %v4618_v55, 0  ;;  %v3381_v55 = vmul.f32 %v4777_v45, %v4777_v45 }
 0x134   : > { %4179 = vmatpush3.bf16.msra.mxu1 %v1144_v14 }
 0x135   : > { %v3400_v14 = vsel %vm3339_vm8, %v3381_v55, 0.0 }
 0x136   : > { %4436 = vrot.lane.b32.xlu1 %v4825_v60, %s4649_s14  ;;  %4456 = vrot.lane.b32.xlu0 %v4455_v5, %s4650_s15  ;;  %v885_v60 = vsel %vm7347_vm2, %v866_v22, %v867_v51  ;;  %v3342_v22 = vadd.f32 %v3341_v15, %v3340_v17  ;;  %v3345_v51 = vsel %vm3339_vm8, %v4735_v20, 0.0  ;;  %v3380_v5 = vmul.f32 %v4735_v20, %v4735_v20 }
 0x137   : > { %v4450_v8 = vpack.i.bf16 %v932_v13, %v885_v60  ;;  %v3382_v15 = vmul.f32 %v4770_v42, %v4770_v42 }
 0x138   : > { %v3344_v31 = vadd.f32 %v3343_v25, %v3342_v22  ;;  %v3351_v22 = vsel %vm3339_vm8, %v4756_v37, 0.0 }
 0x139   : > { %v3402_v21 = vsel %vm3339_vm8, %v3382_v15, 0.0  ;;  %v3386_v15 = vmul.f32 %v4752_v35, %v4752_v35 }
 0x13a   : > { %4446 = vrot.lane.b32.xlu1 %v4445_v12, %s4650_s15  ;;  %v3346_v9 = vadd.f32 %v3345_v51, %v3344_v31  ;;  %v3398_v12 = vsel %vm3339_vm8, %v3380_v5, 0.0  ;;  %v3353_v31 = vsel %vm3339_vm8, %v4762_v39, 0.0  ;;  %v3355_v5 = vsel %vm3339_vm8, %v4750_v34, 0.0 }
 0x13b   : > { %v3399_v13 = vadd.f32 %v3398_v12, %v3397_v7  ;;  %v3385_v7 = vmul.f32 %v4750_v34, %v4750_v34  ;;  %v436_v12 = vadd.s32 72, %v4862_v4  ;;  %v874_v34 = vrot.slane %v4831_v62, 1 }
 0x13c   : > { %v3348_v60 = vadd.f32 %v3347_v10, %v3346_v9  ;;  %v3406_v9 = vsel %vm3339_vm8, %v3384_v43, 0.0  ;;  %v3410_v43 = vsel %vm3339_vm8, %v3386_v15, 0.0  ;;  %v4619_v15 = vld [vmem:[%s7236_s3 + $0x8] sm:$0x3f]  }
 0x13d   : > { %v3401_v16 = vadd.f32 %v3400_v14, %v3399_v13  ;;  %v440_v13 = vadd.s32 104, %v4862_v4  ;;  %v3408_v14 = vsel %vm3339_vm8, %v3385_v7, 0.0  ;;  %v433_v7 = vadd.s32 48, %v4862_v4  ;;  %4255 = vmatprep.subr.msk.bf16.mxu0 %vm1142_vm7, %v4619_v15 }
 0x13e   : > { %4451 = vrot.lane.b32.xlu1 %v4450_v8, %s4650_s15  ;;  %v3349_v8 = vsel %vm3339_vm8, %v4770_v42, 0.0 }
 0x13f   : > { %v3350_v17 = vadd.f32 %v3349_v8, %v3348_v60  ;;  %v3403_v29 = vadd.f32 %v3402_v21, %v3401_v16  ;;  %v438_v60 = vadd.s32 88, %v4862_v4  ;;  %v3357_v8 = vsel %vm3339_vm8, %v4752_v35, 0.0 }
 0x140   : > { %v442_v21 = vadd.s32 120, %v4862_v4 }
 0x141   : > { %v3352_v25 = vadd.f32 %v3351_v22, %v3350_v17  ;;  %v3405_v51 = vadd.f32 %v3404_v30, %v3403_v29  ;;  %v5009_v22 = vand.u32 15, %v436_v12  ;;  %v5011_v24 = vand.u32 15, %v438_v60 }
 0x142   : > { %v429_v29 = vadd.s32 16, %v4862_v4  ;;  %v3359_v30 = vsel %vm3339_vm8, %v4783_v47, 0.0 }
 0x143   : > { %v3354_v50 = vadd.f32 %v3353_v31, %v3352_v25  ;;  %v3407_v55 = vadd.f32 %v3406_v9, %v3405_v51  ;;  %7405 = vst [vmem:[#allocation37_spill] sm:$0xff] %v5009_v22  ;;  %7406 = vst [vmem:[#allocation38_spill] sm:$0xff] %v5011_v24  ;;  %v5013_v25 = vand.u32 15, %v440_v13  ;;  %v3387_v31 = vmul.f32 %v4783_v47, %v4783_v47 }
 0x144   : > { %vm7300_vm9 = vcmp.lt.s32.totalorder %v5009_v22, 15  ;;  %vm7259_vm10 = vcmp.lt.s32.totalorder %v5011_v24, 15  ;;  %v5029_v12 = vand.u32 15, %v429_v29  ;;  %v3361_v13 = vsel %vm3339_vm8, %v4785_v48, 0.0 }
 0x145   : > { %v3356_v10 = vadd.f32 %v3355_v5, %v3354_v50  ;;  %v3409_v16 = vadd.f32 %v3408_v14, %v3407_v55  ;;  %7407 = vst [vmem:[#allocation39_spill] sm:$0xff] %v5013_v25  ;;  %v431_v50 = vadd.s32 32, %v4862_v4  ;;  %v3388_v55 = vmul.f32 %v4785_v48, %v4785_v48 }
 0x146   : > { %7409 = vst [vmem:[#allocation41_spill] sm:$0xff] %v5029_v12  ;;  %v3412_v60 = vsel %vm3339_vm8, %v3387_v31, 0.0  ;;  %vm7269_vm11 = vcmp.lt.s32.totalorder %v5013_v25, 15  ;;  %v5036_v14 = vand.u32 15, %v4862_v4  ;;  %v5044_v29 = vand.u32 15, %v433_v7 }
 0x147   : > { %v3358_v17 = vadd.f32 %v3357_v8, %v3356_v10  ;;  %v3411_v5 = vadd.f32 %v3410_v43, %v3409_v16  ;;  %v5023_v10 = vand.u32 15, %v442_v21  ;;  %v5038_v8 = vand.u32 15, %v431_v50 }
 0x148   : > { %7410 = vst [vmem:[#allocation42_spill] sm:$0xff] %v5036_v14  ;;  %v869_v21 = vrot.slane %v4768_v41, 1  ;;  %v870_v31 = vrot.slane %v4803_v53, 1  ;;  %v871_v43 = vrot.slane %v4806_v54, 1  ;;  %v1696_v50 = vsel %vm1142_vm7, %v4619_v15, 0 }
 0x149   : > { %v3360_v51 = vadd.f32 %v3359_v30, %v3358_v17  ;;  %7408 = vst [vmem:[#allocation40_spill] sm:$0xff] %v5023_v10  ;;  %7411 = vst [vmem:[#allocation43_spill] sm:$0xff] %v5038_v8  ;;  %v3413_v17 = vadd.f32 %v3412_v60, %v3411_v5  ;;  %vm7286_vm12 = vcmp.lt.s32.totalorder %v5023_v10, 15  ;;  %v3363_v5 = vsel %vm3339_vm8, %v4820_v59, 0.0  ;;  %4197 = vmatpush3.bf16.msra.mxu0 %v1696_v50 }
 0x14a   : > { %v873_v15 = vrot.slane %v4828_v61, 1  ;;  %v882_v47 = vsel %vm7347_vm2, %v869_v21, %v870_v31  ;;  %v880_v39 = vsel %vm7347_vm2, %v871_v43, %v872_v11  ;;  %vm7332_vm6 = vcmp.ge.s32.totalorder %v5029_v12, 1 }
 0x14b   : > { %v3362_v16 = vadd.f32 %v3361_v13, %v3360_v51  ;;  %v3414_v51 = vsel %vm3339_vm8, %v3388_v55, 0.0  ;;  %v5061_v13 = vmul.f32 %v4820_v59, %v4820_v59  ;;  %v5094_v37 = vsel %vm7347_vm2, %v870_v31, %v871_v43 }
 0x14c   : > { %v5070_v48 = vadd.f32 %v3414_v51, %v3413_v17  ;;  %v7415_v51 = vrot.slane %v4765_v40, 1  ;;  %v878_v20 = vsel %vm7347_vm2, %v873_v15, %v874_v34  ;;  %v934_v28 = vsel %vm7300_vm9, %v882_v47, 0.0 }
 0x14d   : > { %v5068_v55 = vadd.f32 %v3363_v5, %v3362_v16  ;;  %v875_v16 = vrot.slane %v4834_v63, 1  ;;  %vm7356_vm4 = vcmp.ge.s32.totalorder %v5036_v14, 1  ;;  %v5130_v32 = vsel %vm7269_vm11, %v878_v20, 0.0 }
 0x14e   : > { %v883_v5 = vsel %vm7347_vm2, %v7415_v51, %v869_v21  ;;  %v5104_v21 = vsel %vm7259_vm10, %v880_v39, 0.0  ;;  %v5108_v51 = vsel %vm7347_vm2, %v872_v11, %v873_v15  ;;  %v7418_v39 = vrot.slane %v4738_v26, 1 }
 0x14f   : > { %vm720_vm10 = vcmp.lt.s32.totalorder %v4902_v18, 14  ;;  %vm724_vm11 = vcmp.lt.s32.totalorder %v5009_v22, 14  ;;  %vm728_vm9 = vcmp.lt.s32.totalorder %v5013_v25, 14 }
 0x150   : > { %v892_v11 = vsel %vm7347_vm2, %v875_v16, %v7418_v39 }
 0x151   : > { %v5147_v39 = vsel %vm7286_vm12, %v892_v11, 0.0  ;;  %v5178_v11 = vld [vmem:[%s7236_s3 + $0x10] sm:$0x3f]   ;;  %vm722_vm12 = vcmp.lt.s32.totalorder %v4921_v36, 14 }
 0x152   : > { %7422 = vst [vmem:[#allocation51_spill] sm:$0xff] %v5178_v11  ;;  %4256 = vmatprep.subr.msk.bf16.mxu1 %vm1142_vm7, %v5178_v11 }
 0x168   : > { %v4292_v9 = vpop.permute.xlu0 %4291 }
 0x169   : > { %v5063_v3 = vunpack.i.l.bf16 %v4292_v9 }
 0x16b   : > { %7414 = vst [vmem:[#allocation46_spill] sm:$0xff] %v5063_v3  ;;  %v7262_v42 = vrot.slane %v5063_v3, 2 }
 0x16c   : > { %v4297_v30 = vpop.permute.xlu0 %4296 }
 0x16d   : > { %v5055_v7 = vunpack.i.h.bf16 %v4297_v30  ;;  %v5057_v60 = vunpack.i.l.bf16 %v4297_v30 }
 0x16f   : > { %7412 = vst [vmem:[#allocation44_spill] sm:$0xff] %v5055_v7  ;;  %7413 = vst [vmem:[#allocation45_spill] sm:$0xff] %v5057_v60  ;;  %v1480_v30 = vrot.slane %v5055_v7, 2  ;;  %v1479_v50 = vrot.slane %v5057_v60, 2  ;;  %v5098_v7 = vunpack.i.h.bf16 %v4292_v9 }
 0x170   : > { %v5074_v35 = vpop.permute.xlu1 %4306  ;;  %v4302_v59 = vpop.permute.xlu0 %4301 }
 0x171   : > { %v1508_v17 = vsel %vm1494_vm13, %v1479_v50, %v1480_v30  ;;  %7416 = vst [vmem:[#allocation47_spill] sm:$0xff] %v5098_v7  ;;  %v1509_v9 = vsel %vm1494_vm13, %v7262_v42, %v1479_v50  ;;  %v782_v42 = vrot.slane %v4741_v27, 7  ;;  %v5188_v54 = vunpack.i.h.bf16 %v4302_v59 }
 0x172   : > { %v1544_v47 = vsel %vm716_vm15, %v1508_v17, 0.0  ;;  %v5136_v17 = vsel %vm7347_vm2, %v874_v34, %v875_v16  ;;  %v4465_v16 = vpack.i.bf16 %v934_v28, %v883_v5  ;;  %vm7318_vm15 = vcmp.ge.s32.totalorder %v5038_v8, 1 }
 0x173   : > { %v4460_v60 = vpack.i.bf16 %v1544_v47, %v1509_v9  ;;  %v1481_v9 = vrot.slane %v5098_v7, 2  ;;  %v5142_v47 = vunpack.i.l.bf16 %v5074_v35  ;;  %v779_v7 = vrot.slane %v4738_v26, 7  ;;  %7424 = vst [vmem:[#allocation53_spill] sm:$0xff] %v5188_v54 }
 0x174   : > { %v4312_v45 = vpop.permute.xlu1 %4311  ;;  %v5113_v43 = vpop.permute.xlu0 %4326  ;;  %v5190_v40 = vunpack.i.l.bf16 %v4302_v59  ;;  %v785_v59 = vrot.slane %v4775_v44, 7  ;;  %v7433_v27 = vrot.slane %v4780_v46, 7  ;;  %vm740_vm2 = vcmp.lt.s32.totalorder %v5009_v22, 13 }
 0x175   : > { %v5111_v31 = vunpack.i.l.bf16 %v4312_v45  ;;  %v5125_v15 = vunpack.i.h.bf16 %v4312_v45  ;;  %7420 = vst [vmem:[#allocation50_spill] sm:$0xff] %v5142_v47  ;;  %4461 = vrot.lane.b32.xlu0 %v4460_v60, %s4650_s15  ;;  %v4475_v45 = vpack.i.bf16 %v5104_v21, %v5094_v37  ;;  %v7421_v21 = vrot.slane %v4834_v63, 7 }
 0x176   : > { %v1507_v37 = vsel %vm1494_vm13, %v1480_v30, %v1481_v9  ;;  %7425 = vst [vmem:[#allocation54_spill] sm:$0xff] %v5190_v40  ;;  %v7426_v30 = vrot.slane %v5142_v47, 2  ;;  %v5227_v12 = vunpack.i.h.bf16 %v5113_v43 }
 0x177   : > { %7417 = vst [vmem:[#allocation48_spill] sm:$0xff] %v5111_v31  ;;  %7419 = vst [vmem:[#allocation49_spill] sm:$0xff] %v5125_v15  ;;  %v1482_v50 = vrot.slane %v5111_v31, 2  ;;  %v781_v31 = vrot.slane %v4759_v38, 7  ;;  %v1483_v62 = vrot.slane %v5125_v15, 2  ;;  %v811_v15 = vsel %vm795_vm14, %v7421_v21, %v779_v7 }
 0x178   : > { %v4317_v20 = vpop.permute.xlu1 %4316  ;;  %v5150_v34 = vpop.permute.xlu0 %4341  ;;  %7429 = vst [vmem:[#allocation57_spill] sm:$0xff] %v5227_v12 }
 0x179   : > { %v1506_v60 = vsel %vm1494_vm13, %v1481_v9, %v1482_v50  ;;  %v809_v28 = vsel %vm795_vm14, %v780_v19, %v781_v31  ;;  %v5168_v5 = vsel %vm795_vm14, %v781_v31, %v782_v42  ;;  %v5181_v53 = vunpack.i.l.bf16 %v4317_v20  ;;  %4466 = vrot.lane.b32.xlu0 %v4465_v16, %s4650_s15 }
 0x17a   : > { %v1546_v21 = vsel %vm718_vm0, %v1506_v60, 0.0  ;;  %v5195_v61 = vsel %vm7332_vm6, %v809_v28, 0.0  ;;  %v1504_v9 = vsel %vm1494_vm13, %v1483_v62, %v7426_v30  ;;  %v784_v16 = vrot.slane %v4788_v49, 7 }
 0x17b   : > { %7423 = vst [vmem:[#allocation52_spill] sm:$0xff] %v5181_v53  ;;  %v4470_v52 = vpack.i.bf16 %v1546_v21, %v1507_v37  ;;  %v5209_v37 = vld [vmem:[%s7236_s3 + $0x18] sm:$0x3f]   ;;  %v5212_v28 = vunpack.i.h.bf16 %v5074_v35  ;;  %v1505_v21 = vsel %vm1494_vm13, %v1482_v50, %v1483_v62  ;;  %vm726_vm0 = vcmp.lt.s32.totalorder %v5011_v24, 14 }
 0x17c   : > { %v4322_v31 = vpop.permute.xlu1 %4321  ;;  %v4347_v41 = vpop.permute.xlu0 %4346  ;;  %7427 = vst [vmem:[#allocation55_spill] sm:$0xff] %v5209_v37  ;;  %v5220_v30 = vsel %vm795_vm14, %v779_v7, %v780_v19  ;;  %v5224_v60 = vsel %vm7356_vm4, %v811_v15, 0.0  ;;  %v807_v62 = vsel %vm795_vm14, %v782_v42, %v783_v0  ;;  %4257 = vmatprep.subr.msk.bf16.mxu0 %vm1142_vm7, %v5209_v37  ;;  %v1487_v19 = vrot.slane %v5188_v54, 2 }
 0x17d   : > { %7428 = vst [vmem:[#allocation56_spill] sm:$0xff] %v5212_v28  ;;  %4471 = vrot.lane.b32.xlu1 %v4470_v52, %s4650_s15  ;;  %v5230_v44 = vunpack.i.l.bf16 %v4347_v41  ;;  %v1486_v7 = vrot.slane %v5190_v40, 2  ;;  %v5239_v15 = vunpack.i.l.bf16 %v5113_v43  ;;  %v1548_v50 = vsel %vm720_vm10, %v1504_v9, 0.0 }
 0x17e   : > { %v5243_v49 = vunpack.i.h.bf16 %v4317_v20  ;;  %v4485_v38 = vpack.i.bf16 %v1548_v50, %v1505_v21  ;;  %v5249_v42 = vsel %vm795_vm14, %v785_v59, %v7433_v27  ;;  %v5253_v37 = vsel %vm795_vm14, %v784_v16, %v785_v59 }
 0x17f   : > { %7430 = vst [vmem:[#allocation58_spill] sm:$0xff] %v5230_v44  ;;  %7431 = vst [vmem:[#allocation59_spill] sm:$0xff] %v5239_v15  ;;  %v1485_v43 = vrot.slane %v5212_v28, 2  ;;  %v4344_v54 = vunpack.i.h.bf16 %v5150_v34  ;;  %v4343_v9 = vunpack.i.l.bf16 %v5150_v34  ;;  %v5261_v20 = vsel %vm795_vm14, %v783_v0, %v784_v16 }
 0x180   : > { %v4332_v52 = vpop.permute.xlu1 %4331  ;;  %v4352_v35 = vpop.permute.xlu0 %4351  ;;  %7432 = vst [vmem:[#allocation60_spill] sm:$0xff] %v5243_v49  ;;  %vm1966_vm10 = vcmp.lt.s32.totalorder %v4862_v4, 3  ;;  %4486 = vrot.lane.b32.xlu0 %v4485_v38, %s4650_s15  ;;  %v7434_v59 = vrot.slane %v5181_v53, 2  ;;  %v5276_v0 = vsel %vm7318_vm15, %v807_v62, 0.0  ;;  %v5279_v16 = vunpack.i.h.bf16 %v4322_v31 }
 0x181   : > { %4476 = vrot.lane.b32.xlu1 %v4475_v45, %s4650_s15  ;;  %v1501_v38 = vsel %vm1494_vm13, %v1486_v7, %v1487_v19  ;;  %v5288_v40 = vunpack.i.l.bf16 %v4322_v31  ;;  %v5290_v28 = vunpack.i.h.bf16 %v4347_v41  ;;  %v5293_v45 = vrot.slane %v4344_v54, 4 }
 0x182   : > { %v1500_v50 = vsel %vm1494_vm13, %v1487_v19, %v7434_v59  ;;  %7435 = vst [vmem:[#allocation61_spill] sm:$0xff] %v5279_v16  ;;  %v1489_v59 = vrot.slane %v5243_v49, 2  ;;  %v5295_v46 = vrot.slane %v4343_v9, 4  ;;  %v5297_v63 = vunpack.i.h.bf16 %v4352_v35 }
 0x183   : > { %v1552_v27 = vsel %vm724_vm11, %v1500_v50, 0.0  ;;  %7436 = vst [vmem:[#allocation62_spill] sm:$0xff] %v5288_v40  ;;  %7437 = vst [vmem:[#allocation63_spill] sm:$0xff] %v5290_v28  ;;  %v1502_v19 = vsel %vm1494_vm13, %v1485_v43, %v1486_v7  ;;  %v5301_v50 = vunpack.i.h.bf16 %v4332_v52  ;;  %v7439_v31 = vrot.slane %v5142_v47, 2 }
 0x184   : > { %v5271_v34 = vpop.permute.xlu1 %4336  ;;  %v5285_v21 = vpop.permute.xlu0 %4361  ;;  %v4490_v62 = vpack.i.bf16 %v1552_v27, %v1501_v38  ;;  %7438 = vst [vmem:[#allocation64_spill] sm:$0xff] %v5297_v63  ;;  %v1550_v54 = vsel %vm722_vm12, %v1502_v19, 0.0  ;;  %v7440_v9 = vrot.slane %v5230_v44, 2  ;;  %vm732_vm11 = vcmp.lt.s32.totalorder %v4873_v6, 13 }
 0x185   : > { %v1503_v41 = vsel %vm1494_vm13, %v7439_v31, %v1485_v43  ;;  %v1491_v19 = vrot.slane %v5290_v28, 2  ;;  %vm730_vm12 = vcmp.lt.s32.totalorder %v5023_v10, 14  ;;  %vm2519_vm15 = vcmp.lt.s32.totalorder %v4862_v4, 4 }
 0x186   : > { %4491 = vrot.lane.b32.xlu0 %v4490_v62, %s4650_s15  ;;  %v1498_v38 = vsel %vm1494_vm13, %v1489_v59, %v7440_v9  ;;  %v4480_v49 = vpack.i.bf16 %v1550_v54, %v1503_v41  ;;  %v5326_v9 = vunpack.i.l.bf16 %v4332_v52  ;;  %v5335_v43 = vunpack.i.l.bf16 %v4352_v35 }
 0x187   : > { %v1554_v33 = vsel %vm726_vm0, %v1498_v38, 0.0  ;;  %v7442_v38 = vrot.slane %v5181_v53, 2  ;;  %v4339_v41 = vunpack.i.h.bf16 %v5271_v34  ;;  %v7444_v35 = vrot.slane %v5297_v63, 5 }
 0x188   : > { %v4357_v27 = vpop.permute.xlu1 %4356  ;;  %v4372_v47 = vpop.permute.xlu0 %4371  ;;  %4481 = vrot.lane.b32.xlu1 %v4480_v49, %s4650_s15  ;;  %7441 = vst [vmem:[#allocation65_spill] sm:$0xff] %v5335_v43  ;;  %v4364_v53 = vunpack.i.h.bf16 %v5285_v21  ;;  %v7450_v11 = vrot.slane %v5288_v40, 2  ;;  %vm748_vm0 = vcmp.lt.s32.totalorder %v4873_v6, 12  ;;  %v7460_v14 = vrot.slane %v5279_v16, 2 }
 0x189   : > { %v5315_v58 = vunpack.i.h.bf16 %v4357_v27  ;;  %v5317_v62 = vunpack.i.l.bf16 %v4357_v27  ;;  %v5322_v31 = vunpack.i.l.bf16 %v4372_v47  ;;  %v1499_v49 = vsel %vm1494_vm13, %v7442_v38, %v1489_v59 }
 0x18a   : > { %4501 = vrot.lane.b32.xlu0 %v4848_v2, %s4649_s14  ;;  %v4338_v27 = vunpack.i.l.bf16 %v5271_v34  ;;  %v4495_v52 = vpack.i.bf16 %v1554_v33, %v1499_v49  ;;  %v4363_v49 = vunpack.i.l.bf16 %v5285_v21  ;;  %v7452_v21 = vpack.i.bf16 %v5130_v32, %v5108_v51 }
 0x18b   : > { %v7443_v7 = vrot.slane %v5317_v62, 5  ;;  %v7446_v59 = vrot.slane %v5322_v31, 5  ;;  %v7447_v38 = vrot.slane %v5315_v58, 5  ;;  %vm750_vm6 = vcmp.lt.s32.totalorder %v4906_v23, 12 }
 0x18c   : > { %v5344_v54 = vpop.permute.xlu1 %4366  ;;  %v4377_v28 = vpop.permute.xlu0 %4376  ;;  %4496 = vrot.lane.b32.xlu1 %v4495_v52, %s4650_s15  ;;  %v2504_v51 = vrot.slane %v4338_v27, 4  ;;  %v7458_v27 = vrot.slane %v5326_v9, 3  ;;  %vm641_vm4 = vcmp.ge.s32.totalorder %v5044_v29, 1 }
 0x18d   : > { %v5354_v2 = vsel %vm1966_vm10, %v7444_v35, %v7443_v7  ;;  %v5363_v8 = vsel %vm1966_vm10, %v7447_v38, %v7446_v59  ;;  %v5365_v34 = vunpack.i.l.bf16 %v4377_v28  ;;  %v1496_v7 = vsel %vm1494_vm13, %v1491_v19, %v7450_v11 }
 0x18e   : > { %7445 = vst [vmem:[#allocation66_spill] sm:$0xff] %v5354_v2  ;;  %7448 = vst [vmem:[#allocation67_spill] sm:$0xff] %v5363_v8  ;;  %v7451_v35 = vrot.slane %v5230_v44, 2  ;;  %v1556_v38 = vsel %vm728_vm9, %v1496_v7, 0.0  ;;  %v5383_v2 = vunpack.i.h.bf16 %v4372_v47  ;;  %4511 = vrot.lane.b32.xlu0 %v7452_v21, %s4650_s15  ;;  %v5394_v7 = vrot.slane %v4339_v41, 4 }
 0x18f   : > { %7449 = vst [vmem:[#allocation68_spill] sm:$0xff] %v5365_v34  ;;  %v7329_v52 = vrot.slane %v5365_v34, 5  ;;  %v7453_v47 = vrot.slane %v5227_v12, 3  ;;  %v7454_v11 = vrot.slane %v5239_v15, 3  ;;  %vm734_vm9 = vcmp.lt.s32.totalorder %v4906_v23, 13 }
 0x190   : > { %v1497_v59 = vsel %vm1494_vm13, %v7451_v35, %v1491_v19  ;;  %v5390_v33 = vpop.permute.xlu1 %4391  ;;  %v5396_v8 = vpop.permute.xlu0 %4381  ;;  %v5405_v21 = vrot.slane %v4364_v53, 4  ;;  %v7455_v19 = vrot.slane %v5301_v50, 5  ;;  %v5416_v44 = vrot.slane %v4363_v49, 4  ;;  %4506 = vrot.lane.b32.xlu1 %v4844_v1, %s4649_s14  ;;  %s4114_s14 = sshll.u32 (%p4708_p4), %s4696_s21, 7 }
 0x191   : > { %v2061_v32 = vsel %vm2047_vm5, %v7454_v11, %v7453_v47  ;;  %v4525_v35 = vpack.i.bf16 %v1556_v38, %v1497_v59  ;;  %v7457_v53 = vmov %v7454_v11  ;;  %v4369_v38 = vunpack.i.h.bf16 %v5344_v54  ;;  %s7032_s17 = scalar_lea.vmem (%p4708_p4), %s7237_s4, %s4114_s14 }
 0x192   : > { %v5413_v41 = vsel %vm1966_vm10, %v7455_v19, %v7329_v52  ;;  %v2062_v19 = vsel %vm2047_vm5, %v7458_v27, %v7457_v53  ;;  %v5430_v49 = vunpack.i.h.bf16 %v4377_v28  ;;  %v2097_v52 = vsel %vm732_vm11, %v2061_v32, 0.0 }
 0x193   : > { %7456 = vst [vmem:[#allocation69_spill] sm:$0xff] %v5413_v41  ;;  %4526 = vrot.lane.b32.xlu0 %v4525_v35, %s4650_s15  ;;  %v4368_v1 = vunpack.i.l.bf16 %v5344_v54  ;;  %v4530_v47 = vpack.i.bf16 %v2097_v52, %v2062_v19  ;;  %v7461_v53 = vrot.slane %v5288_v40, 2  ;;  %v7462_v28 = vrot.slane %v5063_v3, 2 }
 0x194   : > { %7459 = vst [vmem:[#allocation70_spill] sm:$0xff] %v5430_v49  ;;  %v4402_v11 = vpop.permute.xlu1 %4401  ;;  %v4387_v41 = vpop.permute.xlu0 %4386  ;;  %v7463_v59 = vmov %v7460_v14  ;;  %vm1085_vm11 = vcmask 64512   ;;  %v5456_v32 = vsel %vm2519_vm15, %v2504_v51, %v5394_v7  ;;  %v5469_v3 = vrot.slane %v4369_v38, 4 }
 0x195   : > { %v1495_v27 = vsel %vm1494_vm13, %v7461_v53, %v7460_v14  ;;  %v1510_v35 = vsel %vm1494_vm13, %v7463_v59, %v7462_v28  ;;  %v5449_v54 = vunpack.i.h.bf16 %v4387_v41  ;;  %7464 = vst [vmem:[#allocation71_spill] sm:$0xff] %v5456_v32  ;;  %v2534_v14 = vsel %vm2519_vm15, %v5295_v46, %v2504_v51 }
 0x196   : > { %v1558_v52 = vsel %vm730_vm12, %v1510_v35, 0.0  ;;  %v2035_v59 = vrot.slane %v5365_v34, 3  ;;  %v7465_v53 = vpack.i.bf16 %v5147_v39, %v5136_v17  ;;  %v4404_v28 = vunpack.i.h.bf16 %v4402_v11 }
 0x197   : > { %v4403_v35 = vunpack.i.l.bf16 %v4402_v11  ;;  %vm752_vm13 = vcmp.lt.s32.totalorder %v4902_v18, 12  ;;  %v2036_v16 = vrot.slane %v5430_v49, 3  ;;  %4531 = vrot.lane.b32.xlu0 %v4530_v47, %s4650_s15  ;;  %v7348_v51 = vrot.slane %v5449_v54, 5 }
 0x198   : > { %4516 = vrot.lane.b32.xlu1 %v7465_v53, %s4650_s15  ;;  %v5474_v19 = vpop.permute.xlu1 %4406  ;;  %vm1117_vm12 = vcmask 97280   ;;  %v5476_v34 = vrot.slane %v4368_v1, 4  ;;  %v4520_v17 = vpack.i.bf16 %v1558_v52, %v1495_v27  ;;  %v2617_v39 = vsel %vm748_vm0, %v5456_v32, 0.0  ;;  %v4397_v38 = vpop.permute.xlu0 %4396 }
 0x199   : > { %v5483_v11 = vsel %vm300_vm1, %v2534_v14, %v5239_v15  ;;  %v4394_v53 = vunpack.i.h.bf16 %v5390_v33  ;;  %v7467_v47 = vrot.slane %v5326_v9, 5  ;;  %v4540_v27 = vpack.i.bf16 %v2617_v39, %v2534_v14 }
 0x19a   : > { %7466 = vst [vmem:[#allocation72_spill] sm:$0xff] %v5483_v11  ;;  %v4398_v52 = vunpack.i.l.bf16 %v4397_v38  ;;  %v2508_v40 = vrot.slane %v4404_v28, 4  ;;  %v2507_v6 = vrot.slane %v4403_v35, 4  ;;  %v4399_v32 = vunpack.i.h.bf16 %v4397_v38 }
 0x19b   : > { %v5492_v1 = vsel %vm1966_vm10, %v7348_v51, %v7467_v47  ;;  %v7469_v11 = vrot.slane %v5301_v50, 3  ;;  %vm738_vm0 = vcmp.lt.s32.totalorder %v4921_v36, 13  ;;  %v4393_v57 = vunpack.i.l.bf16 %v5390_v33  ;;  %4541 = vrot.lane.b32.xlu0 %v4540_v27, %s4650_s15 }
 0x19c   : > { %7468 = vst [vmem:[#allocation73_spill] sm:$0xff] %v5492_v1  ;;  %4521 = vrot.lane.b32.xlu1 %v4520_v17, %s4650_s15  ;;  %v7471_v14 = vrot.slane %v5227_v12, 3  ;;  %v7472_v17 = vrot.slane %v5335_v43, 3  ;;  %v4384_v33 = vunpack.i.h.bf16 %v5396_v8  ;;  %v2058_v27 = vsel %vm2047_vm5, %v2035_v59, %v2036_v16 }
 0x19d   : > { %v2059_v15 = vsel %vm2047_vm5, %v7469_v11, %v2035_v59  ;;  %v7470_v47 = vmov %v7469_v11  ;;  %v5514_v11 = vpop.permute.xlu1 %4416  ;;  %v1070_v12 = vsel %vm300_vm1, %v5220_v30, %v4399_v32  ;;  %v5541_v59 = vunpack.i.l.bf16 %v4387_v41 }
 0x19e   : > { %v2060_v28 = vsel %vm2047_vm5, %v7471_v14, %v7470_v47  ;;  %v2099_v35 = vsel %vm734_vm9, %v2059_v15, 0.0  ;;  %v2057_v39 = vsel %vm2047_vm5, %v2036_v16, %v7472_v17  ;;  %v4412_v14 = vpop.permute.xlu0 %4411  ;;  %v1069_v15 = vsel %vm300_vm1, %v5224_v60, %v4398_v52 }
 0x19f   : > { %v4535_v38 = vpack.i.bf16 %v2099_v35, %v2060_v28  ;;  %v2101_v47 = vsel %vm736_vm3, %v2057_v39, 0.0  ;;  %v4414_v1 = vunpack.i.h.bf16 %v4412_v14  ;;  %v4413_v17 = vunpack.i.l.bf16 %v4412_v14 }
 0x1a0   : > { %v4560_v51 = vpack.i.bf16 %v2101_v47, %v2058_v27  ;;  %v5530_v28 = vsel %vm2519_vm15, %v5293_v45, %v2507_v6  ;;  %v2532_v16 = vsel %vm2519_vm15, %v5394_v7, %v5293_v45  ;;  %v5539_v60 = vsel %vm2519_vm15, %v2508_v40, %v5416_v44 }
 0x1a1   : > { %4536 = vrot.lane.b32.xlu1 %v4535_v38, %s4650_s15  ;;  %7473 = vst [vmem:[#allocation74_spill] sm:$0xff] %v5539_v60  ;;  %v1086_v30 = vsel %vm1085_vm11, %v1069_v15, %v4413_v17  ;;  %v1087_v32 = vsel %vm1085_vm11, %v1070_v12, %v4414_v1  ;;  %v2619_v52 = vsel %vm750_vm6, %v5530_v28, 0.0  ;;  %v4427_v35 = vpop.permute.xlu1 %4426  ;;  %vm754_vm3 = vcmp.lt.s32.totalorder %v4921_v36, 12 }
 0x1a2   : > { %4561 = vrot.lane.b32.xlu0 %v4560_v51, %s4650_s15  ;;  %v4383_v45 = vunpack.i.l.bf16 %v5396_v8  ;;  %v1102_v7 = vpack.c.bf16 %v1087_v32, %v1086_v30  ;;  %v5553_v41 = vsel %vm300_vm1, %v2532_v16, %v5301_v50  ;;  %v4545_v39 = vpack.i.bf16 %v2619_v52, %v2532_v16  ;;  %v5555_v51 = vpop.permute.xlu0 %4421 }
 0x1a3   : > { %7474 = vst [vmem:[#allocation75_spill] sm:$0xff] %v5553_v41  ;;  %vm756_vm9 = vcmp.lt.s32.totalorder %v5009_v22, 12  ;;  %v5558_v12 = vrot.slane %v4394_v53, 4  ;;  %v2530_v1 = vsel %vm2519_vm15, %v2507_v6, %v2508_v40  ;;  %v2621_v38 = vsel %vm752_vm13, %v5539_v60, 0.0 }
 0x1a4   : > { %v5565_v8 = vunpack.i.h.bf16 %v4427_v35  ;;  %v5567_v27 = vrot.slane %v4393_v57, 4  ;;  %v5572_v47 = vsel %vm300_vm1, %v2530_v1, %v5430_v49  ;;  %v4565_v14 = vpack.i.bf16 %v2621_v38, %v2530_v1  ;;  %4180 = vmatprep.mubr.msk.bf16.mxu1 %vm1117_vm12, %v1102_v7 }
 0x1a5   : > { %4546 = vrot.lane.b32.xlu1 %v4545_v39, %s4650_s15  ;;  %7475 = vst [vmem:[#allocation76_spill] sm:$0xff] %v5572_v47  ;;  %v5574_v53 = vunpack.i.l.bf16 %v4427_v35  ;;  %v7351_v40 = vrot.slane %v5541_v59, 5  ;;  %v4409_v6 = vunpack.i.h.bf16 %v5474_v19  ;;  %v7476_v57 = vrot.slane %v5317_v62, 3  ;;  %v4432_v30 = vpop.permute.xlu1 %4431 }
 0x1a6   : > { %v7352_v15 = vrot.slane %v5565_v8, 5  ;;  %v7477_v17 = vrot.slane %v5297_v63, 3  ;;  %vm742_vm6 = vcmp.lt.s32.totalorder %v5011_v24, 13  ;;  %v5587_v32 = vrot.slane %v4384_v33, 4  ;;  %4566 = vrot.lane.b32.xlu0 %v4565_v14, %s4650_s15  ;;  %v4442_v39 = vpop.permute.xlu0 %4441 }
 0x1a7   : > { %v5589_v52 = vrot.slane %v4383_v45, 4  ;;  %v7355_v7 = vrot.slane %v5574_v53, 5  ;;  %vm744_vm13 = vcmp.lt.s32.totalorder %v5013_v25, 13  ;;  %v7480_v45 = vrot.slane %v5335_v43, 3 }
 0x1a8   : > { %v2055_v16 = vsel %vm2047_vm5, %v7477_v17, %v7476_v57  ;;  %v5601_v1 = vsel %vm1966_vm10, %v7352_v15, %v7351_v40  ;;  %v7479_v33 = vmov %v7477_v17  ;;  %v7481_v57 = vrot.slane %v5322_v31, 3 }
 0x1a9   : > { %7478 = vst [vmem:[#allocation77_spill] sm:$0xff] %v5601_v1  ;;  %v2056_v38 = vsel %vm2047_vm5, %v7480_v45, %v7479_v33  ;;  %v2103_v14 = vsel %vm738_vm0, %v2055_v16, 0.0  ;;  %v7482_v17 = vrot.slane %v5315_v58, 3  ;;  %v7483_v40 = vrot.slane %v5383_v2, 5 }
 0x1aa   : > { %v4550_v18 = vpack.i.bf16 %v2103_v14, %v2056_v38  ;;  %v7486_v16 = vrot.slane %v5317_v62, 3  ;;  %v4408_v1 = vunpack.i.l.bf16 %v5474_v19  ;;  %vm758_vm0 = vcmp.lt.s32.totalorder %v5011_v24, 12  ;;  %v7546_v24 = vld [vmem:[#allocation45_spill] sm:$0xff] }
 0x1ab   : > { %v2053_v35 = vsel %vm2047_vm5, %v7482_v17, %v7481_v57  ;;  %v5623_v15 = vsel %vm1966_vm10, %v7483_v40, %v7355_v7  ;;  %v7485_v33 = vmov %v7482_v17  ;;  %v1072_v17 = vsel %vm300_vm1, %v5168_v5, %v4409_v6  ;;  %v5637_v7 = vpop.permute.xlu1 %4436 }
 0x1ac   : > { %7484 = vst [vmem:[#allocation78_spill] sm:$0xff] %v5623_v15  ;;  %v2054_v45 = vsel %vm2047_vm5, %v7486_v16, %v7485_v33  ;;  %v2105_v23 = vsel %vm740_vm2, %v2053_v35, 0.0  ;;  %4551 = vrot.lane.b32.xlu1 %v4550_v18, %s4650_s15  ;;  %v4434_v38 = vunpack.i.h.bf16 %v4432_v30  ;;  %v5645_v35 = vsel %vm2519_vm15, %v5405_v21, %v5476_v34  ;;  %v4457_v33 = vpop.permute.xlu0 %4456 }
 0x1ad   : > { %v4570_v40 = vpack.i.bf16 %v2105_v23, %v2054_v45  ;;  %v2528_v5 = vsel %vm2519_vm15, %v5416_v44, %v5405_v21  ;;  %v5655_v23 = vsel %vm2519_vm15, %v5469_v3, %v5589_v52  ;;  %vm760_vm2 = vcmp.lt.s32.totalorder %v5013_v25, 12 }
 0x1ae   : > { %v2044_v18 = vrot.slane %v5565_v8, 3  ;;  %v2043_v19 = vrot.slane %v5574_v53, 3  ;;  %v4433_v6 = vunpack.i.l.bf16 %v4432_v30  ;;  %v4444_v14 = vunpack.i.h.bf16 %v4442_v39 }
 0x1af   : > { %4571 = vrot.lane.b32.xlu0 %v4570_v40, %s4650_s15  ;;  %v4443_v16 = vunpack.i.l.bf16 %v4442_v39  ;;  %v2623_v44 = vsel %vm754_vm3, %v5645_v35, 0.0  ;;  %v5666_v21 = vsel %vm300_vm1, %v2528_v5, %v5297_v63  ;;  %v2526_v45 = vsel %vm2519_vm15, %v5476_v34, %v5469_v3  ;;  %v4447_v36 = vpop.permute.xlu1 %4446  ;;  %v7554_v63 = vld [vmem:[#allocation41_spill] sm:$0xff] }
 0x1b0   : > { %7487 = vst [vmem:[#allocation79_spill] sm:$0xff] %v5666_v21  ;;  %v1071_v40 = vsel %vm300_vm1, %v5195_v61, %v4408_v1  ;;  %v4555_v30 = vpack.i.bf16 %v2623_v44, %v2528_v5  ;;  %v2625_v39 = vsel %vm756_vm9, %v5655_v23, 0.0  ;;  %v5680_v57 = vsel %vm300_vm1, %v2526_v45, %v5315_v58 }
 0x1b1   : > { %7488 = vst [vmem:[#allocation80_spill] sm:$0xff] %v5680_v57  ;;  %vm746_vm3 = vcmp.lt.s32.totalorder %v5023_v10, 13  ;;  %v4419_v15 = vunpack.i.h.bf16 %v5514_v11  ;;  %v2516_v3 = vrot.slane %v4434_v38, 4  ;;  %v4580_v34 = vpack.i.bf16 %v2625_v39, %v2526_v45 }
 0x1b2   : > { %v4459_v21 = vunpack.i.h.bf16 %v4457_v33  ;;  %v2515_v61 = vrot.slane %v4433_v6, 4  ;;  %4556 = vrot.lane.b32.xlu1 %v4555_v30, %s4650_s15  ;;  %v4458_v1 = vunpack.i.l.bf16 %v4457_v33  ;;  %v7489_v5 = vrot.slane %v5383_v2, 3 }
 0x1b3   : > { %v7490_v22 = vrot.slane %v5541_v59, 3  ;;  %vm762_vm9 = vcmp.lt.s32.totalorder %v5023_v10, 12  ;;  %v1074_v38 = vsel %vm300_vm1, %v5261_v20, %v4444_v14  ;;  %v1073_v6 = vsel %vm300_vm1, %v5276_v0, %v4443_v16  ;;  %4581 = vrot.lane.b32.xlu0 %v4580_v34, %s4650_s15 }
 0x1b4   : > { %v2051_v44 = vsel %vm2047_vm5, %v7489_v5, %v2043_v19  ;;  %v7491_v33 = vmov %v7489_v5  ;;  %v7492_v45 = vrot.slane %v5322_v31, 3  ;;  %v1091_v39 = vsel %vm1085_vm11, %v1074_v38, %v4459_v21 }
 0x1b5   : > { %v2049_v57 = vsel %vm2047_vm5, %v2044_v18, %v7490_v22  ;;  %v2107_v22 = vsel %vm742_vm6, %v2051_v44, 0.0  ;;  %v2050_v20 = vsel %vm2047_vm5, %v2043_v19, %v2044_v18  ;;  %v1090_v14 = vsel %vm1085_vm11, %v1073_v6, %v4458_v1  ;;  %v4452_v19 = vpop.permute.xlu1 %4451 }
 0x1b6   : > { %v2052_v30 = vsel %vm2047_vm5, %v7492_v45, %v7491_v33  ;;  %v2109_v0 = vsel %vm744_vm13, %v2049_v57, 0.0  ;;  %v4449_v34 = vunpack.i.h.bf16 %v4447_v36  ;;  %v4448_v60 = vunpack.i.l.bf16 %v4447_v36 }
 0x1b7   : > { %v4575_v5 = vpack.i.bf16 %v2107_v22, %v2052_v30  ;;  %v4595_v16 = vpack.i.bf16 %v2109_v0, %v2050_v20  ;;  %v5717_v44 = vsel %vm2519_vm15, %v5587_v32, %v2515_v61  ;;  %v2524_v18 = vsel %vm2519_vm15, %v5589_v52, %v5587_v32 }
 0x1b8   : > { %v5726_v57 = vsel %vm2519_vm15, %v2516_v3, %v5567_v27  ;;  %v2522_v36 = vsel %vm2519_vm15, %v2515_v61, %v2516_v3  ;;  %v4418_v21 = vunpack.i.l.bf16 %v5514_v11  ;;  %v1088_v1 = vsel %vm1085_vm11, %v1071_v40, %v4448_v60 }
 0x1b9   : > { %4576 = vrot.lane.b32.xlu1 %v4575_v5, %s4650_s15  ;;  %4596 = vrot.lane.b32.xlu0 %v4595_v16, %s4650_s15  ;;  %v1089_v38 = vsel %vm1085_vm11, %v1072_v17, %v4449_v34  ;;  %v2627_v32 = vsel %vm758_vm0, %v5717_v44, 0.0  ;;  %v5739_v33 = vsel %vm300_vm1, %v2524_v18, %v5383_v2  ;;  %v2629_v11 = vsel %vm760_vm2, %v5726_v57, 0.0 }
 0x1ba   : > { %v1103_v52 = vpack.c.bf16 %v1089_v38, %v1088_v1  ;;  %v4585_v6 = vpack.i.bf16 %v2627_v32, %v2524_v18  ;;  %7493 = vst [vmem:[#allocation81_spill] sm:$0xff] %v5739_v33  ;;  %v1104_v3 = vpack.c.bf16 %v1091_v39, %v1090_v14  ;;  %v5746_v60 = vsel %vm300_vm1, %v2522_v36, %v5565_v8 }
 0x1bb   : > { %7494 = vst [vmem:[#allocation82_spill] sm:$0xff] %v5746_v60  ;;  %v4600_v17 = vpack.i.bf16 %v2629_v11, %v2522_v36  ;;  %v4454_v40 = vunpack.i.h.bf16 %v4452_v19  ;;  %v4453_v61 = vunpack.i.l.bf16 %v4452_v19  ;;  %v7495_v45 = vrot.slane %v5449_v54, 3 }
 0x1bc   : > { %v7496_v30 = vrot.slane %v5541_v59, 3  ;;  %v7497_v5 = vrot.slane %v5326_v9, 3  ;;  %4181 = vmatmul.mubr.msk.bf16.vlgmr.msra.gmra.mrb[8].mxu1 %vm1117_vm12, %v1103_v52  ;;  %v2520_v0 = vsel %vm2519_vm15, %v5567_v27, %v5558_v12  ;;  %v850_v14 = vsel %vm641_vm4, %v5253_v37, 0.0 }
 0x1bd   : > { %4586 = vrot.lane.b32.xlu1 %v4585_v6, %s4650_s15  ;;  %v7498_v39 = vmov %v7495_v45  ;;  %4601 = vrot.lane.b32.xlu0 %v4600_v17, %s4650_s15  ;;  %v2535_v34 = vsel %vm2519_vm15, %v5558_v12, %v5295_v46  ;;  %v5779_v18 = vsel %vm300_vm1, %v2520_v0, %v5449_v54  ;;  %v3365_v27 = vsel %vm3339_vm8, %v4812_v56, 0.0 }
 0x1be   : > { %v2048_v22 = vsel %vm2047_vm5, %v7496_v30, %v7495_v45  ;;  %v2063_v20 = vsel %vm2047_vm5, %v7498_v39, %v7497_v5  ;;  %4184 = vmatprep.mubr.msk.bf16.mxu1 %vm1117_vm12, %v1104_v3  ;;  %7499 = vst [vmem:[#allocation83_spill] sm:$0xff] %v5779_v18  ;;  %v1076_v37 = vsel %vm300_vm1, %v5249_v42, %v4419_v15  ;;  %v2631_v46 = vsel %vm762_vm9, %v2535_v34, 0.0  ;;  %v7549_v18 = vld [vmem:[#allocation18_spill] sm:$0xff] }
 0x1bf   : > { %v2111_v16 = vsel %vm746_vm3, %v2063_v20, 0.0  ;;  %v1075_v36 = vsel %vm300_vm1, %v850_v14, %v4418_v21  ;;  %v3366_v1 = vadd.f32 %v3365_v27, %v5068_v55  ;;  %v1093_v32 = vsel %vm1085_vm11, %v1076_v37, %v4454_v40  ;;  %v7500_v21 = vld [vmem:[#allocation26_spill] sm:$0xff]  ;;  %v7504_v14 = vld [vmem:[#allocation43_spill] sm:$0xff]  ;;  %v7505_v27 = vld [vmem:[#allocation8_spill] sm:$0xff] }
 0x1c0   : > { %v4590_v19 = vpack.i.bf16 %v2111_v16, %v2048_v22  ;;  %v1092_v38 = vsel %vm1085_vm11, %v1075_v36, %v4453_v61  ;;  %v3416_v12 = vsel %vm3339_vm8, %v5061_v13, 0.0  ;;  %v3390_v52 = vmul.f32 %v4812_v56, %v4812_v56  ;;  %v7501_v13 = vld [vmem:[#allocation42_spill] sm:$0xff]  ;;  %v7502_v61 = vld [vmem:[#allocation51_spill] sm:$0xff] }
 0x1c1   : > { %v3417_v42 = vadd.f32 %v3416_v12, %v5070_v48  ;;  %v435_v15 = vadd.s32 64, %v4862_v4  ;;  %v437_v55 = vadd.s32 80, %v4862_v4  ;;  %2975 = vrot.lane.b32.xlu0 %v4738_v26, %s4651_s30  ;;  %v3367_v6 = vsel %vm3339_vm8, %v7500_v21, 0.0  ;;  %v7503_v22 = vld [vmem:[#allocation59_spill] sm:$0xff] }
 0x1c2   : > { %4591 = vrot.lane.b32.xlu1 %v4590_v19, %s4650_s15  ;;  %v1105_v11 = vpack.c.bf16 %v1093_v32, %v1092_v38  ;;  %vm683_vm5 = vcmp.ge.s32.totalorder %v7501_v13, 4  ;;  %v4605_v3 = vpack.i.bf16 %v2631_v46, %v2520_v0  ;;  %v3391_v17 = vmul.f32 %v7500_v21, %v7500_v21  ;;  %v7506_v37 = vld [vmem:[#allocation27_spill] sm:$0xff] }
 0x1c3   : > { %v3368_v40 = vadd.f32 %v3367_v6, %v3366_v1  ;;  %v439_v48 = vadd.s32 96, %v4862_v4  ;;  %v2249_v45 = vsel %vm1142_vm7, %v7502_v61, 0  ;;  %v3418_v30 = vsel %vm3339_vm8, %v3390_v52, 0.0 }
 0x1c4   : > { %v7361_v5 = vrot.slane %v7503_v22, 5  ;;  %v441_v39 = vadd.s32 112, %v4862_v4  ;;  %4185 = vmatmul.mubr.msk.bf16.gmra.mrb[12].mxu1 %vm1117_vm12, %v1105_v11  ;;  %v3419_v20 = vadd.f32 %v3418_v30, %v3417_v42  ;;  %v7360_v0 = vrot.slane %v5430_v49, 5  ;;  %v7514_v30 = vld [vmem:[#allocation12_spill] sm:$0xff] }
 0x1c5   : > { %vm687_vm15 = vcmp.ge.s32.totalorder %v7504_v14, 4  ;;  %v2568_v16 = vsel %vm683_vm5, %v2535_v34, 0.0  ;;  %2977 = vrot.lane.b32.xlu0 %v7505_v27, %s4651_s30  ;;  %4215 = vmatpush3.bf16.msra.mxu1 %v2249_v45  ;;  %v3369_v36 = vsel %vm3339_vm8, %v7506_v37, 0.0  ;;  %v5820_v19 = vand.u32 15, %v435_v15  ;;  %v7508_v15 = vld [vmem:[#allocation31_spill] sm:$0xff] }
 0x1c6   : > { %4606 = vrot.lane.b32.xlu1 %v4605_v3, %s4650_s15  ;;  %v7507_v1 = vrot.slane %v5326_v9, 5  ;;  %v3420_v32 = vsel %vm3339_vm8, %v3391_v17, 0.0  ;;  %v5831_v34 = vand.u32 15, %v437_v55  ;;  %v5833_v46 = vand.u32 15, %v439_v48  ;;  %v7509_v55 = vld [vmem:[#allocation5_spill] sm:$0xff]  ;;  %v7510_v17 = vld [vmem:[#allocation68_spill] sm:$0xff] }
 0x1c7   : > { %v3370_v12 = vadd.f32 %v3369_v36, %v3368_v40  ;;  %v3392_v52 = vmul.f32 %v7506_v37, %v7506_v37  ;;  %v2572_v42 = vsel %vm687_vm15, %v5530_v28, 0.0  ;;  %vm691_vm6 = vcmp.ge.s32.totalorder %v5820_v19, 4 }
 0x1c8   : > { %v5828_v38 = vsel %vm1966_vm10, %v7507_v1, %v7361_v5  ;;  %v5843_v6 = vsel %vm300_vm1, %v2568_v16, %v5326_v9  ;;  %v5845_v11 = vand.u32 15, %v441_v39  ;;  %v3421_v3 = vadd.f32 %v3420_v32, %v3419_v20  ;;  %v7518_v1 = vld [vmem:[#allocation22_spill] sm:$0xff]  ;;  %v7543_v5 = vld [vmem:[#allocation61_spill] sm:$0xff] }
 0x1c9   : > { %2981 = vrot.lane.b32.xlu0 %v7509_v55, %s4651_s30  ;;  %v7511_v40 = vrot.slane %v7510_v17, 5  ;;  %vm693_vm13 = vcmp.ge.s32.totalorder %v5831_v34, 4  ;;  %vm695_vm0 = vcmp.ge.s32.totalorder %v5833_v46, 4  ;;  %v2576_v9 = vsel %vm691_vm6, %v5645_v35, 0.0 }
 0x1ca   : > { %3005 = vrot.lane.b32.xlu1 %v7508_v15, %s4651_s30  ;;  %vm697_vm2 = vcmp.ge.s32.totalorder %v5845_v11, 4  ;;  %v3371_v48 = vrot.slane %v3370_v12, 4  ;;  %v5863_v61 = vsel %vm300_vm1, %v2572_v42, %v7510_v17  ;;  %v3422_v45 = vsel %vm3339_vm8, %v3392_v52, 0.0 }
 0x1cb   : > { %v5855_v28 = vsel %vm1966_vm10, %v7511_v40, %v7360_v0  ;;  %7513 = vst [vmem:[#allocation42_spill] sm:$0xff] %v5863_v61  ;;  %v7515_v39 = vrot.slane %v5315_v58, 5  ;;  %v7516_v20 = vrot.slane %v5317_v62, 5  ;;  %v2578_v35 = vsel %vm693_vm13, %v5655_v23, 0.0  ;;  %v7540_v0 = vld [vmem:[#allocation32_spill] sm:$0xff] }
 0x1cc   : > { %7512 = vst [vmem:[#allocation26_spill] sm:$0xff] %v5855_v28  ;;  %v2580_v36 = vsel %vm695_vm0, %v5717_v44, 0.0  ;;  %v3423_v32 = vadd.f32 %v3422_v45, %v3421_v3  ;;  %v2582_v52 = vsel %vm697_vm2, %v5726_v57, 0.0  ;;  %v5883_v42 = vsel %vm300_vm1, %v2576_v9, %v5317_v62  ;;  %v7526_v62 = vld [vmem:[#allocation23_spill] sm:$0xff]  ;;  %v7556_v61 = vld [vmem:[#allocation48_spill] sm:$0xff]  ;;  %v7567_v28 = vld [vmem:[#allocation53_spill] sm:$0xff] }
 0x1cd   : > { %v5874_v16 = vsel %vm1966_vm10, %v7516_v20, %v7515_v39  ;;  %2985 = vrot.lane.b32.xlu0 %v7518_v1, %s4651_s30  ;;  %7519 = vst [vmem:[#allocation59_spill] sm:$0xff] %v5883_v42  ;;  %v7520_v58 = vrot.slane %v5383_v2, 5  ;;  %v7521_v17 = vrot.slane %v5322_v31, 5  ;;  %v7523_v23 = vrot.slane %v5565_v8, 5 }
 0x1ce   : > { %2979 = vrot.lane.b32.xlu1 %v7514_v30, %s4651_s30  ;;  %7517 = vst [vmem:[#allocation51_spill] sm:$0xff] %v5874_v16  ;;  %v7524_v44 = vrot.slane %v5574_v53, 5  ;;  %v3372_v57 = vadd.f32 %v3371_v48, %v3370_v12  ;;  %v5905_v2 = vsel %vm300_vm1, %v2578_v35, %v5322_v31  ;;  %v5909_v9 = vsel %vm300_vm1, %v2580_v36, %v5574_v53  ;;  %v7532_v12 = vld [vmem:[#allocation19_spill] sm:$0xff]  ;;  %v7534_v53 = vld [vmem:[#allocation17_spill] sm:$0xff] }
 0x1cf   : > { %v5891_v40 = vsel %vm1966_vm10, %v7521_v17, %v7520_v58  ;;  %7527 = vst [vmem:[#allocation27_spill] sm:$0xff] %v5905_v2  ;;  %7528 = vst [vmem:[#allocation31_spill] sm:$0xff] %v5909_v9  ;;  %v7529_v8 = vrot.slane %v5449_v54, 5  ;;  %v7530_v45 = vrot.slane %v5541_v59, 5  ;;  %v5923_v48 = vsel %vm300_vm1, %v2582_v52, %v5541_v59  ;;  %v7535_v54 = vld [vmem:[#allocation15_spill] sm:$0xff]  ;;  %v7536_v58 = vld [vmem:[#allocation14_spill] sm:$0xff] }
 0x1d0   : > { %7522 = vst [vmem:[#allocation43_spill] sm:$0xff] %v5891_v40  ;;  %v5899_v3 = vsel %vm1966_vm10, %v7524_v44, %v7523_v23  ;;  %7533 = vst [vmem:[#allocation68_spill] sm:$0xff] %v5923_v48  ;;  %v3424_v31 = vrot.slane %v3423_v32, 4  ;;  %v3373_v20 = vrot.slane %v3372_v57, 2  ;;  %v7537_v17 = vld [vmem:[#allocation25_spill] sm:$0xff]  ;;  %v7538_v59 = vld [vmem:[#allocation24_spill] sm:$0xff]  ;;  %v4423_v40 = vunpack.i.l.bf16 %v5555_v51 }
 0x1d1   : > { %7525 = vst [vmem:[#allocation8_spill] sm:$0xff] %v5899_v3  ;;  %v5917_v39 = vsel %vm1966_vm10, %v7530_v45, %v7529_v8  ;;  %2989 = vrot.lane.b32.xlu0 %v7532_v12, %s4651_s30  ;;  %v7539_v52 = vld [vmem:[#allocation29_spill] sm:$0xff]  ;;  %v7365_v25 = vrot.slane %v7543_v5, 6  ;;  %v789_v10 = vrot.slane %v7538_v59, 7  ;;  %vm1413_vm8 = vcmp.lt.s32.totalorder %v4862_v4, 2 }
 0x1d2   : > { %2983 = vrot.lane.b32.xlu1 %v7526_v62, %s4651_s30  ;;  %7531 = vst [vmem:[#allocation5_spill] sm:$0xff] %v5917_v39  ;;  %v3425_v35 = vadd.f32 %v3424_v31, %v3423_v32  ;;  %v3374_v36 = vadd.f32 %v3373_v20, %v3372_v57  ;;  %v7541_v57 = vld [vmem:[#allocation30_spill] sm:$0xff]  ;;  %v7542_v31 = vld [vmem:[#allocation3_spill] sm:$0xff]  ;;  %vm651_vm3 = vcmp.ge.s32.totalorder %v7501_v13, 2  ;;  %vm643_vm9 = vcmp.ge.s32.totalorder %v5820_v19, 1  ;;  %v7551_v39 = vld [vmem:[#allocation4_spill] sm:$0xff] }
 0x1d3   : > { %vm645_vm5 = vcmp.ge.s32.totalorder %v5831_v34, 1  ;;  %vm653_vm15 = vcmp.ge.s32.totalorder %v7554_v63, 2  ;;  %v1401_v47 = vrot.slane %v7556_v61, 6  ;;  %vm655_vm6 = vcmp.ge.s32.totalorder %v7504_v14, 2 }
 0x1d4   : > { %v3426_v23 = vrot.slane %v3425_v35, 2  ;;  %v3375_v44 = vrot.slane %v3374_v36, 1  ;;  %vm647_vm13 = vcmp.ge.s32.totalorder %v5833_v46, 1  ;;  %vm659_vm0 = vcmp.ge.s32.totalorder %v5820_v19, 2 }
 0x1d5   : > { %2993 = vrot.lane.b32.xlu0 %v7535_v54, %s4651_s30  ;;  %vm657_vm2 = vcmp.ge.s32.totalorder %v5044_v29, 2 }
 0x1d6   : > { %2987 = vrot.lane.b32.xlu1 %v7534_v53, %s4651_s30  ;;  %v3427_v8 = vadd.f32 %v3426_v23, %v3425_v35  ;;  %v3376_v45 = vadd.f32 %v3375_v44, %v3374_v36  ;;  %v787_v35 = vrot.slane %v7536_v58, 7  ;;  %v7544_v36 = vld [vmem:[#allocation7_spill] sm:$0xff]  ;;  %v7545_v23 = vld [vmem:[#allocation46_spill] sm:$0xff] }
 0x1d7   : > { %v1397_v44 = vrot.slane %v7545_v23, 6 }
 0x1d8   : > { %v3428_v32 = vrot.slane %v3427_v8, 1 }
 0x1d9   : > { %2997 = vrot.lane.b32.xlu0 %v7537_v17, %s4651_s30 }
 0x1da   : > { %2991 = vrot.lane.b32.xlu1 %v7536_v58, %s4651_s30  ;;  %v3429_v20 = vadd.f32 %v3428_v32, %v3427_v8  ;;  %v1429_v8 = vsel %vm1413_vm8, %v7365_v25, %v1397_v44  ;;  %v790_v32 = vrot.slane %v7537_v17, 7 }
 0x1db   : > { %v1462_v33 = vsel %vm651_vm3, %v1429_v8, 0.0  ;;  %vm649_vm3 = vcmp.ge.s32.totalorder %v5845_v11, 1 }
 0x1dc   : > { %v1623_v42 = vsel %vm300_vm1, %v1462_v33, %v4738_v26 }
 0x1dd   : > { %3001 = vrot.lane.b32.xlu0 %v7539_v52, %s4651_s30 }
 0x1de   : > { %2995 = vrot.lane.b32.xlu1 %v7538_v59, %s4651_s30 }
 0x1e1   : > { %3431 = vrot.lane.b32.xlu0 %v3376_v45, %s4652_s6  ;;  %v788_v45 = vrot.slane %v7535_v54, 7 }
 0x1e2   : > { %2999 = vrot.lane.b32.xlu1 %v7540_v0, %s4651_s30 }
 0x1e3   : > { %v801_v25 = vsel %vm795_vm14, %v788_v45, %v789_v10  ;;  %v802_v60 = vsel %vm795_vm14, %v787_v35, %v788_v45 }
 0x1e5   : > { %3274 = vrot.lane.b32.xlu0 %v7542_v31, %s4652_s6  ;;  %v1398_v31 = vrot.slane %v7546_v24, 6 }
 0x1e6   : > { %3003 = vrot.lane.b32.xlu1 %v7541_v57, %s4651_s30 }
 0x1e7   : > { %v1428_v2 = vsel %vm1413_vm8, %v1397_v44, %v1398_v31  ;;  %v4462_v3 = vpop.permute.xlu0 %4461  ;;  %v7552_v44 = vld [vmem:[#allocation11_spill] sm:$0xff] }
 0x1e8   : > { %v4463_v45 = vunpack.i.l.bf16 %v4462_v3 }
 0x1e9   : > { %3278 = vrot.lane.b32.xlu0 %v7544_v36, %s4652_s6  ;;  %v7548_v36 = vrot.slane %v7532_v12, 7 }
 0x1ea   : > { %3435 = vrot.lane.b32.xlu1 %v3429_v20, %s4652_s6  ;;  %v7547_v20 = vld [vmem:[#allocation6_spill] sm:$0xff]  ;;  %v1639_v16 = vsel %vm1085_vm11, %v1623_v42, %v4463_v45  ;;  %v7560_v42 = vld [vmem:[#allocation56_spill] sm:$0xff]  ;;  %v7561_v45 = vld [vmem:[#allocation9_spill] sm:$0xff] }
 0x1eb   : > { %v803_v48 = vsel %vm795_vm14, %v7548_v36, %v787_v35  ;;  %v5990_v35 = vsel %vm645_vm5, %v801_v25, 0.0  ;;  %v1624_v25 = vsel %vm300_vm1, %v1428_v2, %v7505_v27  ;;  %v4467_v33 = vpop.permute.xlu0 %4466  ;;  %v7558_v27 = vrot.slane %v7541_v57, 7 }
 0x1ec   : > { %v852_v36 = vsel %vm643_vm9, %v803_v48, 0.0  ;;  %v4464_v48 = vunpack.i.h.bf16 %v4462_v3  ;;  %v7559_v2 = vrot.slane %v7539_v52, 7  ;;  %v4468_v41 = vunpack.i.l.bf16 %v4467_v33 }
 0x1ed   : > { %3282 = vrot.lane.b32.xlu0 %v7549_v18, %s4652_s6  ;;  %v5982_v18 = vsel %vm795_vm14, %v789_v10, %v790_v32  ;;  %v7553_v10 = vrot.slane %v7540_v0, 7 }
 0x1ee   : > { %3276 = vrot.lane.b32.xlu1 %v7547_v20, %s4652_s6  ;;  %v7550_v20 = vld [vmem:[#allocation44_spill] sm:$0xff]  ;;  %v1640_v3 = vsel %vm1085_vm11, %v1624_v25, %v4464_v48  ;;  %v4469_v25 = vunpack.i.h.bf16 %v4467_v33 }
 0x1ef   : > { %v1399_v9 = vrot.slane %v7550_v20, 6  ;;  %v5998_v8 = vsel %vm795_vm14, %v790_v32, %v7553_v10  ;;  %v7555_v32 = vld [vmem:[#allocation47_spill] sm:$0xff]  ;;  %v1655_v26 = vpack.c.bf16 %v1640_v3, %v1639_v16  ;;  %v1077_v3 = vsel %vm300_vm1, %v852_v36, %v4423_v40 }
 0x1f0   : > { %v1400_v10 = vrot.slane %v7555_v32, 6  ;;  %v1094_v49 = vsel %vm1085_vm11, %v1077_v3, %v4468_v41  ;;  %v4438_v41 = vunpack.i.l.bf16 %v5637_v7 }
 0x1f1   : > { %3286 = vrot.lane.b32.xlu0 %v7552_v44, %s4652_s6  ;;  %v1427_v44 = vsel %vm1413_vm8, %v1398_v31, %v1399_v9  ;;  %v6021_v31 = vsel %vm795_vm14, %v7559_v2, %v7558_v27  ;;  %4198 = vmatprep.mubr.msk.bf16.mxu0 %vm1117_vm12, %v1655_v26  ;;  %v7562_v2 = vld [vmem:[#allocation54_spill] sm:$0xff] }
 0x1f2   : > { %3280 = vrot.lane.b32.xlu1 %v7551_v39, %s4652_s6  ;;  %v4424_v39 = vunpack.i.h.bf16 %v5555_v51  ;;  %v7557_v51 = vld [vmem:[#allocation16_spill] sm:$0xff]  ;;  %v1426_v27 = vsel %vm1413_vm8, %v1399_v9, %v1400_v10  ;;  %v1405_v33 = vrot.slane %v7562_v2, 6  ;;  %v1425_v40 = vsel %vm1413_vm8, %v1400_v10, %v1401_v47  ;;  %v7564_v9 = vld [vmem:[#allocation13_spill] sm:$0xff]  ;;  %v7566_v10 = vld [vmem:[#allocation50_spill] sm:$0xff] }
 0x1f3   : > { %v4439_v2 = vunpack.i.h.bf16 %v5637_v7  ;;  %v1626_v3 = vsel %vm300_vm1, %v1426_v27, %v7509_v55  ;;  %v1403_v43 = vrot.slane %v7566_v10, 6  ;;  %v7569_v27 = vrot.slane %v7560_v42, 6 }
 0x1f4   : > { %v1078_v16 = vsel %vm300_vm1, %v802_v60, %v4424_v39  ;;  %v4472_v39 = vpop.permute.xlu1 %4471 }
 0x1f5   : > { %3290 = vrot.lane.b32.xlu0 %v7561_v45, %s4652_s6  ;;  %v7563_v45 = vld [vmem:[#allocation49_spill] sm:$0xff]  ;;  %v1095_v60 = vsel %vm1085_vm11, %v1078_v16, %v4469_v25  ;;  %v4473_v26 = vunpack.i.l.bf16 %v4472_v39  ;;  %v7565_v25 = vld [vmem:[#allocation20_spill] sm:$0xff] }
 0x1f6   : > { %3284 = vrot.lane.b32.xlu1 %v7557_v51, %s4652_s6  ;;  %v1464_v51 = vsel %vm653_vm15, %v1427_v44, 0.0  ;;  %v1402_v48 = vrot.slane %v7563_v45, 6  ;;  %v1106_v36 = vpack.c.bf16 %v1095_v60, %v1094_v49  ;;  %v4474_v44 = vunpack.i.h.bf16 %v4472_v39 }
 0x1f7   : > { %v1625_v16 = vsel %vm300_vm1, %v1464_v51, %v7514_v30  ;;  %v1466_v30 = vsel %vm655_vm6, %v1425_v40, 0.0  ;;  %v1080_v40 = vsel %vm300_vm1, %v5982_v18, %v4439_v2  ;;  %v7572_v2 = vld [vmem:[#allocation52_spill] sm:$0xff]  ;;  %vm661_vm15 = vcmp.ge.s32.totalorder %v5831_v34, 2 }
 0x1f8   : > { %v1641_v49 = vsel %vm1085_vm11, %v1625_v16, %v4473_v26  ;;  %v1642_v60 = vsel %vm1085_vm11, %v1626_v3, %v4474_v44  ;;  %4188 = vmatprep.mubr.msk.bf16.mxu1 %vm1117_vm12, %v1106_v36  ;;  %v1424_v39 = vsel %vm1413_vm8, %v1401_v47, %v1402_v48  ;;  %v4477_v51 = vpop.permute.xlu1 %4476  ;;  %v1421_v26 = vsel %vm1413_vm8, %v7569_v27, %v1405_v33  ;;  %v7570_v36 = vld [vmem:[#allocation10_spill] sm:$0xff]  ;;  %v4487_v16 = vpop.permute.xlu0 %4486 }
 0x1f9   : > { %3294 = vrot.lane.b32.xlu0 %v7565_v25, %s4652_s6  ;;  %v1656_v7 = vpack.c.bf16 %v1642_v60, %v1641_v49  ;;  %v7568_v25 = vld [vmem:[#allocation55_spill] sm:$0xff]  ;;  %v1423_v44 = vsel %vm1413_vm8, %v1402_v48, %v1403_v43  ;;  %v4479_v47 = vunpack.i.h.bf16 %v4477_v51  ;;  %v4478_v3 = vunpack.i.l.bf16 %v4477_v51  ;;  %v7571_v60 = vld [vmem:[#allocation28_spill] sm:$0xff] }
 0x1fa   : > { %3288 = vrot.lane.b32.xlu1 %v7564_v9, %s4652_s6  ;;  %v1406_v9 = vrot.slane %v7567_v28, 6  ;;  %v2769_v55 = vsel %vm1142_vm7, %v7568_v25, 0  ;;  %v1079_v49 = vsel %vm300_vm1, %v5990_v35, %v4438_v41  ;;  %v4489_v25 = vunpack.i.h.bf16 %v4487_v16 }
 0x1fb   : > { %v4488_v27 = vunpack.i.l.bf16 %v4487_v16  ;;  %4199 = vmatmul.mubr.msk.bf16.vlgmr.msra.gmra.mrb[8].mxu0 %vm1117_vm12, %v1656_v7  ;;  %v1627_v48 = vsel %vm300_vm1, %v1466_v30, %v7526_v62  ;;  %v1097_v51 = vsel %vm1085_vm11, %v1080_v40, %v4479_v47  ;;  %v1096_v18 = vsel %vm1085_vm11, %v1079_v49, %v4478_v3  ;;  %v7573_v7 = vld [vmem:[#allocation21_spill] sm:$0xff] }
 0x1fc   : > { %4233 = vmatpush3.bf16.msra.mxu0 %v2769_v55  ;;  %v1407_v35 = vrot.slane %v7572_v2, 6  ;;  %v1107_v16 = vpack.c.bf16 %v1097_v51, %v1096_v18  ;;  %v4492_v62 = vpop.permute.xlu0 %4491  ;;  %v7574_v30 = vrot.slane %v7539_v52, 7  ;;  %v856_v55 = vsel %vm647_vm13, %v5998_v8, 0.0  ;;  %v7580_v18 = vld [vmem:[#allocation58_spill] sm:$0xff] }
 0x1fd   : > { %3298 = vrot.lane.b32.xlu0 %v7571_v60, %s4652_s6  ;;  %v1643_v60 = vsel %vm1085_vm11, %v1627_v48, %v4488_v27  ;;  %v7576_v47 = vrot.slane %v7508_v15, 7  ;;  %v7577_v3 = vrot.slane %v7541_v57, 7  ;;  %v1420_v49 = vsel %vm1413_vm8, %v1405_v33, %v1406_v9 }
 0x1fe   : > { %3292 = vrot.lane.b32.xlu1 %v7570_v36, %s4652_s6  ;;  %v1628_v36 = vsel %vm300_vm1, %v1424_v39, %v7518_v1  ;;  %v7575_v1 = vrot.slane %v7540_v0, 7  ;;  %v4494_v27 = vunpack.i.h.bf16 %v4492_v62  ;;  %v4493_v48 = vunpack.i.l.bf16 %v4492_v62  ;;  %4189 = vmatmul.mubr.msk.bf16.gmra.mrb[16].mxu1 %vm1117_vm12, %v1107_v16 }
 0x1ff   : > { %v1644_v41 = vsel %vm1085_vm11, %v1628_v36, %v4489_v25  ;;  %v6106_v40 = vsel %vm795_vm14, %v7577_v3, %v7576_v47  ;;  %v1470_v25 = vsel %vm659_vm0, %v1421_v26, 0.0  ;;  %v7578_v8 = vrot.slane %v7560_v42, 6  ;;  %v7579_v26 = vld [vmem:[#allocation60_spill] sm:$0xff] }
 0x200   : > { %v1657_v28 = vpack.c.bf16 %v1644_v41, %v1643_v60  ;;  %v798_v39 = vsel %vm795_vm14, %v7575_v1, %v7574_v30  ;;  %v6126_v33 = vsel %vm649_vm3, %v6021_v31, 0.0  ;;  %v1408_v51 = vrot.slane %v7579_v26, 6  ;;  %v4482_v60 = vpop.permute.xlu1 %4481 }
 0x201   : > { %3302 = vrot.lane.b32.xlu0 %v7500_v21, %s4652_s6  ;;  %v1422_v36 = vsel %vm1413_vm8, %v1403_v43, %v7578_v8  ;;  %v1468_v21 = vsel %vm657_vm2, %v1423_v44, 0.0  ;;  %v1409_v41 = vrot.slane %v7580_v18, 6  ;;  %vm663_vm6 = vcmp.ge.s32.totalorder %v5833_v46, 2 }
 0x202   : > { %3296 = vrot.lane.b32.xlu1 %v7573_v7, %s4652_s6  ;;  %4202 = vmatprep.mubr.msk.bf16.mxu0 %vm1117_vm12, %v1657_v28  ;;  %v1419_v28 = vsel %vm1413_vm8, %v1406_v9, %v1407_v35  ;;  %v1631_v43 = vsel %vm300_vm1, %v1470_v25, %v7536_v58  ;;  %v1632_v44 = vsel %vm300_vm1, %v1420_v49, %v7535_v54  ;;  %v4484_v31 = vunpack.i.h.bf16 %v4482_v60  ;;  %v4502_v7 = vpop.permute.xlu0 %4501 }
 0x203   : > { %v4483_v16 = vunpack.i.l.bf16 %v4482_v60  ;;  %v1648_v62 = vsel %vm1085_vm11, %v1632_v44, %v4494_v27  ;;  %v1647_v9 = vsel %vm1085_vm11, %v1631_v43, %v4493_v48  ;;  %v1629_v30 = vsel %vm300_vm1, %v1468_v21, %v7534_v53  ;;  %v7582_v43 = vld [vmem:[#allocation62_spill] sm:$0xff] }
 0x204   : > { %v1630_v1 = vsel %vm300_vm1, %v1422_v36, %v7532_v12  ;;  %v4504_v47 = vunpack.i.h.bf16 %v4502_v7  ;;  %v4503_v3 = vunpack.i.l.bf16 %v4502_v7  ;;  %v1417_v25 = vsel %vm1413_vm8, %v1408_v51, %v1409_v41  ;;  %v4497_v8 = vpop.permute.xlu1 %4496 }
 0x205   : > { %v1646_v58 = vsel %vm1085_vm11, %v1630_v1, %v4484_v31  ;;  %v1645_v54 = vsel %vm1085_vm11, %v1629_v30, %v4483_v16  ;;  %v1472_v48 = vsel %vm661_vm15, %v1419_v28, 0.0  ;;  %vm665_vm0 = vcmp.ge.s32.totalorder %v5845_v11, 2 }
 0x206   : > { %3300 = vrot.lane.b32.xlu1 %v4812_v56, %s4652_s6  ;;  %v7581_v56 = vld [vmem:[#allocation63_spill] sm:$0xff]  ;;  %v1658_v27 = vpack.c.bf16 %v1646_v58, %v1645_v54  ;;  %v1659_v53 = vpack.c.bf16 %v1648_v62, %v1647_v9  ;;  %v1418_v12 = vsel %vm1413_vm8, %v1407_v35, %v1408_v51  ;;  %v4499_v36 = vunpack.i.h.bf16 %v4497_v8  ;;  %v4512_v60 = vpop.permute.xlu0 %4511 }
 0x207   : > { %v1410_v49 = vrot.slane %v7581_v56, 6  ;;  %v4498_v21 = vunpack.i.l.bf16 %v4497_v8  ;;  %v1411_v44 = vrot.slane %v7582_v43, 6  ;;  %v4514_v31 = vunpack.i.h.bf16 %v4512_v60 }
 0x208   : > { %v4513_v16 = vunpack.i.l.bf16 %v4512_v60  ;;  %4203 = vmatmul.mubr.msk.bf16.gmra.mrb[12].mxu0 %vm1117_vm12, %v1658_v27  ;;  %vm667_vm2 = vcmp.ge.s32.totalorder %v7501_v13, 3  ;;  %v1082_v28 = vsel %vm300_vm1, %v798_v39, %v4504_v47  ;;  %v1081_v7 = vsel %vm300_vm1, %v856_v55, %v4503_v3  ;;  %v4507_v30 = vpop.permute.xlu1 %4506  ;;  %v7583_v55 = vld [vmem:[#allocation57_spill] sm:$0xff] }
 0x209   : > { %4206 = vmatprep.mubr.msk.bf16.mxu0 %vm1117_vm12, %v1659_v53  ;;  %v1474_v35 = vsel %vm663_vm6, %v1417_v25, 0.0  ;;  %v1634_v51 = vsel %vm300_vm1, %v1418_v12, %v7537_v17  ;;  %v1099_v9 = vsel %vm1085_vm11, %v1082_v28, %v4514_v31  ;;  %v1416_v39 = vsel %vm1413_vm8, %v1409_v41, %v1410_v49  ;;  %v7584_v53 = vld [vmem:[#allocation73_spill] sm:$0xff] }
 0x20a   : > { %3304 = vrot.lane.b32.xlu1 %v7506_v37, %s4652_s6  ;;  %v1633_v37 = vsel %vm300_vm1, %v1472_v48, %v7538_v59  ;;  %v1098_v62 = vsel %vm1085_vm11, %v1081_v7, %v4513_v16  ;;  %vm669_vm15 = vcmp.ge.s32.totalorder %v7554_v63, 3  ;;  %v1952_v59 = vrot.slane %v7583_v55, 5  ;;  %v4527_v47 = vpop.permute.xlu0 %4526 }
 0x20b   : > { %v1650_v1 = vsel %vm1085_vm11, %v1634_v51, %v4499_v36  ;;  %v1649_v58 = vsel %vm1085_vm11, %v1633_v37, %v4498_v21  ;;  %v1108_v54 = vpack.c.bf16 %v1099_v9, %v1098_v62  ;;  %vm685_vm6 = vcmp.ge.s32.totalorder %v7554_v63, 4 }
 0x20c   : > { %v4509_v17 = vunpack.i.h.bf16 %v4507_v30  ;;  %v4508_v3 = vunpack.i.l.bf16 %v4507_v30  ;;  %v4529_v25 = vunpack.i.h.bf16 %v4527_v47  ;;  %v4528_v27 = vunpack.i.l.bf16 %v4527_v47  ;;  %v4517_v31 = vpop.permute.xlu1 %4516 }
 0x20d   : > { %v1415_v48 = vsel %vm1413_vm8, %v1410_v49, %v1411_v44  ;;  %v1635_v41 = vsel %vm300_vm1, %v1474_v35, %v7540_v0  ;;  %v1636_v8 = vsel %vm300_vm1, %v1416_v39, %v7539_v52  ;;  %4192 = vmatprep.mubr.msk.bf16.mxu1 %vm1117_vm12, %v1108_v54  ;;  %v2015_v12 = vsel %vm667_vm2, %v7584_v53, 0.0 }
 0x20e   : > { %v1660_v36 = vpack.c.bf16 %v1650_v1, %v1649_v58  ;;  %v1652_v21 = vsel %vm1085_vm11, %v1636_v8, %v4529_v25  ;;  %v1651_v60 = vsel %vm1085_vm11, %v1635_v41, %v4528_v27  ;;  %v2177_v49 = vsel %vm300_vm1, %v5828_v38, %v7546_v24  ;;  %v4532_v52 = vpop.permute.xlu0 %4531 }
 0x20f   : > { %v1661_v0 = vpack.c.bf16 %v1652_v21, %v1651_v60  ;;  %v4519_v16 = vunpack.i.h.bf16 %v4517_v31  ;;  %v4518_v28 = vunpack.i.l.bf16 %v4517_v31  ;;  %v7585_v7 = vrot.slane %v7543_v5, 6 }
 0x210   : > { %v1084_v35 = vsel %vm300_vm1, %v6106_v40, %v4509_v17  ;;  %v1083_v51 = vsel %vm300_vm1, %v6126_v33, %v4508_v3  ;;  %v4534_v62 = vunpack.i.h.bf16 %v4532_v52  ;;  %v4533_v9 = vunpack.i.l.bf16 %v4532_v52  ;;  %4207 = vmatmul.mubr.msk.bf16.gmra.mrb[16].mxu0 %vm1117_vm12, %v1660_v36  ;;  %v4522_v54 = vpop.permute.xlu1 %4521 }
 0x211   : > { %v1414_v37 = vsel %vm1413_vm8, %v1411_v44, %v7585_v7  ;;  %v1101_v24 = vsel %vm1085_vm11, %v1084_v35, %v4519_v16  ;;  %v1100_v38 = vsel %vm1085_vm11, %v1083_v51, %v4518_v28  ;;  %v2176_v30 = vsel %vm300_vm1, %v2015_v12, %v7545_v23  ;;  %4210 = vmatprep.mubr.msk.bf16.mxu0 %vm1117_vm12, %v1661_v0  ;;  %v7590_v16 = vld [vmem:[#allocation71_spill] sm:$0xff] }
 0x212   : > { %v1476_v44 = vsel %vm665_vm0, %v1415_v48, 0.0  ;;  %v7586_v40 = vrot.slane %v7503_v22, 5  ;;  %v1109_v39 = vpack.c.bf16 %v1101_v24, %v1100_v38  ;;  %v2193_v1 = vsel %vm1085_vm11, %v2177_v49, %v4534_v62  ;;  %v4542_v23 = vpop.permute.xlu0 %4541  ;;  %v7589_v49 = vld [vmem:[#allocation69_spill] sm:$0xff]  ;;  %v7591_v38 = vld [vmem:[#allocation26_spill] sm:$0xff] }
 0x213   : > { %v2192_v58 = vsel %vm1085_vm11, %v2176_v30, %v4533_v9  ;;  %v4524_v17 = vunpack.i.h.bf16 %v4522_v54  ;;  %v4523_v3 = vunpack.i.l.bf16 %v4522_v54  ;;  %vm671_vm8 = vcmp.ge.s32.totalorder %v7504_v14, 3 }
 0x214   : > { %v1980_v33 = vsel %vm1966_vm10, %v7586_v40, %v1952_v59  ;;  %v2208_v47 = vpack.c.bf16 %v2193_v1, %v2192_v58  ;;  %v1637_v25 = vsel %vm300_vm1, %v1476_v44, %v7541_v57  ;;  %v1638_v22 = vsel %vm300_vm1, %v1414_v37, %v7508_v15  ;;  %4193 = vmatmul.mubr.msk.bf16.gmra.mrb[20].mxu1 %vm1117_vm12, %v1109_v39  ;;  %v7588_v15 = vld [vmem:[#allocation72_spill] sm:$0xff]  ;;  %v4537_v31 = vpop.permute.xlu1 %4536 }
 0x215   : > { %v4544_v27 = vunpack.i.h.bf16 %v4542_v23  ;;  %v4543_v48 = vunpack.i.l.bf16 %v4542_v23  ;;  %v1654_v41 = vsel %vm1085_vm11, %v1638_v22, %v4524_v17  ;;  %v1653_v8 = vsel %vm1085_vm11, %v1637_v25, %v4523_v3  ;;  %v7595_v23 = vld [vmem:[#allocation75_spill] sm:$0xff] }
 0x216   : > { %4216 = vmatprep.mubr.msk.bf16.mxu1 %vm1117_vm12, %v2208_v47  ;;  %v7587_v53 = vrot.slane %v5301_v50, 5  ;;  %v2017_v57 = vsel %vm669_vm15, %v1980_v33, 0.0  ;;  %v1662_v36 = vpack.c.bf16 %v1654_v41, %v1653_v8  ;;  %v2019_v0 = vsel %vm671_vm8, %v7589_v49, 0.0  ;;  %v4562_v7 = vpop.permute.xlu0 %4561  ;;  %v7593_v47 = vld [vmem:[#allocation70_spill] sm:$0xff]  ;;  %v7596_v8 = vld [vmem:[#allocation76_spill] sm:$0xff] }
 0x217   : > { %v2713_v21 = vsel %vm1085_vm11, %v7588_v15, %v4544_v27  ;;  %v2712_v60 = vsel %vm1085_vm11, %v5843_v6, %v4543_v48  ;;  %v2570_v50 = vsel %vm685_vm6, %v7590_v16, 0.0  ;;  %v4539_v52 = vunpack.i.h.bf16 %v4537_v31  ;;  %v7600_v49 = vld [vmem:[#allocation66_spill] sm:$0xff] }
 0x218   : > { %v1979_v12 = vsel %vm1966_vm10, %v1952_v59, %v7587_v53  ;;  %v2728_v28 = vpack.c.bf16 %v2713_v21, %v2712_v60  ;;  %v4538_v59 = vunpack.i.l.bf16 %v4537_v31  ;;  %v2178_v37 = vsel %vm300_vm1, %v2017_v57, %v7550_v20  ;;  %4211 = vmatmul.mubr.msk.bf16.gmra.mrb[20].mxu0 %vm1117_vm12, %v1662_v36  ;;  %v7592_v20 = vld [vmem:[#allocation65_spill] sm:$0xff]  ;;  %v4547_v39 = vpop.permute.xlu1 %4546  ;;  %v7597_v53 = vld [vmem:[#allocation42_spill] sm:$0xff]  ;;  %v7598_v57 = vld [vmem:[#allocation64_spill] sm:$0xff] }
 0x219   : > { %v2179_v35 = vsel %vm300_vm1, %v1979_v12, %v7555_v32  ;;  %v4564_v51 = vunpack.i.h.bf16 %v4562_v7  ;;  %v4563_v62 = vunpack.i.l.bf16 %v4562_v7  ;;  %v2180_v24 = vsel %vm300_vm1, %v2019_v0, %v7556_v61 }
 0x21a   : > { %v2195_v6 = vsel %vm1085_vm11, %v2179_v35, %v4539_v52  ;;  %v2194_v9 = vsel %vm1085_vm11, %v2178_v37, %v4538_v59  ;;  %v2181_v30 = vsel %vm300_vm1, %v7591_v38, %v7563_v45  ;;  %4234 = vmatprep.mubr.msk.bf16.mxu0 %vm1117_vm12, %v2728_v28  ;;  %v1956_v44 = vrot.slane %v7592_v20, 5  ;;  %v4567_v3 = vpop.permute.xlu0 %4566 }
 0x21b   : > { %v2209_v32 = vpack.c.bf16 %v2195_v6, %v2194_v9  ;;  %v2197_v40 = vsel %vm1085_vm11, %v2181_v30, %v4564_v51  ;;  %v2196_v33 = vsel %vm1085_vm11, %v2180_v24, %v4563_v62  ;;  %v4549_v58 = vunpack.i.h.bf16 %v4547_v39  ;;  %v7601_v62 = vld [vmem:[#allocation54_spill] sm:$0xff]  ;;  %v7602_v9 = vld [vmem:[#allocation53_spill] sm:$0xff]  ;;  %v7603_v24 = vld [vmem:[#allocation51_spill] sm:$0xff] }
 0x21c   : > { %v2210_v1 = vpack.c.bf16 %v2197_v40, %v2196_v33  ;;  %v4548_v54 = vunpack.i.l.bf16 %v4547_v39  ;;  %v7594_v17 = vrot.slane %v7593_v47, 5  ;;  %v2698_v45 = vsel %vm300_vm1, %v2570_v50, %v7583_v55  ;;  %v7604_v30 = vld [vmem:[#allocation74_spill] sm:$0xff] }
 0x21d   : > { %4217 = vmatmul.mubr.msk.bf16.vlgmr.msra.gmra.mrb[24].mxu1 %vm1117_vm12, %v2209_v32  ;;  %vm673_vm0 = vcmp.ge.s32.totalorder %v5044_v29, 3  ;;  %vm675_vm2 = vcmp.ge.s32.totalorder %v5820_v19, 3  ;;  %v2715_v25 = vsel %vm1085_vm11, %v7595_v23, %v4549_v58  ;;  %v4569_v27 = vunpack.i.h.bf16 %v4567_v3  ;;  %v7606_v23 = vld [vmem:[#allocation67_spill] sm:$0xff] }
 0x21e   : > { %v1976_v61 = vsel %vm1966_vm10, %v7594_v17, %v1956_v44  ;;  %v2714_v22 = vsel %vm1085_vm11, %v2698_v45, %v4548_v54  ;;  %v4568_v48 = vunpack.i.l.bf16 %v4567_v3  ;;  %4220 = vmatprep.mubr.msk.bf16.mxu1 %vm1117_vm12, %v2210_v1  ;;  %v7599_v36 = vrot.slane %v7598_v57, 5  ;;  %v4552_v31 = vpop.permute.xlu1 %4551 }
 0x21f   : > { %v2729_v41 = vpack.c.bf16 %v2715_v25, %v2714_v22  ;;  %v2717_v55 = vsel %vm1085_vm11, %v7596_v8, %v4569_v27  ;;  %v2021_v21 = vsel %vm673_vm0, %v1976_v61, 0.0  ;;  %v2023_v0 = vsel %vm675_vm2, %v7600_v49, 0.0  ;;  %v7605_v61 = vld [vmem:[#allocation79_spill] sm:$0xff]  ;;  %v7607_v27 = vld [vmem:[#allocation80_spill] sm:$0xff] }
 0x220   : > { %v2716_v12 = vsel %vm1085_vm11, %v7597_v53, %v4568_v48  ;;  %v1975_v15 = vsel %vm1966_vm10, %v1956_v44, %v7599_v36  ;;  %vm689_vm15 = vcmp.ge.s32.totalorder %v5044_v29, 4  ;;  %v4554_v16 = vunpack.i.h.bf16 %v4552_v31 }
 0x221   : > { %v2730_v60 = vpack.c.bf16 %v2717_v55, %v2716_v12  ;;  %4235 = vmatmul.mubr.msk.bf16.vlgmr.msra.gmra.mrb[24].mxu0 %vm1117_vm12, %v2729_v41  ;;  %v4553_v50 = vunpack.i.l.bf16 %v4552_v31  ;;  %v4572_v28 = vpop.permute.xlu0 %4571  ;;  %v2182_v52 = vsel %vm300_vm1, %v2021_v21, %v7566_v10  ;;  %v2183_v59 = vsel %vm300_vm1, %v1975_v15, %v7560_v42  ;;  %v7608_v41 = vld [vmem:[#allocation59_spill] sm:$0xff] }
 0x222   : > { %v4574_v7 = vunpack.i.h.bf16 %v4572_v28  ;;  %v4573_v37 = vunpack.i.l.bf16 %v4572_v28  ;;  %v2199_v35 = vsel %vm1085_vm11, %v2183_v59, %v4554_v16  ;;  %v2184_v6 = vsel %vm300_vm1, %v2023_v0, %v7601_v62 }
 0x223   : > { %4238 = vmatprep.mubr.msk.bf16.mxu0 %vm1117_vm12, %v2730_v60  ;;  %v2198_v51 = vsel %vm1085_vm11, %v2182_v52, %v4553_v50  ;;  %v2185_v38 = vsel %vm300_vm1, %v7603_v24, %v7602_v9  ;;  %v2574_v10 = vsel %vm689_vm15, %v7604_v30, 0.0  ;;  %vm677_vm10 = vcmp.ge.s32.totalorder %v5831_v34, 3  ;;  %v7610_v60 = vld [vmem:[#allocation43_spill] sm:$0xff]  ;;  %v7611_v52 = vld [vmem:[#allocation8_spill] sm:$0xff]  ;;  %v7612_v24 = vld [vmem:[#allocation81_spill] sm:$0xff] }
 0x224   : > { %v2211_v44 = vpack.c.bf16 %v2199_v35, %v2198_v51  ;;  %v2201_v42 = vsel %vm1085_vm11, %v2185_v38, %v4574_v7  ;;  %v2200_v32 = vsel %vm1085_vm11, %v2184_v6, %v4573_v37  ;;  %v4557_v33 = vpop.permute.xlu1 %4556  ;;  %vm679_vm6 = vcmp.ge.s32.totalorder %v5833_v46, 3  ;;  %v7613_v38 = vld [vmem:[#allocation27_spill] sm:$0xff] }
 0x225   : > { %v2212_v40 = vpack.c.bf16 %v2201_v42, %v2200_v32  ;;  %v4559_v39 = vunpack.i.h.bf16 %v4557_v33  ;;  %v4558_v1 = vunpack.i.l.bf16 %v4557_v33  ;;  %v4582_v58 = vpop.permute.xlu0 %4581  ;;  %v2702_v54 = vsel %vm300_vm1, %v2574_v10, %v7592_v20  ;;  %v7609_v20 = vld [vmem:[#allocation78_spill] sm:$0xff]  ;;  %v7614_v10 = vld [vmem:[#allocation77_spill] sm:$0xff]  ;;  %v7616_v33 = vld [vmem:[#allocation31_spill] sm:$0xff] }
 0x226   : > { %4221 = vmatmul.mubr.msk.bf16.gmra.mrb[28].mxu1 %vm1117_vm12, %v2211_v44  ;;  %v4584_v47 = vunpack.i.h.bf16 %v4582_v58  ;;  %v4583_v17 = vunpack.i.l.bf16 %v4582_v58  ;;  %v2025_v25 = vsel %vm677_vm10, %v7606_v23, 0.0  ;;  %v2027_v53 = vsel %vm679_vm6, %v7609_v20, 0.0  ;;  %v7615_v32 = vld [vmem:[#allocation82_spill] sm:$0xff]  ;;  %v7619_v20 = vld [vmem:[#allocation68_spill] sm:$0xff] }
 0x227   : > { %4224 = vmatprep.mubr.msk.bf16.mxu1 %vm1117_vm12, %v2212_v40  ;;  %v2719_v45 = vsel %vm1085_vm11, %v7605_v61, %v4559_v39  ;;  %v2718_v3 = vsel %vm1085_vm11, %v2702_v54, %v4558_v1  ;;  %v2186_v21 = vsel %vm300_vm1, %v2025_v25, %v7572_v2  ;;  %v2187_v31 = vsel %vm300_vm1, %v7610_v60, %v7579_v26 }
 0x228   : > { %v2731_v22 = vpack.c.bf16 %v2719_v45, %v2718_v3  ;;  %v2721_v48 = vsel %vm1085_vm11, %v7607_v27, %v4584_v47  ;;  %v2720_v8 = vsel %vm1085_vm11, %v7608_v41, %v4583_v17  ;;  %v2188_v28 = vsel %vm300_vm1, %v2027_v53, %v7580_v18  ;;  %v7617_v45 = vld [vmem:[#allocation5_spill] sm:$0xff] }
 0x229   : > { %v2732_v12 = vpack.c.bf16 %v2721_v48, %v2720_v8  ;;  %v2189_v59 = vsel %vm300_vm1, %v7611_v52, %v7581_v56  ;;  %vm681_vm8 = vcmp.ge.s32.totalorder %v5845_v11, 3  ;;  %v2191_v3 = vsel %vm300_vm1, %v7617_v45, %v7543_v5 }
 0x22a   : > { %4239 = vmatmul.mubr.msk.bf16.gmra.mrb[28].mxu0 %vm1117_vm12, %v2731_v22  ;;  %v2029_v44 = vsel %vm681_vm8, %v7614_v10, 0.0  ;;  %vm7623_vm2 = vcmp.ge.s32.totalorder %v7554_v63, 1  ;;  %vm7628_vm8 = vcmp.ge.s32.totalorder %v7504_v14, 1 }
 0x22b   : > { %v4577_v55 = vpop.permute.xlu1 %4576  ;;  %v4597_v15 = vpop.permute.xlu0 %4596  ;;  %4242 = vmatprep.mubr.msk.bf16.mxu0 %vm1117_vm12, %v2732_v12  ;;  %v2190_v61 = vsel %vm300_vm1, %v2029_v44, %v7582_v43  ;;  %v7618_v43 = vld [vmem:[#allocation83_spill] sm:$0xff] }
 0x22c   : > { %v4579_v57 = vunpack.i.h.bf16 %v4577_v55  ;;  %v4578_v36 = vunpack.i.l.bf16 %v4577_v55  ;;  %v4599_v49 = vunpack.i.h.bf16 %v4597_v15  ;;  %v4598_v0 = vunpack.i.l.bf16 %v4597_v15 }
 0x22e   : > { %v2203_v16 = vsel %vm1085_vm11, %v2187_v31, %v4579_v57  ;;  %v2202_v50 = vsel %vm1085_vm11, %v2186_v21, %v4578_v36  ;;  %v2205_v26 = vsel %vm1085_vm11, %v2189_v59, %v4599_v49  ;;  %v2204_v7 = vsel %vm1085_vm11, %v2188_v28, %v4598_v0 }
 0x22f   : > { %v2213_v2 = vpack.c.bf16 %v2203_v16, %v2202_v50  ;;  %v4587_v37 = vpop.permute.xlu1 %4586  ;;  %v2214_v35 = vpack.c.bf16 %v2205_v26, %v2204_v7  ;;  %v4602_v6 = vpop.permute.xlu0 %4601 }
 0x230   : > { %v4589_v51 = vunpack.i.h.bf16 %v4587_v37  ;;  %v4588_v62 = vunpack.i.l.bf16 %v4587_v37  ;;  %v4604_v9 = vunpack.i.h.bf16 %v4602_v6  ;;  %v4603_v18 = vunpack.i.l.bf16 %v4602_v6 }
 0x231   : > { %4225 = vmatmul.mubr.msk.bf16.gmra.mrb[32].mxu1 %vm1117_vm12, %v2213_v2 }
 0x232   : > { %v2723_v56 = vsel %vm1085_vm11, %v7612_v24, %v4589_v51  ;;  %v2722_v30 = vsel %vm1085_vm11, %v7613_v38, %v4588_v62  ;;  %4228 = vmatprep.mubr.msk.bf16.mxu1 %vm1117_vm12, %v2214_v35  ;;  %v2725_v40 = vsel %vm1085_vm11, %v7615_v32, %v4604_v9  ;;  %v2724_v39 = vsel %vm1085_vm11, %v7616_v33, %v4603_v18 }
 0x233   : > { %v2733_v42 = vpack.c.bf16 %v2723_v56, %v2722_v30  ;;  %v2734_v58 = vpack.c.bf16 %v2725_v40, %v2724_v39  ;;  %v2976_v17 = vpop.permute.xlu0 %2975 }
 0x234   : > { %v4592_v1 = vpop.permute.xlu1 %4591  ;;  %v3023_v36 = vrot.slane %v2976_v17, 7  ;;  %v3071_v16 = vrot.slane %v2976_v17, 1 }
 0x235   : > { %v4594_v54 = vunpack.i.h.bf16 %v4592_v1  ;;  %v4593_v47 = vunpack.i.l.bf16 %v4592_v1  ;;  %4243 = vmatmul.mubr.msk.bf16.gmra.mrb[32].mxu0 %vm1117_vm12, %v2733_v42  ;;  %v7626_v42 = vld [vmem:[#allocation33_spill] sm:$0xff] }
 0x236   : > { %4246 = vmatprep.mubr.msk.bf16.mxu0 %vm1117_vm12, %v2734_v58  ;;  %vm7627_vm6 = vcmp.lt.s32.totalorder %v7626_v42, 15 }
 0x237   : > { %v2207_v23 = vsel %vm1085_vm11, %v2191_v3, %v4594_v54  ;;  %v2206_v25 = vsel %vm1085_vm11, %v2190_v61, %v4593_v47  ;;  %v2978_v8 = vpop.permute.xlu0 %2977 }
 0x238   : > { %v2215_v22 = vpack.c.bf16 %v2207_v23, %v2206_v25  ;;  %v4607_v27 = vpop.permute.xlu1 %4606  ;;  %v3024_v53 = vrot.slane %v2978_v8, 7  ;;  %v3072_v60 = vrot.slane %v2978_v8, 1 }
 0x239   : > { %v4609_v48 = vunpack.i.h.bf16 %v4607_v27  ;;  %v4608_v41 = vunpack.i.l.bf16 %v4607_v27 }
 0x23a   : > { %4229 = vmatmul.mubr.msk.bf16.gmra.mrb[36].mxu1 %vm1117_vm12, %v2215_v22  ;;  %v3053_v49 = vsel %vm795_vm14, %v3023_v36, %v3024_v53 }
 0x23b   : > { %v2727_v55 = vsel %vm1085_vm11, %v7618_v43, %v4609_v48  ;;  %v2726_v5 = vsel %vm1085_vm11, %v7619_v20, %v4608_v41  ;;  %v6354_v21 = vpop.permute.xlu0 %2981  ;;  %vm7620_vm11 = vcmp.ge.s32.totalorder %v7501_v13, 1  ;;  %v3120_v35 = vmax.f32 %v3053_v49, %v2978_v8  ;;  %v7631_v49 = vld [vmem:[#allocation35_spill] sm:$0xff] }
 0x23c   : > { %v2735_v12 = vpack.c.bf16 %v2727_v55, %v2726_v5  ;;  %v6351_v57 = vpop.permute.xlu1 %3005  ;;  %v3026_v59 = vrot.slane %v6354_v21, 7  ;;  %v3074_v13 = vrot.slane %v6354_v21, 1 }
 0x23d   : > { %v3038_v15 = vrot.slane %v6351_v57, 7  ;;  %v3086_v31 = vrot.slane %v6351_v57, 1 }
 0x23e   : > { %4247 = vmatmul.mubr.msk.bf16.gmra.mrb[36].mxu0 %vm1117_vm12, %v2735_v12  ;;  %vm7621_vm12 = vcmp.lt.s32.totalorder %v4862_v4, 7 }
 0x23f   : > { %v3054_v0 = vsel %vm795_vm14, %v3038_v15, %v3023_v36  ;;  %v6367_v7 = vpop.permute.xlu0 %2985  ;;  %v3101_v37 = vsel %vm7621_vm12, %v3071_v16, %v3072_v60  ;;  %vm7622_vm0 = vmmov %vm7621_vm12 }
 0x240   : > { %v3055_v50 = vsel %vm7620_vm11, %v3054_v0, 0.0  ;;  %v2980_v28 = vpop.permute.xlu1 %2979  ;;  %v6375_v51 = vsel %vm7622_vm0, %v3086_v31, %v3071_v16  ;;  %v3028_v18 = vrot.slane %v6367_v7, 7  ;;  %vm7624_vm15 = vmmov %vm7622_vm0  ;;  %v3076_v30 = vrot.slane %v6367_v7, 1 }
 0x241   : > { %v3119_v52 = vmax.f32 %v3055_v50, %v2976_v17  ;;  %v3025_v2 = vrot.slane %v2980_v28, 7  ;;  %v3073_v26 = vrot.slane %v2980_v28, 1  ;;  %vm7625_vm10 = vmmov %vm7622_vm0 }
 0x242   : > { %vm7629_vm11 = vmmov %vm7622_vm0 }
 0x243   : > { %v3135_v62 = vmax.f32 %v3119_v52, %v3101_v37  ;;  %v3051_v6 = vsel %vm795_vm14, %v3025_v2, %v3026_v59  ;;  %v3052_v9 = vsel %vm795_vm14, %v3024_v53, %v3025_v2  ;;  %v3099_v56 = vsel %vm7624_vm15, %v3073_v26, %v3074_v13  ;;  %v6397_v33 = vpop.permute.xlu0 %2989  ;;  %vm7630_vm12 = vmmov %vm7622_vm0 }
 0x244   : > { %v3057_v24 = vsel %vm7623_vm2, %v3052_v9, 0.0  ;;  %v3100_v38 = vsel %vm7625_vm10, %v3072_v60, %v3073_v26  ;;  %v2984_v10 = vpop.permute.xlu1 %2983  ;;  %v3122_v40 = vmax.f32 %v3051_v6, %v6354_v21  ;;  %v3030_v61 = vrot.slane %v6397_v33, 7  ;;  %vm7633_vm2 = vmmov %vm7625_vm10 }
 0x245   : > { %4077 = vst.msk [vmem:[%s6390_s18 + $0x200] sm:$0xff] %vm300_vm1, %v3135_v62  ;;  %v3205_v44 = vmul.f32 %v3135_v62, %v3135_v62  ;;  %v3104_v63 = vsel %vm7627_vm6, %v3100_v38, 0.0  ;;  %v3121_v32 = vmax.f32 %v3057_v24, %v2980_v28  ;;  %v3168_v1 = vsel %vm300_vm1, %v3135_v62, 0.0  ;;  %vm7634_vm15 = vmmov %vm7633_vm2 }
 0x246   : > { %v3136_v39 = vmax.f32 %v3120_v35, %v3104_v63  ;;  %v3027_v58 = vrot.slane %v2984_v10, 7  ;;  %v3075_v54 = vrot.slane %v2984_v10, 1  ;;  %v3078_v45 = vrot.slane %v6397_v33, 1  ;;  %vm7638_vm6 = vmmov %vm7633_vm2 }
 0x247   : > { %v3137_v47 = vmax.f32 %v3121_v32, %v3099_v56  ;;  %v3221_v17 = vsel %vm300_vm1, %v3205_v44, 0.0  ;;  %v6415_v55 = vpop.permute.xlu0 %2993  ;;  %vm7632_vm0 = vcmp.lt.s32.totalorder %v7631_v49, 15 }
 0x248   : > { %4078 = vst.msk [vmem:[%s6390_s18 + $0x208] sm:$0xff] %vm300_vm1, %v3136_v39  ;;  %v3169_v3 = vsel %vm300_vm1, %v3136_v39, 0.0  ;;  %v3206_v23 = vmul.f32 %v3136_v39, %v3136_v39  ;;  %v3049_v25 = vsel %vm795_vm14, %v3027_v58, %v3028_v18  ;;  %v3050_v22 = vsel %vm795_vm14, %v3026_v59, %v3027_v58  ;;  %v2988_v27 = vpop.permute.xlu1 %2987  ;;  %v7635_v39 = vld [vmem:[#allocation34_spill] sm:$0xff] }
 0x249   : > { %4079 = vst.msk [vmem:[%s6390_s18 + $0x210] sm:$0xff] %vm300_vm1, %v3137_v47  ;;  %v3170_v48 = vadd.f32 %v3169_v3, %v3168_v1  ;;  %v3171_v41 = vsel %vm300_vm1, %v3137_v47, 0.0  ;;  %v3207_v8 = vmul.f32 %v3137_v47, %v3137_v47  ;;  %v3059_v43 = vsel %vm7628_vm8, %v3050_v22, 0.0  ;;  %vm7641_vm8 = vmmov %vm7633_vm2 }
 0x24a   : > { %v3222_v20 = vsel %vm300_vm1, %v3206_v23, 0.0  ;;  %v3097_v5 = vsel %vm7629_vm11, %v3075_v54, %v3076_v30  ;;  %v3098_v53 = vsel %vm7630_vm12, %v3074_v13, %v3075_v54  ;;  %v3123_v12 = vmax.f32 %v3059_v43, %v2984_v10  ;;  %vm7642_vm11 = vmmov %vm7633_vm2 }
 0x24b   : > { %v3172_v36 = vadd.f32 %v3171_v41, %v3170_v48  ;;  %v3223_v21 = vadd.f32 %v3222_v20, %v3221_v17  ;;  %v3224_v60 = vsel %vm300_vm1, %v3207_v8, 0.0  ;;  %v3106_v14 = vsel %vm7632_vm0, %v3098_v53, 0.0  ;;  %v6428_v35 = vpop.permute.xlu0 %2997  ;;  %vm7646_vm0 = vmmov %vm7633_vm2 }
 0x24c   : > { %v3124_v0 = vmax.f32 %v3049_v25, %v6367_v7  ;;  %v3138_v16 = vmax.f32 %v3122_v40, %v3106_v14  ;;  %v3139_v50 = vmax.f32 %v3123_v12, %v3097_v5  ;;  %v3029_v28 = vrot.slane %v2988_v27, 7  ;;  %v2992_v52 = vpop.permute.xlu1 %2991 }
 0x24d   : > { %v3225_v59 = vadd.f32 %v3224_v60, %v3223_v21  ;;  %v3077_v2 = vrot.slane %v2988_v27, 1  ;;  %v3032_v26 = vrot.slane %v6415_v55, 7  ;;  %v3080_v37 = vrot.slane %v6415_v55, 1 }
 0x24e   : > { %4080 = vst.msk [vmem:[%s6390_s18 + $0x218] sm:$0xff] %vm300_vm1, %v3138_v16  ;;  %4081 = vst.msk [vmem:[%s6390_s18 + $0x220] sm:$0xff] %vm300_vm1, %v3139_v50  ;;  %v3173_v13 = vsel %vm300_vm1, %v3138_v16, 0.0  ;;  %v3175_v7 = vsel %vm300_vm1, %v3139_v50, 0.0  ;;  %v3208_v62 = vmul.f32 %v3138_v16, %v3138_v16  ;;  %v3209_v6 = vmul.f32 %v3139_v50, %v3139_v50  ;;  %v7639_v16 = vld [vmem:[#allocation36_spill] sm:$0xff] }
 0x24f   : > { %v3174_v9 = vadd.f32 %v3173_v13, %v3172_v36  ;;  %v3047_v24 = vsel %vm795_vm14, %v3029_v28, %v3030_v61  ;;  %v3048_v56 = vsel %vm795_vm14, %v3028_v18, %v3029_v28  ;;  %v3095_v38 = vsel %vm7633_vm2, %v3077_v2, %v3078_v45  ;;  %v6456_v54 = vpop.permute.xlu0 %3001 }
 0x250   : > { %v3226_v10 = vsel %vm300_vm1, %v3208_v62, 0.0  ;;  %v3228_v44 = vsel %vm300_vm1, %v3209_v6, 0.0  ;;  %v3061_v42 = vsel %vm641_vm4, %v3048_v56, 0.0  ;;  %v3096_v63 = vsel %vm7634_vm15, %v3076_v30, %v3077_v2  ;;  %v6452_v32 = vpop.permute.xlu1 %2995  ;;  %vm7637_vm4 = vmmov %vm7633_vm2 }
 0x251   : > { %v3176_v40 = vadd.f32 %v3175_v7, %v3174_v9  ;;  %v3227_v18 = vadd.f32 %v3226_v10, %v3225_v59  ;;  %vm7636_vm10 = vcmp.lt.s32.totalorder %v7635_v39, 15  ;;  %v3125_v58 = vmax.f32 %v3061_v42, %v2988_v27  ;;  %vm7651_vm15 = vmmov %vm7646_vm0 }
 0x252   : > { %v3108_v1 = vsel %vm7636_vm10, %v3096_v63, 0.0  ;;  %v3126_v47 = vmax.f32 %v3047_v24, %v6397_v33  ;;  %v3031_v29 = vrot.slane %v2992_v52, 7  ;;  %v3079_v3 = vrot.slane %v2992_v52, 1 }
 0x253   : > { %v3140_v17 = vmax.f32 %v3124_v0, %v3108_v1  ;;  %v3229_v23 = vadd.f32 %v3228_v44, %v3227_v18  ;;  %v3141_v25 = vmax.f32 %v3125_v58, %v3095_v38  ;;  %v3034_v30 = vrot.slane %v6428_v35, 7  ;;  %v6479_v36 = vpop.permute.xlu0 %3431 }
 0x254   : > { %v3082_v22 = vrot.slane %v6428_v35, 1  ;;  %v3045_v27 = vsel %vm795_vm14, %v3031_v29, %v3032_v26  ;;  %v3046_v8 = vsel %vm795_vm14, %v3030_v61, %v3031_v29  ;;  %v6472_v43 = vpop.permute.xlu1 %2999  ;;  %v3093_v61 = vsel %vm7637_vm4, %v3079_v3, %v3080_v37 }
 0x255   : > { %4082 = vst.msk [vmem:[%s6390_s18 + $0x228] sm:$0xff] %vm300_vm1, %v3140_v17  ;;  %v3177_v48 = vsel %vm300_vm1, %v3140_v17, 0.0  ;;  %v3210_v41 = vmul.f32 %v3140_v17, %v3140_v17  ;;  %4083 = vst.msk [vmem:[%s6390_s18 + $0x230] sm:$0xff] %vm300_vm1, %v3141_v25  ;;  %v3179_v5 = vsel %vm300_vm1, %v3141_v25, 0.0  ;;  %v3211_v53 = vmul.f32 %v3141_v25, %v3141_v25  ;;  %v7643_v17 = vld [vmem:[#allocation37_spill] sm:$0xff] }
 0x256   : > { %v3178_v20 = vadd.f32 %v3177_v48, %v3176_v40  ;;  %v3063_v12 = vsel %vm643_vm9, %v3046_v8, 0.0  ;;  %v3094_v60 = vsel %vm7638_vm6, %v3078_v45, %v3079_v3  ;;  %vm7640_vm9 = vcmp.lt.s32.totalorder %v7639_v16, 15 }
 0x257   : > { %v3230_v21 = vsel %vm300_vm1, %v3210_v41, 0.0  ;;  %v3127_v49 = vmax.f32 %v3063_v12, %v2992_v52  ;;  %v3232_v0 = vsel %vm300_vm1, %v3211_v53, 0.0  ;;  %v3110_v50 = vsel %vm7640_vm9, %v3094_v60, 0.0  ;;  %v3275_v6 = vpop.permute.xlu0 %3274 }
 0x258   : > { %v3180_v14 = vadd.f32 %v3179_v5, %v3178_v20  ;;  %v3231_v19 = vadd.f32 %v3230_v21, %v3229_v23  ;;  %v3128_v28 = vmax.f32 %v3045_v27, %v6415_v55  ;;  %v3142_v59 = vmax.f32 %v3126_v47, %v3110_v50  ;;  %v6495_v13 = vpop.permute.xlu1 %3003  ;;  %4093 = vst.msk [vmem:[%s6390_s18 + $0x280] sm:$0xff] %vm300_vm1, %v3275_v6 }
 0x259   : > { %v3143_v2 = vmax.f32 %v3127_v49, %v3093_v61  ;;  %v3033_v33 = vrot.slane %v6452_v32, 7  ;;  %v3081_v52 = vrot.slane %v6452_v32, 1  ;;  %v3036_v7 = vrot.slane %v6456_v54, 7 }
 0x25a   : > { %v3233_v45 = vadd.f32 %v3232_v0, %v3231_v19  ;;  %v3084_v62 = vrot.slane %v6456_v54, 1  ;;  %4084 = vst.msk [vmem:[%s6390_s18 + $0x238] sm:$0xff] %vm300_vm1, %v3142_v59  ;;  %v3181_v9 = vsel %vm300_vm1, %v3142_v59, 0.0  ;;  %v3212_v56 = vmul.f32 %v3142_v59, %v3142_v59  ;;  %v7647_v59 = vld [vmem:[#allocation38_spill] sm:$0xff] }
 0x25b   : > { %4085 = vst.msk [vmem:[%s6390_s18 + $0x240] sm:$0xff] %vm300_vm1, %v3143_v2  ;;  %v3183_v24 = vsel %vm300_vm1, %v3143_v2, 0.0  ;;  %v3213_v38 = vmul.f32 %v3143_v2, %v3143_v2  ;;  %v3182_v10 = vadd.f32 %v3181_v9, %v3180_v14  ;;  %v3043_v44 = vsel %vm795_vm14, %v3033_v33, %v3034_v30  ;;  %v3279_v23 = vpop.permute.xlu0 %3278 }
 0x25c   : > { %v3044_v42 = vsel %vm795_vm14, %v3032_v26, %v3033_v33  ;;  %v3091_v63 = vsel %vm7641_vm8, %v3081_v52, %v3082_v22  ;;  %v3234_v40 = vsel %vm300_vm1, %v3212_v56, 0.0  ;;  %v3092_v1 = vsel %vm7642_vm11, %v3080_v37, %v3081_v52  ;;  %v6528_v26 = vpop.permute.xlu1 %3435  ;;  %4095 = vst.msk [vmem:[%s6390_s18 + $0x290] sm:$0xff] %vm300_vm1, %v3279_v23  ;;  %v7649_v33 = vld [vmem:[#allocation40_spill] sm:$0xff] }
 0x25d   : > { %v3236_v18 = vsel %vm300_vm1, %v3213_v38, 0.0  ;;  %v3065_v39 = vsel %vm645_vm5, %v3044_v42, 0.0  ;;  %v3184_v58 = vadd.f32 %v3183_v24, %v3182_v10  ;;  %v3235_v47 = vadd.f32 %v3234_v40, %v3233_v45  ;;  %vm7645_vm5 = vmmov %vm7633_vm2 }
 0x25e   : > { %vm7644_vm12 = vcmp.lt.s32.totalorder %v7643_v17, 15  ;;  %v3129_v3 = vmax.f32 %v3065_v39, %v6452_v32  ;;  %v3130_v34 = vmax.f32 %v3043_v44, %v6428_v35  ;;  %v3035_v55 = vrot.slane %v6472_v43, 7 }
 0x25f   : > { %v3112_v29 = vsel %vm7644_vm12, %v3092_v1, 0.0  ;;  %v3083_v48 = vrot.slane %v6472_v43, 1  ;;  %v3237_v37 = vadd.f32 %v3236_v18, %v3235_v47  ;;  %v3037_v27 = vrot.slane %v6495_v13, 7  ;;  %v3283_v14 = vpop.permute.xlu0 %3282 }
 0x260   : > { %v3144_v25 = vmax.f32 %v3128_v28, %v3112_v29  ;;  %v3145_v41 = vmax.f32 %v3129_v3, %v3091_v63  ;;  %v3085_v8 = vrot.slane %v6495_v13, 1  ;;  %v3041_v5 = vsel %vm795_vm14, %v3035_v55, %v3036_v7  ;;  %v3277_v12 = vpop.permute.xlu1 %3276  ;;  %4097 = vst.msk [vmem:[%s6390_s18 + $0x2a0] sm:$0xff] %vm300_vm1, %v3283_v14 }
 0x261   : > { %v3042_v53 = vsel %vm795_vm14, %v3034_v30, %v3035_v55  ;;  %4094 = vst.msk [vmem:[%s6390_s18 + $0x288] sm:$0xff] %vm300_vm1, %v3277_v12  ;;  %v3089_v30 = vsel %vm7645_vm5, %v3083_v48, %v3084_v62  ;;  %v3090_v0 = vsel %vm7646_vm0, %v3082_v22, %v3083_v48  ;;  %vm7650_vm2 = vcmp.lt.s32.totalorder %v7649_v33, 15 }
 0x262   : > { %4086 = vst.msk [vmem:[%s6390_s18 + $0x248] sm:$0xff] %vm300_vm1, %v3144_v25  ;;  %v3185_v32 = vsel %vm300_vm1, %v3144_v25, 0.0  ;;  %v3214_v20 = vmul.f32 %v3144_v25, %v3144_v25  ;;  %4087 = vst.msk [vmem:[%s6390_s18 + $0x250] sm:$0xff] %vm300_vm1, %v3145_v41  ;;  %v3187_v61 = vsel %vm300_vm1, %v3145_v41, 0.0  ;;  %v3215_v60 = vmul.f32 %v3145_v41, %v3145_v41 }
 0x263   : > { %v3186_v21 = vadd.f32 %v3185_v32, %v3184_v58  ;;  %v3067_v49 = vsel %vm647_vm13, %v3042_v53, 0.0  ;;  %vm7648_vm13 = vcmp.lt.s32.totalorder %v7647_v59, 15  ;;  %v3118_v35 = vsel %vm7650_vm2, %v6375_v51, 0.0  ;;  %v3287_v56 = vpop.permute.xlu0 %3286 }
 0x264   : > { %v3238_v19 = vsel %vm300_vm1, %v3214_v20, 0.0  ;;  %v3131_v16 = vmax.f32 %v3067_v49, %v6472_v43  ;;  %v3240_v28 = vsel %vm300_vm1, %v3215_v60, 0.0  ;;  %v3114_v2 = vsel %vm7648_vm13, %v3090_v0, 0.0  ;;  %v3281_v52 = vpop.permute.xlu1 %3280  ;;  %4099 = vst.msk [vmem:[%s6390_s18 + $0x2b0] sm:$0xff] %vm300_vm1, %v3287_v56 }
 0x265   : > { %v3188_v46 = vadd.f32 %v3187_v61, %v3186_v21  ;;  %v3239_v50 = vadd.f32 %v3238_v19, %v3237_v37  ;;  %v3146_v45 = vmax.f32 %v3130_v34, %v3114_v2  ;;  %v3039_v43 = vsel %vm795_vm14, %v3037_v27, %v3038_v15  ;;  %4096 = vst.msk [vmem:[%s6390_s18 + $0x298] sm:$0xff] %vm300_vm1, %v3281_v52 }
 0x266   : > { %v3147_v22 = vmax.f32 %v3131_v16, %v3089_v30  ;;  %v3132_v9 = vmax.f32 %v3041_v5, %v6456_v54  ;;  %v3040_v24 = vsel %vm795_vm14, %v3036_v7, %v3037_v27  ;;  %v3088_v51 = vsel %vm7651_vm15, %v3084_v62, %v3085_v8  ;;  %v7652_v62 = vld [vmem:[#allocation39_spill] sm:$0xff] }
 0x267   : > { %v3241_v6 = vadd.f32 %v3240_v28, %v3239_v50  ;;  %4088 = vst.msk [vmem:[%s6390_s18 + $0x258] sm:$0xff] %vm300_vm1, %v3146_v45  ;;  %v3189_v15 = vsel %vm300_vm1, %v3146_v45, 0.0  ;;  %v3216_v10 = vmul.f32 %v3146_v45, %v3146_v45  ;;  %v3069_v7 = vsel %vm649_vm3, %v3040_v24, 0.0  ;;  %vm7654_vm3 = vmmov %vm7646_vm0  ;;  %v3291_v3 = vpop.permute.xlu0 %3290 }
 0x268   : > { %4089 = vst.msk [vmem:[%s6390_s18 + $0x260] sm:$0xff] %vm300_vm1, %v3147_v22  ;;  %v3191_v38 = vsel %vm300_vm1, %v3147_v22, 0.0  ;;  %v3217_v44 = vmul.f32 %v3147_v22, %v3147_v22  ;;  %v3190_v54 = vadd.f32 %v3189_v15, %v3188_v46  ;;  %vm7653_vm14 = vcmp.lt.s32.totalorder %v7652_v62, 15  ;;  %v3285_v58 = vpop.permute.xlu1 %3284  ;;  %4101 = vst.msk [vmem:[%s6390_s18 + $0x2c0] sm:$0xff] %vm300_vm1, %v3291_v3 }
 0x269   : > { %v3116_v42 = vsel %vm7653_vm14, %v3088_v51, 0.0  ;;  %v3134_v63 = vmax.f32 %v3039_v43, %v6351_v57  ;;  %v3242_v40 = vsel %vm300_vm1, %v3216_v10, 0.0  ;;  %v3133_v39 = vmax.f32 %v3069_v7, %v6495_v13  ;;  %4098 = vst.msk [vmem:[%s6390_s18 + $0x2a8] sm:$0xff] %vm300_vm1, %v3285_v58 }
 0x26a   : > { %v3244_v18 = vsel %vm300_vm1, %v3217_v44, 0.0  ;;  %v3148_v1 = vmax.f32 %v3132_v9, %v3116_v42  ;;  %v3192_v47 = vadd.f32 %v3191_v38, %v3190_v54  ;;  %v3243_v11 = vadd.f32 %v3242_v40, %v3241_v6 }
 0x26b   : > { %v3087_v17 = vsel %vm7654_vm3, %v3085_v8, %v3086_v31  ;;  %v3150_v29 = vmax.f32 %v3134_v63, %v3118_v35  ;;  %v3295_v8 = vpop.permute.xlu0 %3294  ;;  %vm3438_vm10 = vcmask 1040384   ;;  %vm7655_vm4 = vcmask 1041408  }
 0x26c   : > { %v3149_v23 = vmax.f32 %v3133_v39, %v3087_v17  ;;  %4090 = vst.msk [vmem:[%s6390_s18 + $0x268] sm:$0xff] %vm300_vm1, %v3148_v1  ;;  %v3193_v13 = vsel %vm300_vm1, %v3148_v1, 0.0  ;;  %v3218_v34 = vmul.f32 %v3148_v1, %v3148_v1  ;;  %v3245_v25 = vadd.f32 %v3244_v18, %v3243_v11  ;;  %v3289_v37 = vpop.permute.xlu1 %3288  ;;  %4103 = vst.msk [vmem:[%s6390_s18 + $0x2d0] sm:$0xff] %vm300_vm1, %v3295_v8 }
 0x26d   : > { %4092 = vst.msk [vmem:[%s6390_s18 + $0x278] sm:$0xff] %vm300_vm1, %v3150_v29  ;;  %v3194_v57 = vadd.f32 %v3193_v13, %v3192_v47  ;;  %v3220_v55 = vmul.f32 %v3150_v29, %v3150_v29  ;;  %4100 = vst.msk [vmem:[%s6390_s18 + $0x2b8] sm:$0xff] %vm300_vm1, %v3289_v37  ;;  %v3197_v32 = vsel %vm300_vm1, %v3150_v29, 0.0  ;;  %vm3441_vm6 = vcmask 1042432  }
 0x26e   : > { %4091 = vst.msk [vmem:[%s6390_s18 + $0x270] sm:$0xff] %vm300_vm1, %v3149_v23  ;;  %v3195_v4 = vsel %vm300_vm1, %v3149_v23, 0.0  ;;  %v3219_v31 = vmul.f32 %v3149_v23, %v3149_v23  ;;  %v3246_v48 = vsel %vm300_vm1, %v3218_v34, 0.0  ;;  %vm3443_vm9 = vcmask 1043456   ;;  %vm7656_vm5 = vmmov %vm7655_vm4 }
 0x26f   : > { %v3196_v41 = vadd.f32 %v3195_v4, %v3194_v57  ;;  %v3247_v27 = vadd.f32 %v3246_v48, %v3245_v25  ;;  %v3250_v12 = vsel %vm300_vm1, %v3220_v55, 0.0  ;;  %v3299_v60 = vpop.permute.xlu0 %3298  ;;  %vm3445_vm8 = vcmask 1044480  }
 0x270   : > { %v3248_v20 = vsel %vm300_vm1, %v3219_v31, 0.0  ;;  %v3293_v21 = vpop.permute.xlu1 %3292  ;;  %4105 = vst.msk [vmem:[%s6390_s18 + $0x2e0] sm:$0xff] %vm300_vm1, %v3299_v60  ;;  %vm3448_vm11 = vcmask 1046528   ;;  %vm3454_vm12 = vcmask 27648  }
 0x271   : > { %v6630_v5 = vadd.f32 %v3197_v32, %v3196_v41  ;;  %v3249_v53 = vadd.f32 %v3248_v20, %v3247_v27  ;;  %4102 = vst.msk [vmem:[%s6390_s18 + $0x2c8] sm:$0xff] %vm300_vm1, %v3293_v21 }
 0x273   : > { %v6633_v61 = vadd.f32 %v3250_v12, %v3249_v53  ;;  %v3303_v14 = vpop.permute.xlu0 %3302 }
 0x274   : > { %v3297_v49 = vpop.permute.xlu1 %3296  ;;  %4107 = vst.msk [vmem:[%s6390_s18 + $0x2f0] sm:$0xff] %vm300_vm1, %v3303_v14 }
 0x275   : > { %4104 = vst.msk [vmem:[%s6390_s18 + $0x2d8] sm:$0xff] %vm300_vm1, %v3297_v49 }
 0x278   : > { %v3301_v19 = vpop.permute.xlu1 %3300 }
 0x279   : > { %4106 = vst.msk [vmem:[%s6390_s18 + $0x2e8] sm:$0xff] %vm300_vm1, %v3301_v19 }
 0x27c   : > { %v3305_v30 = vpop.permute.xlu1 %3304 }
 0x27d   : > { %4108 = vst.msk [vmem:[%s6390_s18 + $0x2f8] sm:$0xff] %vm300_vm1, %v3305_v30 }
 0x28f   : > { %v4182_v0 = vpop.f32.mrb[8].mxu1 }
 0x290   : > { %1245 = vst.msk [vmem:[%s6390_s18 + $0x10] sm:$0xff] %vm300_vm1, %v4182_v0  ;;  %v1180_v16 = vpop.f32.mrb[9].mxu1  ;;  %v1298_v59 = vmul.f32 %v4182_v0, %v4182_v0  ;;  %v1262_v22 = vsel %vm300_vm1, %v4182_v0, 0.0 }
 0x291   : > { %1243 = vst.msk [vmem:[%s6390_s18] sm:$0xff] %vm300_vm1, %v1180_v16  ;;  %v1296_v46 = vmul.f32 %v1180_v16, %v1180_v16  ;;  %v4183_v50 = vpop.f32.mrb[10].mxu1  ;;  %v1259_v2 = vsel %vm300_vm1, %v1180_v16, 0.0 }
 0x292   : > { %1246 = vst.msk [vmem:[%s6390_s18 + $0x18] sm:$0xff] %vm300_vm1, %v4183_v50  ;;  %v1183_v28 = vpop.f32.mrb[11].mxu1  ;;  %v1299_v52 = vmul.f32 %v4183_v50, %v4183_v50  ;;  %v1315_v51 = vsel %vm300_vm1, %v1298_v59, 0.0  ;;  %v1264_v56 = vsel %vm300_vm1, %v4183_v50, 0.0 }
 0x293   : > { %1244 = vst.msk [vmem:[%s6390_s18 + $0x8] sm:$0xff] %vm300_vm1, %v1183_v28  ;;  %v1260_v33 = vsel %vm300_vm1, %v1183_v28, 0.0  ;;  %v1297_v35 = vmul.f32 %v1183_v28, %v1183_v28  ;;  %v1312_v43 = vsel %vm300_vm1, %v1296_v46, 0.0 }
 0x294   : > { %v1261_v45 = vadd.f32 %v1260_v33, %v1259_v2  ;;  %v1317_v54 = vsel %vm300_vm1, %v1299_v52, 0.0 }
 0x295   : > { %v1313_v6 = vsel %vm300_vm1, %v1297_v35, 0.0 }
 0x296   : > { %v1263_v9 = vadd.f32 %v1262_v22, %v1261_v45  ;;  %v1314_v24 = vadd.f32 %v1313_v6, %v1312_v43 }
 0x297   : > { %v4186_v15 = vpop.f32.mrb[12].mxu1 }
 0x298   : > { %v1316_v38 = vadd.f32 %v1315_v51, %v1314_v24  ;;  %1249 = vst.msk [vmem:[%s6390_s18 + $0x30] sm:$0xff] %vm300_vm1, %v4186_v15  ;;  %v1196_v10 = vpop.f32.mrb[13].mxu1  ;;  %v1265_v44 = vadd.f32 %v1264_v56, %v1263_v9  ;;  %v1302_v39 = vmul.f32 %v4186_v15, %v4186_v15  ;;  %v1270_v29 = vsel %vm300_vm1, %v4186_v15, 0.0 }
 0x299   : > { %1247 = vst.msk [vmem:[%s6390_s18 + $0x20] sm:$0xff] %vm300_vm1, %v1196_v10  ;;  %v1266_v7 = vsel %vm300_vm1, %v1196_v10, 0.0  ;;  %v1300_v62 = vmul.f32 %v1196_v10, %v1196_v10  ;;  %v4187_v42 = vpop.f32.mrb[14].mxu1 }
 0x29a   : > { %v1267_v63 = vadd.f32 %v1266_v7, %v1265_v44  ;;  %v1318_v40 = vadd.f32 %v1317_v54, %v1316_v38  ;;  %1250 = vst.msk [vmem:[%s6390_s18 + $0x38] sm:$0xff] %vm300_vm1, %v4187_v42  ;;  %v1199_v18 = vpop.f32.mrb[15].mxu1  ;;  %v1303_v3 = vmul.f32 %v4187_v42, %v4187_v42  ;;  %v1323_v25 = vsel %vm300_vm1, %v1302_v39, 0.0 }
 0x29b   : > { %v1319_v1 = vsel %vm300_vm1, %v1300_v62, 0.0  ;;  %1248 = vst.msk [vmem:[%s6390_s18 + $0x28] sm:$0xff] %vm300_vm1, %v1199_v18  ;;  %v1268_v58 = vsel %vm300_vm1, %v1199_v18, 0.0  ;;  %v1301_v47 = vmul.f32 %v1199_v18, %v1199_v18  ;;  %v1272_v57 = vsel %vm300_vm1, %v4187_v42, 0.0 }
 0x29c   : > { %v1320_v11 = vadd.f32 %v1319_v1, %v1318_v40  ;;  %v1269_v17 = vadd.f32 %v1268_v58, %v1267_v63  ;;  %v1325_v55 = vsel %vm300_vm1, %v1303_v3, 0.0 }
 0x29d   : > { %v1321_v23 = vsel %vm300_vm1, %v1301_v47, 0.0 }
 0x29e   : > { %v1271_v13 = vadd.f32 %v1270_v29, %v1269_v17  ;;  %v1322_v34 = vadd.f32 %v1321_v23, %v1320_v11 }
 0x2a0   : > { %v1324_v4 = vadd.f32 %v1323_v25, %v1322_v34  ;;  %v1273_v31 = vadd.f32 %v1272_v57, %v1271_v13 }
 0x2a2   : > { %v1326_v48 = vadd.f32 %v1325_v55, %v1324_v4 }
 0x2ce   : > { %v4200_v37 = vpop.f32.mrb[8].mxu0 }
 0x2cf   : > { %4009 = vst.msk [vmem:[%s6390_s18 + $0x90] sm:$0xff] %vm300_vm1, %v4200_v37  ;;  %v1732_v41 = vpop.f32.mrb[9].mxu0  ;;  %v1851_v32 = vmul.f32 %v4200_v37, %v4200_v37  ;;  %v1815_v49 = vsel %vm300_vm1, %v4200_v37, 0.0 }
 0x2d0   : > { %4007 = vst.msk [vmem:[%s6390_s18 + $0x80] sm:$0xff] %vm300_vm1, %v1732_v41  ;;  %v1849_v27 = vmul.f32 %v1732_v41, %v1732_v41  ;;  %v4201_v8 = vpop.f32.mrb[10].mxu0  ;;  %v1812_v53 = vsel %vm300_vm1, %v1732_v41, 0.0 }
 0x2d1   : > { %4010 = vst.msk [vmem:[%s6390_s18 + $0x98] sm:$0xff] %vm300_vm1, %v4201_v8  ;;  %v1735_v20 = vpop.f32.mrb[11].mxu0  ;;  %v4190_v60 = vpop.f32.mrb[16].mxu1  ;;  %v1852_v14 = vmul.f32 %v4201_v8, %v4201_v8  ;;  %v1868_v59 = vsel %vm300_vm1, %v1851_v32, 0.0  ;;  %v1817_v22 = vsel %vm300_vm1, %v4201_v8, 0.0 }
 0x2d2   : > { %4008 = vst.msk [vmem:[%s6390_s18 + $0x88] sm:$0xff] %vm300_vm1, %v1735_v20  ;;  %v1813_v12 = vsel %vm300_vm1, %v1735_v20, 0.0  ;;  %v1850_v21 = vmul.f32 %v1735_v20, %v1735_v20  ;;  %1253 = vst.msk [vmem:[%s6390_s18 + $0x50] sm:$0xff] %vm300_vm1, %v4190_v60  ;;  %v1212_v30 = vpop.f32.mrb[17].mxu1  ;;  %v1865_v0 = vsel %vm300_vm1, %v1849_v27, 0.0  ;;  %v1306_v43 = vmul.f32 %v4190_v60, %v4190_v60 }
 0x2d3   : > { %v1814_v19 = vadd.f32 %v1813_v12, %v1812_v53  ;;  %1251 = vst.msk [vmem:[%s6390_s18 + $0x40] sm:$0xff] %vm300_vm1, %v1212_v30  ;;  %v1274_v46 = vsel %vm300_vm1, %v1212_v30, 0.0  ;;  %v1304_v50 = vmul.f32 %v1212_v30, %v1212_v30  ;;  %v4191_v28 = vpop.f32.mrb[18].mxu1  ;;  %v1870_v15 = vsel %vm300_vm1, %v1852_v14, 0.0 }
 0x2d4   : > { %v1866_v16 = vsel %vm300_vm1, %v1850_v21, 0.0  ;;  %v1275_v35 = vadd.f32 %v1274_v46, %v1273_v31  ;;  %1254 = vst.msk [vmem:[%s6390_s18 + $0x58] sm:$0xff] %vm300_vm1, %v4191_v28  ;;  %v1215_v45 = vpop.f32.mrb[19].mxu1  ;;  %v1278_v38 = vsel %vm300_vm1, %v4190_v60, 0.0  ;;  %v1307_v44 = vmul.f32 %v4191_v28, %v4191_v28 }
 0x2d5   : > { %v1816_v2 = vadd.f32 %v1815_v49, %v1814_v19  ;;  %v1867_v33 = vadd.f32 %v1866_v16, %v1865_v0  ;;  %v1327_v52 = vsel %vm300_vm1, %v1304_v50, 0.0  ;;  %1252 = vst.msk [vmem:[%s6390_s18 + $0x48] sm:$0xff] %vm300_vm1, %v1215_v45  ;;  %v1276_v6 = vsel %vm300_vm1, %v1215_v45, 0.0 }
 0x2d6   : > { %v1328_v24 = vadd.f32 %v1327_v52, %v1326_v48  ;;  %v1277_v51 = vadd.f32 %v1276_v6, %v1275_v35  ;;  %v1305_v56 = vmul.f32 %v1215_v45, %v1215_v45  ;;  %v1280_v42 = vsel %vm300_vm1, %v4191_v28, 0.0 }
 0x2d7   : > { %v1869_v9 = vadd.f32 %v1868_v59, %v1867_v33  ;;  %v1818_v10 = vadd.f32 %v1817_v22, %v1816_v2  ;;  %v1331_v18 = vsel %vm300_vm1, %v1306_v43, 0.0  ;;  %v1333_v29 = vsel %vm300_vm1, %v1307_v44, 0.0 }
 0x2d8   : > { %v1279_v54 = vadd.f32 %v1278_v38, %v1277_v51  ;;  %v1329_v7 = vsel %vm300_vm1, %v1305_v56, 0.0 }
 0x2d9   : > { %v1871_v62 = vadd.f32 %v1870_v15, %v1869_v9  ;;  %v1330_v63 = vadd.f32 %v1329_v7, %v1328_v24 }
 0x2da   : > { %v1281_v1 = vadd.f32 %v1280_v42, %v1279_v54 }
 0x2db   : > { %v4204_v40 = vpop.f32.mrb[12].mxu0  ;;  %v1332_v58 = vadd.f32 %v1331_v18, %v1330_v63 }
 0x2dc   : > { %4013 = vst.msk [vmem:[%s6390_s18 + $0xb0] sm:$0xff] %vm300_vm1, %v4204_v40  ;;  %v1748_v39 = vpop.f32.mrb[13].mxu0  ;;  %v1855_v3 = vmul.f32 %v4204_v40, %v4204_v40  ;;  %v1823_v48 = vsel %vm300_vm1, %v4204_v40, 0.0 }
 0x2dd   : > { %4011 = vst.msk [vmem:[%s6390_s18 + $0xa0] sm:$0xff] %vm300_vm1, %v1748_v39  ;;  %v1819_v47 = vsel %vm300_vm1, %v1748_v39, 0.0  ;;  %v1853_v11 = vmul.f32 %v1748_v39, %v1748_v39  ;;  %v4205_v17 = vpop.f32.mrb[14].mxu0  ;;  %v1334_v4 = vadd.f32 %v1333_v29, %v1332_v58 }
 0x2de   : > { %v1820_v23 = vadd.f32 %v1819_v47, %v1818_v10  ;;  %4014 = vst.msk [vmem:[%s6390_s18 + $0xb8] sm:$0xff] %vm300_vm1, %v4205_v17  ;;  %v1751_v13 = vpop.f32.mrb[15].mxu0  ;;  %v1856_v37 = vmul.f32 %v4205_v17, %v4205_v17  ;;  %v1876_v32 = vsel %vm300_vm1, %v1855_v3, 0.0  ;;  %v1825_v20 = vsel %vm300_vm1, %v4205_v17, 0.0 }
 0x2df   : > { %v1872_v34 = vsel %vm300_vm1, %v1853_v11, 0.0  ;;  %4012 = vst.msk [vmem:[%s6390_s18 + $0xa8] sm:$0xff] %vm300_vm1, %v1751_v13  ;;  %v1821_v25 = vsel %vm300_vm1, %v1751_v13, 0.0  ;;  %v1854_v57 = vmul.f32 %v1751_v13, %v1751_v13 }
 0x2e0   : > { %v1873_v31 = vadd.f32 %v1872_v34, %v1871_v62  ;;  %v1822_v55 = vadd.f32 %v1821_v25, %v1820_v23  ;;  %v1878_v49 = vsel %vm300_vm1, %v1856_v37, 0.0 }
 0x2e1   : > { %v1874_v41 = vsel %vm300_vm1, %v1854_v57, 0.0 }
 0x2e2   : > { %v1824_v27 = vadd.f32 %v1823_v48, %v1822_v55  ;;  %v1875_v8 = vadd.f32 %v1874_v41, %v1873_v31 }
 0x2e3   : > { %v4208_v53 = vpop.f32.mrb[16].mxu0 }
 0x2e4   : > { %v1877_v12 = vadd.f32 %v1876_v32, %v1875_v8  ;;  %4017 = vst.msk [vmem:[%s6390_s18 + $0xd0] sm:$0xff] %vm300_vm1, %v4208_v53  ;;  %v1764_v21 = vpop.f32.mrb[17].mxu0  ;;  %v1826_v60 = vadd.f32 %v1825_v20, %v1824_v27  ;;  %v1859_v0 = vmul.f32 %v4208_v53, %v4208_v53  ;;  %v1831_v35 = vsel %vm300_vm1, %v4208_v53, 0.0 }
 0x2e5   : > { %4015 = vst.msk [vmem:[%s6390_s18 + $0xc0] sm:$0xff] %vm300_vm1, %v1764_v21  ;;  %v1827_v14 = vsel %vm300_vm1, %v1764_v21, 0.0  ;;  %v1857_v19 = vmul.f32 %v1764_v21, %v1764_v21  ;;  %v4209_v30 = vpop.f32.mrb[18].mxu0 }
 0x2e6   : > { %v1828_v16 = vadd.f32 %v1827_v14, %v1826_v60  ;;  %v1879_v46 = vadd.f32 %v1878_v49, %v1877_v12  ;;  %4018 = vst.msk [vmem:[%s6390_s18 + $0xd8] sm:$0xff] %vm300_vm1, %v4209_v30  ;;  %v1767_v50 = vpop.f32.mrb[19].mxu0  ;;  %v1860_v52 = vmul.f32 %v4209_v30, %v4209_v30  ;;  %v1884_v56 = vsel %vm300_vm1, %v1859_v0, 0.0 }
 0x2e7   : > { %v1880_v28 = vsel %vm300_vm1, %v1857_v19, 0.0  ;;  %4016 = vst.msk [vmem:[%s6390_s18 + $0xc8] sm:$0xff] %vm300_vm1, %v1767_v50  ;;  %v1829_v59 = vsel %vm300_vm1, %v1767_v50, 0.0  ;;  %v1858_v2 = vmul.f32 %v1767_v50, %v1767_v50  ;;  %v4194_v33 = vpop.f32.mrb[20].mxu1  ;;  %v1833_v54 = vsel %vm300_vm1, %v4209_v30, 0.0 }
 0x2e8   : > { %v1881_v45 = vadd.f32 %v1880_v28, %v1879_v46  ;;  %v1830_v22 = vadd.f32 %v1829_v59, %v1828_v16  ;;  %1257 = vst.msk [vmem:[%s6390_s18 + $0x70] sm:$0xff] %vm300_vm1, %v4194_v33  ;;  %v1228_v43 = vpop.f32.mrb[21].mxu1  ;;  %v1310_v7 = vmul.f32 %v4194_v33, %v4194_v33  ;;  %v1886_v47 = vsel %vm300_vm1, %v1860_v52, 0.0 }
 0x2e9   : > { %v1882_v6 = vsel %vm300_vm1, %v1858_v2, 0.0  ;;  %1255 = vst.msk [vmem:[%s6390_s18 + $0x60] sm:$0xff] %vm300_vm1, %v1228_v43  ;;  %v1282_v9 = vsel %vm300_vm1, %v1228_v43, 0.0  ;;  %v1308_v24 = vmul.f32 %v1228_v43, %v1228_v43  ;;  %v4195_v51 = vpop.f32.mrb[22].mxu1  ;;  %v1286_v11 = vsel %vm300_vm1, %v4194_v33, 0.0 }
 0x2ea   : > { %v1832_v15 = vadd.f32 %v1831_v35, %v1830_v22  ;;  %v1883_v38 = vadd.f32 %v1882_v6, %v1881_v45  ;;  %v1283_v10 = vadd.f32 %v1282_v9, %v1281_v1  ;;  %1258 = vst.msk [vmem:[%s6390_s18 + $0x78] sm:$0xff] %vm300_vm1, %v4195_v51  ;;  %v1231_v44 = vpop.f32.mrb[23].mxu1  ;;  %v1311_v17 = vmul.f32 %v4195_v51, %v4195_v51 }
 0x2eb   : > { %v1335_v62 = vsel %vm300_vm1, %v1308_v24, 0.0  ;;  %1256 = vst.msk [vmem:[%s6390_s18 + $0x68] sm:$0xff] %vm300_vm1, %v1231_v44  ;;  %v1284_v42 = vsel %vm300_vm1, %v1231_v44, 0.0  ;;  %v4212_v63 = vpop.f32.mrb[20].mxu0  ;;  %v1309_v58 = vmul.f32 %v1231_v44, %v1231_v44  ;;  %v1339_v41 = vsel %vm300_vm1, %v1310_v7, 0.0 }
 0x2ec   : > { %v1885_v40 = vadd.f32 %v1884_v56, %v1883_v38  ;;  %v1336_v18 = vadd.f32 %v1335_v62, %v1334_v4  ;;  %v1285_v39 = vadd.f32 %v1284_v42, %v1283_v10  ;;  %4021 = vst.msk [vmem:[%s6390_s18 + $0xf0] sm:$0xff] %vm300_vm1, %v4212_v63  ;;  %v1780_v1 = vpop.f32.mrb[21].mxu0  ;;  %v1834_v29 = vadd.f32 %v1833_v54, %v1832_v15 }
 0x2ed   : > { %4019 = vst.msk [vmem:[%s6390_s18 + $0xe0] sm:$0xff] %vm300_vm1, %v1780_v1  ;;  %v4213_v3 = vpop.f32.mrb[22].mxu0  ;;  %v1337_v13 = vsel %vm300_vm1, %v1309_v58, 0.0  ;;  %v1835_v34 = vsel %vm300_vm1, %v1780_v1, 0.0  ;;  %v1861_v25 = vmul.f32 %v1780_v1, %v1780_v1  ;;  %v1288_v4 = vsel %vm300_vm1, %v4195_v51, 0.0 }
 0x2ee   : > { %v1287_v23 = vadd.f32 %v1286_v11, %v1285_v39  ;;  %4022 = vst.msk [vmem:[%s6390_s18 + $0xf8] sm:$0xff] %vm300_vm1, %v4213_v3  ;;  %v1783_v57 = vpop.f32.mrb[23].mxu0  ;;  %v1338_v31 = vadd.f32 %v1337_v13, %v1336_v18  ;;  %v1836_v55 = vadd.f32 %v1835_v34, %v1834_v29  ;;  %v1887_v48 = vadd.f32 %v1886_v47, %v1885_v40 }
 0x2ef   : > { %4020 = vst.msk [vmem:[%s6390_s18 + $0xe8] sm:$0xff] %vm300_vm1, %v1783_v57  ;;  %v1863_v8 = vmul.f32 %v4212_v63, %v4212_v63  ;;  %v1888_v32 = vsel %vm300_vm1, %v1861_v25, 0.0  ;;  %v1837_v21 = vsel %vm300_vm1, %v1783_v57, 0.0  ;;  %v1862_v60 = vmul.f32 %v1783_v57, %v1783_v57 }
 0x2f0   : > { %v4218_v37 = vpop.f32.mrb[24].mxu1  ;;  %v1289_v27 = vadd.f32 %v1288_v4, %v1287_v23  ;;  %v1340_v53 = vadd.f32 %v1339_v41, %v1338_v31  ;;  %v1889_v12 = vadd.f32 %v1888_v32, %v1887_v48  ;;  %v1341_v14 = vsel %vm300_vm1, %v1311_v17, 0.0 }
 0x2f1   : > { %4036 = vst.msk [vmem:[%s6390_s18 + $0x110] sm:$0xff] %vm300_vm1, %v4218_v37  ;;  %v2285_v20 = vpop.f32.mrb[25].mxu1  ;;  %v1838_v30 = vadd.f32 %v1837_v21, %v1836_v55  ;;  %v1839_v46 = vsel %vm300_vm1, %v4212_v63, 0.0  ;;  %v1864_v50 = vmul.f32 %v4213_v3, %v4213_v3  ;;  %v1890_v28 = vsel %vm300_vm1, %v1862_v60, 0.0 }
 0x2f2   : > { %4034 = vst.msk [vmem:[%s6390_s18 + $0x100] sm:$0xff] %vm300_vm1, %v2285_v20  ;;  %v6773_v49 = vpop.f32.mrb[26].mxu1  ;;  %v1290_v19 = vrot.slane %v1289_v27, 4  ;;  %v6779_v16 = vadd.f32 %v1341_v14, %v1340_v53  ;;  %v1891_v35 = vadd.f32 %v1890_v28, %v1889_v12  ;;  %v1892_v22 = vsel %vm300_vm1, %v1863_v8, 0.0 }
 0x2f3   : > { %4037 = vst.msk [vmem:[%s6390_s18 + $0x118] sm:$0xff] %vm300_vm1, %v6773_v49  ;;  %v2288_v0 = vpop.f32.mrb[27].mxu1  ;;  %v1840_v33 = vadd.f32 %v1839_v46, %v1838_v30  ;;  %v1841_v43 = vsel %vm300_vm1, %v4213_v3, 0.0  ;;  %v2402_v51 = vmul.f32 %v2285_v20, %v2285_v20  ;;  %v1894_v15 = vsel %vm300_vm1, %v1864_v50, 0.0 }
 0x2f4   : > { %4035 = vst.msk [vmem:[%s6390_s18 + $0x108] sm:$0xff] %vm300_vm1, %v2288_v0  ;;  %v4236_v59 = vpop.f32.mrb[24].mxu0  ;;  %v1291_v2 = vadd.f32 %v1290_v19, %v1289_v27  ;;  %v1893_v24 = vadd.f32 %v1892_v22, %v1891_v35  ;;  %v2365_v38 = vsel %vm300_vm1, %v2285_v20, 0.0  ;;  %v2366_v10 = vsel %vm300_vm1, %v2288_v0, 0.0 }
 0x2f5   : > { %4063 = vst.msk [vmem:[%s6390_s18 + $0x190] sm:$0xff] %vm300_vm1, %v4236_v59  ;;  %v2805_v45 = vpop.f32.mrb[25].mxu0  ;;  %v1842_v9 = vadd.f32 %v1841_v43, %v1840_v33  ;;  %v2403_v44 = vmul.f32 %v2288_v0, %v2288_v0  ;;  %v2404_v62 = vmul.f32 %v4218_v37, %v4218_v37  ;;  %v2367_v42 = vadd.f32 %v2366_v10, %v2365_v38 }
 0x2f6   : > { %4061 = vst.msk [vmem:[%s6390_s18 + $0x180] sm:$0xff] %vm300_vm1, %v2805_v45  ;;  %v6791_v52 = vpop.f32.mrb[26].mxu0  ;;  %v1292_v6 = vrot.slane %v1291_v2, 2  ;;  %v6801_v7 = vadd.f32 %v1894_v15, %v1893_v24  ;;  %v2368_v63 = vsel %vm300_vm1, %v4218_v37, 0.0  ;;  %v2418_v1 = vsel %vm300_vm1, %v2402_v51, 0.0 }
 0x2f7   : > { %4064 = vst.msk [vmem:[%s6390_s18 + $0x198] sm:$0xff] %vm300_vm1, %v6791_v52  ;;  %v2808_v56 = vpop.f32.mrb[27].mxu0  ;;  %v1843_v54 = vrot.slane %v1842_v9, 4  ;;  %v2419_v40 = vsel %vm300_vm1, %v2403_v44, 0.0  ;;  %v2369_v47 = vadd.f32 %v2368_v63, %v2367_v42  ;;  %v3199_v17 = vrot.slane %v6630_v5, 4 }
 0x2f8   : > { %4062 = vst.msk [vmem:[%s6390_s18 + $0x188] sm:$0xff] %vm300_vm1, %v2808_v56  ;;  %v1293_v39 = vadd.f32 %v1292_v6, %v1291_v2  ;;  %v2420_v29 = vadd.f32 %v2419_v40, %v2418_v1  ;;  %v3252_v23 = vrot.slane %v6633_v61, 4  ;;  %v2421_v34 = vsel %vm300_vm1, %v2404_v62, 0.0 }
 0x2f9   : > { %v6805_v18 = vpop.f32.mrb[28].mxu1  ;;  %v1844_v58 = vadd.f32 %v1843_v54, %v1842_v9  ;;  %v2922_v25 = vmul.f32 %v2805_v45, %v2805_v45  ;;  %v1343_v4 = vrot.slane %v6779_v16, 4  ;;  %v2405_v31 = vmul.f32 %v6773_v49, %v6773_v49 }
 0x2fa   : > { %4040 = vst.msk [vmem:[%s6390_s18 + $0x130] sm:$0xff] %vm300_vm1, %v6805_v18  ;;  %v2301_v11 = vpop.f32.mrb[29].mxu1  ;;  %v2422_v55 = vadd.f32 %v2421_v34, %v2420_v29  ;;  %v1294_v48 = vrot.slane %v1293_v39, 1  ;;  %v2885_v41 = vsel %vm300_vm1, %v2805_v45, 0.0  ;;  %v2886_v27 = vsel %vm300_vm1, %v2808_v56, 0.0 }
 0x2fb   : > { %4038 = vst.msk [vmem:[%s6390_s18 + $0x120] sm:$0xff] %vm300_vm1, %v2301_v11  ;;  %v6814_v3 = vpop.f32.mrb[30].mxu1  ;;  %v1845_v13 = vrot.slane %v1844_v58, 2  ;;  %v2370_v32 = vsel %vm300_vm1, %v6773_v49, 0.0  ;;  %v2924_v20 = vmul.f32 %v4236_v59, %v4236_v59  ;;  %v2887_v53 = vadd.f32 %v2886_v27, %v2885_v41 }
 0x2fc   : > { %4041 = vst.msk [vmem:[%s6390_s18 + $0x138] sm:$0xff] %vm300_vm1, %v6814_v3  ;;  %v2304_v57 = vpop.f32.mrb[31].mxu1  ;;  %v2923_v12 = vmul.f32 %v2808_v56, %v2808_v56  ;;  %v2888_v14 = vsel %vm300_vm1, %v4236_v59, 0.0  ;;  %v2938_v19 = vsel %vm300_vm1, %v2922_v25, 0.0  ;;  %v2925_v30 = vmul.f32 %v6791_v52, %v6791_v52 }
 0x2fd   : > { %4039 = vst.msk [vmem:[%s6390_s18 + $0x128] sm:$0xff] %vm300_vm1, %v2304_v57  ;;  %v1846_v37 = vadd.f32 %v1845_v13, %v1844_v58  ;;  %v6828_v8 = vpop.f32.mrb[28].mxu0  ;;  %v2889_v0 = vadd.f32 %v2888_v14, %v2887_v53  ;;  %v2371_v50 = vadd.f32 %v2370_v32, %v2369_v47  ;;  %v2372_v28 = vsel %vm300_vm1, %v2301_v11, 0.0 }
 0x2fe   : > { %4067 = vst.msk [vmem:[%s6390_s18 + $0x1b0] sm:$0xff] %vm300_vm1, %v6828_v8  ;;  %v2821_v21 = vpop.f32.mrb[29].mxu0  ;;  %v2939_v46 = vsel %vm300_vm1, %v2923_v12, 0.0  ;;  %v1295_v2 = vadd.f32 %v1294_v48, %v1293_v39  ;;  %v2423_v35 = vsel %vm300_vm1, %v2405_v31, 0.0  ;;  %v2941_v43 = vsel %vm300_vm1, %v2924_v20, 0.0 }
 0x2ff   : > { %v1847_v60 = vrot.slane %v1846_v37, 1  ;;  %4065 = vst.msk [vmem:[%s6390_s18 + $0x1a0] sm:$0xff] %vm300_vm1, %v2821_v21  ;;  %v6841_v49 = vpop.f32.mrb[30].mxu0  ;;  %v2940_v45 = vadd.f32 %v2939_v46, %v2938_v19  ;;  %v2373_v6 = vadd.f32 %v2372_v28, %v2371_v50  ;;  %v2406_v9 = vmul.f32 %v2301_v11, %v2301_v11 }
 0x300   : > { %4068 = vst.msk [vmem:[%s6390_s18 + $0x1b8] sm:$0xff] %vm300_vm1, %v6841_v49  ;;  %v2824_v59 = vpop.f32.mrb[31].mxu0  ;;  %v2424_v24 = vadd.f32 %v2423_v35, %v2422_v55  ;;  %v2890_v15 = vsel %vm300_vm1, %v6791_v52, 0.0  ;;  %v2408_v10 = vmul.f32 %v6805_v18, %v6805_v18  ;;  %v2943_v54 = vsel %vm300_vm1, %v2925_v30, 0.0 }
 0x301   : > { %v1848_v33 = vadd.f32 %v1847_v60, %v1846_v37  ;;  %4066 = vst.msk [vmem:[%s6390_s18 + $0x1a8] sm:$0xff] %vm300_vm1, %v2824_v59  ;;  %v2942_v38 = vadd.f32 %v2941_v43, %v2940_v45  ;;  %v2425_v62 = vsel %vm300_vm1, %v2406_v9, 0.0  ;;  %v2374_v42 = vsel %vm300_vm1, %v2304_v57, 0.0 }
 0x302   : > { %v2407_v63 = vmul.f32 %v2304_v57, %v2304_v57  ;;  %v2376_v40 = vsel %vm300_vm1, %v6805_v18, 0.0  ;;  %v2426_v39 = vadd.f32 %v2425_v62, %v2424_v24  ;;  %v2409_v58 = vmul.f32 %v6814_v3, %v6814_v3 }
 0x303   : > { %v6858_v56 = vsel %vm3438_vm10, %v1295_v2, %v1848_v33  ;;  %v2375_v1 = vadd.f32 %v2374_v42, %v2373_v6  ;;  %v2891_v29 = vadd.f32 %v2890_v15, %v2889_v0  ;;  %v2892_v13 = vsel %vm300_vm1, %v2821_v21, 0.0 }
 0x304   : > { %v6851_v22 = vpop.f32.mrb[32].mxu1  ;;  %v2427_v11 = vsel %vm300_vm1, %v2407_v63, 0.0  ;;  %v2926_v34 = vmul.f32 %v2821_v21, %v2821_v21  ;;  %v2429_v25 = vsel %vm300_vm1, %v2408_v10, 0.0  ;;  %v2944_v55 = vadd.f32 %v2943_v54, %v2942_v38 }
 0x305   : > { %4044 = vst.msk [vmem:[%s6390_s18 + $0x150] sm:$0xff] %vm300_vm1, %v6851_v22  ;;  %v2317_v51 = vpop.f32.mrb[33].mxu1  ;;  %v2377_v57 = vadd.f32 %v2376_v40, %v2375_v1  ;;  %v2428_v31 = vadd.f32 %v2427_v11, %v2426_v39  ;;  %v2378_v37 = vsel %vm300_vm1, %v6814_v3, 0.0  ;;  %v2928_v41 = vmul.f32 %v6828_v8, %v6828_v8 }
 0x306   : > { %4042 = vst.msk [vmem:[%s6390_s18 + $0x140] sm:$0xff] %vm300_vm1, %v2317_v51  ;;  %v6866_v44 = vpop.f32.mrb[34].mxu1  ;;  %v2893_v27 = vadd.f32 %v2892_v13, %v2891_v29  ;;  %v2945_v32 = vsel %vm300_vm1, %v2926_v34, 0.0  ;;  %v2894_v21 = vsel %vm300_vm1, %v2824_v59, 0.0  ;;  %v2927_v60 = vmul.f32 %v2824_v59, %v2824_v59 }
 0x307   : > { %4045 = vst.msk [vmem:[%s6390_s18 + $0x158] sm:$0xff] %vm300_vm1, %v6866_v44  ;;  %v2320_v52 = vpop.f32.mrb[35].mxu1  ;;  %v2430_v53 = vadd.f32 %v2429_v25, %v2428_v31  ;;  %v2946_v12 = vadd.f32 %v2945_v32, %v2944_v55  ;;  %v2431_v14 = vsel %vm300_vm1, %v2409_v58, 0.0  ;;  %v2896_v19 = vsel %vm300_vm1, %v6828_v8, 0.0 }
 0x308   : > { %4043 = vst.msk [vmem:[%s6390_s18 + $0x148] sm:$0xff] %vm300_vm1, %v2320_v52  ;;  %v6880_v47 = vpop.f32.mrb[32].mxu0  ;;  %v2929_v30 = vmul.f32 %v6841_v49, %v6841_v49  ;;  %v2895_v0 = vadd.f32 %v2894_v21, %v2893_v27  ;;  %v2947_v50 = vsel %vm300_vm1, %v2927_v60, 0.0  ;;  %v2379_v28 = vadd.f32 %v2378_v37, %v2377_v57 }
 0x309   : > { %4071 = vst.msk [vmem:[%s6390_s18 + $0x1d0] sm:$0xff] %vm300_vm1, %v6880_v47  ;;  %v2837_v18 = vpop.f32.mrb[33].mxu0  ;;  %v2380_v59 = vsel %vm300_vm1, %v2317_v51, 0.0  ;;  %v2410_v2 = vmul.f32 %v2317_v51, %v2317_v51  ;;  %v2949_v8 = vsel %vm300_vm1, %v2928_v41, 0.0  ;;  %v2948_v45 = vadd.f32 %v2947_v50, %v2946_v12 }
 0x30a   : > { %4069 = vst.msk [vmem:[%s6390_s18 + $0x1c0] sm:$0xff] %vm300_vm1, %v2837_v18  ;;  %v6890_v48 = vpop.f32.mrb[34].mxu0  ;;  %v2897_v35 = vadd.f32 %v2896_v19, %v2895_v0  ;;  %v2432_v43 = vadd.f32 %v2431_v14, %v2430_v53  ;;  %v2898_v9 = vsel %vm300_vm1, %v6841_v49, 0.0  ;;  %v2412_v24 = vmul.f32 %v6851_v22, %v6851_v22 }
 0x30b   : > { %4072 = vst.msk [vmem:[%s6390_s18 + $0x1d8] sm:$0xff] %vm300_vm1, %v6890_v48  ;;  %v2840_v20 = vpop.f32.mrb[35].mxu0  ;;  %v2381_v51 = vadd.f32 %v2380_v59, %v2379_v28  ;;  %v2433_v15 = vsel %vm300_vm1, %v2410_v2, 0.0  ;;  %v2950_v10 = vadd.f32 %v2949_v8, %v2948_v45  ;;  %v2382_v62 = vsel %vm300_vm1, %v2320_v52, 0.0 }
 0x30c   : > { %4070 = vst.msk [vmem:[%s6390_s18 + $0x1c8] sm:$0xff] %vm300_vm1, %v2840_v20  ;;  %v2434_v54 = vadd.f32 %v2433_v15, %v2432_v43  ;;  %v2411_v42 = vmul.f32 %v2320_v52, %v2320_v52  ;;  %v2951_v63 = vsel %vm300_vm1, %v2929_v30, 0.0  ;;  %v2384_v40 = vsel %vm300_vm1, %v6851_v22, 0.0 }
 0x30d   : > { %v6903_v3 = vpop.f32.mrb[36].mxu1  ;;  %v2413_v39 = vmul.f32 %v6866_v44, %v6866_v44  ;;  %v2383_v58 = vadd.f32 %v2382_v62, %v2381_v51  ;;  %v2899_v11 = vadd.f32 %v2898_v9, %v2897_v35  ;;  %v2900_v29 = vsel %vm300_vm1, %v2837_v18, 0.0 }
 0x30e   : > { %4048 = vst.msk [vmem:[%s6390_s18 + $0x170] sm:$0xff] %vm300_vm1, %v6903_v3  ;;  %v2333_v46 = vpop.f32.mrb[37].mxu1  ;;  %v2435_v52 = vsel %vm300_vm1, %v2411_v42, 0.0  ;;  %v2930_v13 = vmul.f32 %v2837_v18, %v2837_v18  ;;  %v2437_v22 = vsel %vm300_vm1, %v2412_v24, 0.0  ;;  %v2952_v31 = vadd.f32 %v2951_v63, %v2950_v10 }
 0x30f   : > { %4046 = vst.msk [vmem:[%s6390_s18 + $0x160] sm:$0xff] %vm300_vm1, %v2333_v46  ;;  %v6917_v33 = vpop.f32.mrb[38].mxu1  ;;  %v2385_v25 = vadd.f32 %v2384_v40, %v2383_v58  ;;  %v2436_v57 = vadd.f32 %v2435_v52, %v2434_v54  ;;  %v2386_v55 = vsel %vm300_vm1, %v6866_v44, 0.0  ;;  %v2932_v37 = vmul.f32 %v6880_v47, %v6880_v47 }
 0x310   : > { %4049 = vst.msk [vmem:[%s6390_s18 + $0x178] sm:$0xff] %vm300_vm1, %v6917_v33  ;;  %v2336_v6 = vpop.f32.mrb[39].mxu1  ;;  %v2901_v41 = vadd.f32 %v2900_v29, %v2899_v11  ;;  %v2953_v18 = vsel %vm300_vm1, %v2930_v13, 0.0  ;;  %v2902_v53 = vsel %vm300_vm1, %v2840_v20, 0.0  ;;  %v2931_v12 = vmul.f32 %v2840_v20, %v2840_v20 }
 0x311   : > { %4047 = vst.msk [vmem:[%s6390_s18 + $0x168] sm:$0xff] %vm300_vm1, %v2336_v6  ;;  %v6930_v38 = vpop.f32.mrb[36].mxu0  ;;  %v2438_v27 = vadd.f32 %v2437_v22, %v2436_v57  ;;  %v2954_v32 = vadd.f32 %v2953_v18, %v2952_v31  ;;  %v2439_v21 = vsel %vm300_vm1, %v2413_v39, 0.0  ;;  %v2904_v60 = vsel %vm300_vm1, %v6880_v47, 0.0 }
 0x312   : > { %4075 = vst.msk [vmem:[%s6390_s18 + $0x1f0] sm:$0xff] %vm300_vm1, %v6930_v38  ;;  %v2853_v49 = vpop.f32.mrb[37].mxu0  ;;  %v2933_v14 = vmul.f32 %v6890_v48, %v6890_v48  ;;  %v2903_v44 = vadd.f32 %v2902_v53, %v2901_v41  ;;  %v2955_v19 = vsel %vm300_vm1, %v2931_v12, 0.0  ;;  %v2387_v30 = vadd.f32 %v2386_v55, %v2385_v25 }
 0x313   : > { %4073 = vst.msk [vmem:[%s6390_s18 + $0x1e0] sm:$0xff] %vm300_vm1, %v2853_v49  ;;  %v6943_v1 = vpop.f32.mrb[38].mxu0  ;;  %v2388_v0 = vsel %vm300_vm1, %v2333_v46, 0.0  ;;  %v2414_v50 = vmul.f32 %v2333_v46, %v2333_v46  ;;  %v2957_v28 = vsel %vm300_vm1, %v2932_v37, 0.0  ;;  %v2956_v2 = vadd.f32 %v2955_v19, %v2954_v32 }
 0x314   : > { %4076 = vst.msk [vmem:[%s6390_s18 + $0x1f8] sm:$0xff] %vm300_vm1, %v6943_v1  ;;  %v2856_v34 = vpop.f32.mrb[39].mxu0  ;;  %v2905_v59 = vadd.f32 %v2904_v60, %v2903_v44  ;;  %v2440_v20 = vadd.f32 %v2439_v21, %v2438_v27  ;;  %v2906_v8 = vsel %vm300_vm1, %v6890_v48, 0.0  ;;  %v2416_v47 = vmul.f32 %v6903_v3, %v6903_v3 }
 0x315   : > { %4074 = vst.msk [vmem:[%s6390_s18 + $0x1e8] sm:$0xff] %vm300_vm1, %v2856_v34  ;;  %v2389_v35 = vadd.f32 %v2388_v0, %v2387_v30  ;;  %v2441_v45 = vsel %vm300_vm1, %v2414_v50, 0.0  ;;  %v2958_v43 = vadd.f32 %v2957_v28, %v2956_v2  ;;  %v2390_v24 = vsel %vm300_vm1, %v2336_v6, 0.0 }
 0x316   : > { %v2442_v9 = vadd.f32 %v2441_v45, %v2440_v20  ;;  %v2415_v51 = vmul.f32 %v2336_v6, %v2336_v6  ;;  %v2959_v46 = vsel %vm300_vm1, %v2933_v14, 0.0  ;;  %v2392_v15 = vsel %vm300_vm1, %v6903_v3, 0.0 }
 0x317   : > { %v2417_v10 = vmul.f32 %v6917_v33, %v6917_v33  ;;  %v2391_v48 = vadd.f32 %v2390_v24, %v2389_v35  ;;  %v2907_v62 = vadd.f32 %v2906_v8, %v2905_v59  ;;  %v2908_v42 = vsel %vm300_vm1, %v2853_v49, 0.0 }
 0x318   : > { %v2443_v54 = vsel %vm300_vm1, %v2415_v51, 0.0  ;;  %v2934_v63 = vmul.f32 %v2853_v49, %v2853_v49  ;;  %v1896_v40 = vrot.slane %v6801_v7, 4  ;;  %v2960_v6 = vadd.f32 %v2959_v46, %v2958_v43 }
 0x319   : > { %v2393_v39 = vadd.f32 %v2392_v15, %v2391_v48  ;;  %v2444_v58 = vadd.f32 %v2443_v54, %v2442_v9  ;;  %v2445_v52 = vsel %vm300_vm1, %v2416_v47, 0.0  ;;  %v2394_v3 = vsel %vm300_vm1, %v6917_v33, 0.0 }
 0x31a   : > { %v2909_v11 = vadd.f32 %v2908_v42, %v2907_v62  ;;  %v2961_v29 = vsel %vm300_vm1, %v2934_v63, 0.0  ;;  %v2910_v57 = vsel %vm300_vm1, %v2856_v34, 0.0  ;;  %v2447_v49 = vsel %vm300_vm1, %v2417_v10, 0.0 }
 0x31b   : > { %v2395_v13 = vadd.f32 %v2394_v3, %v2393_v39  ;;  %v2446_v22 = vadd.f32 %v2445_v52, %v2444_v58  ;;  %v2962_v25 = vadd.f32 %v2961_v29, %v2960_v6  ;;  %v2936_v31 = vmul.f32 %v6930_v38, %v6930_v38 }
 0x31c   : > { %v2911_v55 = vadd.f32 %v2910_v57, %v2909_v11  ;;  %v2935_v37 = vmul.f32 %v2856_v34, %v2856_v34  ;;  %v3200_v41 = vadd.f32 %v3199_v17, %v6630_v5  ;;  %v2912_v27 = vsel %vm300_vm1, %v6930_v38, 0.0 }
 0x31d   : > { %v2396_v33 = vrot.slane %v2395_v13, 4  ;;  %v2448_v18 = vadd.f32 %v2447_v49, %v2446_v22  ;;  %v1344_v32 = vadd.f32 %v1343_v4, %v6779_v16  ;;  %v2937_v53 = vmul.f32 %v6943_v1, %v6943_v1 }
 0x31e   : > { %v2913_v12 = vadd.f32 %v2912_v27, %v2911_v55  ;;  %v2963_v21 = vsel %vm300_vm1, %v2935_v37, 0.0  ;;  %v2914_v5 = vsel %vm300_vm1, %v6943_v1, 0.0  ;;  %v3253_v38 = vadd.f32 %v3252_v23, %v6633_v61  ;;  %v3690_v27 = vld [vmem:[%s6390_s18 + $0x8] sm:$0xff] (%p4708_p4) }
 0x31f   : > { %v2397_v34 = vadd.f32 %v2396_v33, %v2395_v13  ;;  %v2449_v60 = vrot.slane %v2448_v18, 4  ;;  %v2964_v17 = vadd.f32 %v2963_v21, %v2962_v25  ;;  %v1897_v14 = vadd.f32 %v1896_v40, %v6801_v7  ;;  %3691 = vst [vmem:[%s7032_s17 + $0x8] sm:$0xff] (%p4708_p4), %v3690_v27  ;;  %v3700_v21 = vld [vmem:[%s6390_s18 + $0x30] sm:$0xff] (%p4708_p4)  ;;  %v3818_v27 = vld [vmem:[%s6390_s18 + $0x208] sm:$0xff] (%p4708_p4) }
 0x320   : > { %v2965_v16 = vsel %vm300_vm1, %v2936_v31, 0.0  ;;  %v2915_v4 = vadd.f32 %v2914_v5, %v2913_v12  ;;  %v3201_v44 = vrot.slane %v3200_v41, 2  ;;  %v2967_v50 = vsel %vm300_vm1, %v2937_v53, 0.0  ;;  %v3696_v53 = vld [vmem:[%s6390_s18 + $0x20] sm:$0xff] (%p4708_p4)  ;;  %v3698_v12 = vld [vmem:[%s6390_s18 + $0x28] sm:$0xff] (%p4708_p4)  ;;  %3701 = vst [vmem:[%s7032_s17 + $0x30] sm:$0xff] (%p4708_p4), %v3700_v21 }
 0x321   : > { %v2398_v19 = vrot.slane %v2397_v34, 2  ;;  %v2450_v30 = vadd.f32 %v2449_v60, %v2448_v18  ;;  %v2966_v0 = vadd.f32 %v2965_v16, %v2964_v17  ;;  %v1345_v59 = vrot.slane %v1344_v32, 2  ;;  %3697 = vst [vmem:[%s7032_s17 + $0x20] sm:$0xff] (%p4708_p4), %v3696_v53  ;;  %3699 = vst [vmem:[%s7032_s17 + $0x28] sm:$0xff] (%p4708_p4), %v3698_v12  ;;  %v3704_v60 = vld [vmem:[%s6390_s18 + $0x40] sm:$0xff] (%p4708_p4)  ;;  %v3706_v5 = vld [vmem:[%s6390_s18 + $0x48] sm:$0xff] (%p4708_p4) }
 0x322   : > { %v2916_v28 = vrot.slane %v2915_v4, 4  ;;  %v3254_v8 = vrot.slane %v3253_v38, 2  ;;  %v1898_v47 = vrot.slane %v1897_v14, 2  ;;  %v3202_v7 = vadd.f32 %v3201_v44, %v3200_v41  ;;  %3705 = vst [vmem:[%s7032_s17 + $0x40] sm:$0xff] (%p4708_p4), %v3704_v60  ;;  %v3708_v17 = vld [vmem:[%s6390_s18 + $0x50] sm:$0xff] (%p4708_p4)  ;;  %3707 = vst [vmem:[%s7032_s17 + $0x48] sm:$0xff] (%p4708_p4), %v3706_v5 }
 0x323   : > { %v2399_v1 = vadd.f32 %v2398_v19, %v2397_v34  ;;  %v2451_v2 = vrot.slane %v2450_v30, 2  ;;  %v2968_v20 = vadd.f32 %v2967_v50, %v2966_v0  ;;  %v1346_v43 = vadd.f32 %v1345_v59, %v1344_v32  ;;  %v3694_v32 = vld [vmem:[%s6390_s18 + $0x18] sm:$0xff] (%p4708_p4)  ;;  %3709 = vst [vmem:[%s7032_s17 + $0x50] sm:$0xff] (%p4708_p4), %v3708_v17  ;;  %v3714_v16 = vld [vmem:[%s6390_s18 + $0x68] sm:$0xff] (%p4708_p4)  ;;  %v3720_v19 = vld [vmem:[%s6390_s18 + $0x80] sm:$0xff] (%p4708_p4) }
 0x324   : > { %v2917_v61 = vadd.f32 %v2916_v28, %v2915_v4  ;;  %v3255_v46 = vadd.f32 %v3254_v8, %v3253_v38  ;;  %v1899_v15 = vadd.f32 %v1898_v47, %v1897_v14  ;;  %v3203_v48 = vrot.slane %v3202_v7, 1  ;;  %3695 = vst [vmem:[%s7032_s17 + $0x18] sm:$0xff] (%p4708_p4), %v3694_v32  ;;  %v3702_v34 = vld [vmem:[%s6390_s18 + $0x38] sm:$0xff] (%p4708_p4)  ;;  %v3712_v14 = vld [vmem:[%s6390_s18 + $0x60] sm:$0xff] (%p4708_p4)  ;;  %v3716_v4 = vld [vmem:[%s6390_s18 + $0x70] sm:$0xff] (%p4708_p4) }
 0x325   : > { %v2400_v23 = vrot.slane %v2399_v1, 1  ;;  %v2969_v35 = vrot.slane %v2968_v20, 4  ;;  %v2452_v24 = vadd.f32 %v2451_v2, %v2450_v30  ;;  %v1347_v63 = vrot.slane %v1346_v43, 1  ;;  %3703 = vst [vmem:[%s7032_s17 + $0x38] sm:$0xff] (%p4708_p4), %v3702_v34  ;;  %v3710_v38 = vld [vmem:[%s6390_s18 + $0x58] sm:$0xff] (%p4708_p4)  ;;  %3713 = vst [vmem:[%s7032_s17 + $0x60] sm:$0xff] (%p4708_p4), %v3712_v14 }
 0x326   : > { %v2918_v45 = vrot.slane %v2917_v61, 2  ;;  %v3256_v58 = vrot.slane %v3255_v46, 1  ;;  %v1900_v6 = vrot.slane %v1899_v15, 1  ;;  %v3204_v3 = vadd.f32 %v3203_v48, %v3202_v7  ;;  %3711 = vst [vmem:[%s7032_s17 + $0x58] sm:$0xff] (%p4708_p4), %v3710_v38  ;;  %3715 = vst [vmem:[%s7032_s17 + $0x68] sm:$0xff] (%p4708_p4), %v3714_v16  ;;  %v3718_v44 = vld [vmem:[%s6390_s18 + $0x78] sm:$0xff] (%p4708_p4) }
 0x327   : > { %v2401_v9 = vadd.f32 %v2400_v23, %v2399_v1  ;;  %v2970_v51 = vadd.f32 %v2969_v35, %v2968_v20  ;;  %v2453_v40 = vrot.slane %v2452_v24, 1  ;;  %v1348_v13 = vadd.f32 %v1347_v63, %v1346_v43  ;;  %3717 = vst [vmem:[%s7032_s17 + $0x70] sm:$0xff] (%p4708_p4), %v3716_v4  ;;  %v3722_v30 = vld [vmem:[%s6390_s18 + $0x88] sm:$0xff] (%p4708_p4)  ;;  %3719 = vst [vmem:[%s7032_s17 + $0x78] sm:$0xff] (%p4708_p4), %v3718_v44  ;;  %v3724_v0 = vld [vmem:[%s6390_s18 + $0x90] sm:$0xff] (%p4708_p4) }
 0x328   : > { %v2919_v10 = vadd.f32 %v2918_v45, %v2917_v61  ;;  %v3257_v57 = vadd.f32 %v3256_v58, %v3255_v46  ;;  %v1901_v49 = vadd.f32 %v1900_v6, %v1899_v15  ;;  %3721 = vst [vmem:[%s7032_s17 + $0x200] sm:$0xff] (%p4708_p4), %v3720_v19  ;;  %3723 = vst [vmem:[%s7032_s17 + $0x208] sm:$0xff] (%p4708_p4), %v3722_v30  ;;  %v3726_v50 = vld [vmem:[%s6390_s18 + $0x98] sm:$0xff] (%p4708_p4)  ;;  %v3728_v28 = vld [vmem:[%s6390_s18 + $0xa0] sm:$0xff] (%p4708_p4) }
 0x329   : > { %v3440_v54 = vsel %vm7655_vm4, %v6858_v56, %v2401_v9  ;;  %v2971_v62 = vrot.slane %v2970_v51, 2  ;;  %v2454_v56 = vadd.f32 %v2453_v40, %v2452_v24  ;;  %3725 = vst [vmem:[%s7032_s17 + $0x210] sm:$0xff] (%p4708_p4), %v3724_v0  ;;  %3727 = vst [vmem:[%s7032_s17 + $0x218] sm:$0xff] (%p4708_p4), %v3726_v50  ;;  %v3730_v59 = vld [vmem:[%s6390_s18 + $0xa8] sm:$0xff] (%p4708_p4)  ;;  %v3732_v1 = vld [vmem:[%s6390_s18 + $0xb0] sm:$0xff] (%p4708_p4) }
 0x32a   : > { %v2920_v42 = vrot.slane %v2919_v10, 1  ;;  %3729 = vst [vmem:[%s7032_s17 + $0x220] sm:$0xff] (%p4708_p4), %v3728_v28  ;;  %v3734_v2 = vld [vmem:[%s6390_s18 + $0xb8] sm:$0xff] (%p4708_p4)  ;;  %3731 = vst [vmem:[%s7032_s17 + $0x228] sm:$0xff] (%p4708_p4), %v3730_v59  ;;  %v3736_v20 = vld [vmem:[%s6390_s18 + $0xc0] sm:$0xff] (%p4708_p4) }
 0x32b   : > { %v2972_v39 = vadd.f32 %v2971_v62, %v2970_v51  ;;  %3733 = vst [vmem:[%s7032_s17 + $0x230] sm:$0xff] (%p4708_p4), %v3732_v1  ;;  %3735 = vst [vmem:[%s7032_s17 + $0x238] sm:$0xff] (%p4708_p4), %v3734_v2  ;;  %v3738_v8 = vld [vmem:[%s6390_s18 + $0xc8] sm:$0xff] (%p4708_p4)  ;;  %v3740_v47 = vld [vmem:[%s6390_s18 + $0xd0] sm:$0xff] (%p4708_p4) }
 0x32c   : > { %v2921_v52 = vadd.f32 %v2920_v42, %v2919_v10  ;;  %3737 = vst [vmem:[%s7032_s17 + $0x240] sm:$0xff] (%p4708_p4), %v3736_v20  ;;  %3739 = vst [vmem:[%s7032_s17 + $0x248] sm:$0xff] (%p4708_p4), %v3738_v8  ;;  %v3742_v61 = vld [vmem:[%s6390_s18 + $0xd8] sm:$0xff] (%p4708_p4)  ;;  %v3744_v7 = vld [vmem:[%s6390_s18 + $0xe0] sm:$0xff] (%p4708_p4) }
 0x32d   : > { %v2973_v11 = vrot.slane %v2972_v39, 1  ;;  %3741 = vst [vmem:[%s7032_s17 + $0x250] sm:$0xff] (%p4708_p4), %v3740_v47  ;;  %v3746_v23 = vld [vmem:[%s6390_s18 + $0xe8] sm:$0xff] (%p4708_p4)  ;;  %3743 = vst [vmem:[%s7032_s17 + $0x258] sm:$0xff] (%p4708_p4), %v3742_v61  ;;  %v3748_v35 = vld [vmem:[%s6390_s18 + $0xf0] sm:$0xff] (%p4708_p4) }
 0x32e   : > { %v3442_v29 = vsel %vm3441_vm6, %v3440_v54, %v2921_v52  ;;  %3467 = sbr.rel (!%p4708_p4) target bundleno = 850 (0x352), region = 40  ;;  %3745 = vst [vmem:[%s7032_s17 + $0x260] sm:$0xff] (%p4708_p4), %v3744_v7  ;;  %3747 = vst [vmem:[%s7032_s17 + $0x268] sm:$0xff] (%p4708_p4), %v3746_v23  ;;  %v3750_v45 = vld [vmem:[%s6390_s18 + $0xf8] sm:$0xff] (%p4708_p4)  ;;  %v3752_v43 = vld [vmem:[%s6390_s18 + $0x100] sm:$0xff] (%p4708_p4) }
 0x32f   : > { %v2974_v22 = vadd.f32 %v2973_v11, %v2972_v39  ;;  %v3444_v25 = vsel %vm3443_vm9, %v3442_v29, %v3204_v3  ;;  %3749 = vst [vmem:[%s7032_s17 + $0x270] sm:$0xff] (%p4708_p4), %v3748_v35  ;;  %3751 = vst [vmem:[%s7032_s17 + $0x278] sm:$0xff] (%p4708_p4), %v3750_v45  ;;  %v3754_v9 = vld [vmem:[%s6390_s18 + $0x108] sm:$0xff] (%p4708_p4)  ;;  %v3756_v24 = vld [vmem:[%s6390_s18 + $0x110] sm:$0xff] (%p4708_p4) }
 0x330   : > { %v3446_v31 = vsel %vm3445_vm8, %v3444_v25, %v6479_v36  ;;  %v3688_v36 = vld [vmem:[%s6390_s18] sm:$0xff] (%p4708_p4)  ;;  %3753 = vst [vmem:[%s7032_s17 + $0x400] sm:$0xff] (%p4708_p4), %v3752_v43  ;;  %v3758_v51 = vld [vmem:[%s6390_s18 + $0x118] sm:$0xff] (%p4708_p4)  ;;  %3755 = vst [vmem:[%s7032_s17 + $0x408] sm:$0xff] (%p4708_p4), %v3754_v9 }
 0x331   : > { %v3447_v55 = vsel %vm1142_vm7, %v3446_v31, %v1348_v13  ;;  %v3450_v37 = vsel %vm3438_vm10, %v2454_v56, %v2974_v22  ;;  %3689 = vst [vmem:[%s7032_s17] sm:$0xff] (%p4708_p4), %v3688_v36  ;;  %3757 = vst [vmem:[%s7032_s17 + $0x410] sm:$0xff] (%p4708_p4), %v3756_v24  ;;  %v3760_v46 = vld [vmem:[%s6390_s18 + $0x120] sm:$0xff] (%p4708_p4)  ;;  %v3762_v15 = vld [vmem:[%s6390_s18 + $0x128] sm:$0xff] (%p4708_p4) }
 0x332   : > { %v3449_v41 = vsel %vm3448_vm11, %v3447_v55, %v1901_v49  ;;  %v3451_v33 = vsel %vm7656_vm5, %v3450_v37, %v3257_v57  ;;  %3759 = vst [vmem:[%s7032_s17 + $0x418] sm:$0xff] (%p4708_p4), %v3758_v51  ;;  %v3764_v10 = vld [vmem:[%s6390_s18 + $0x130] sm:$0xff] (%p4708_p4)  ;;  %3761 = vst [vmem:[%s7032_s17 + $0x420] sm:$0xff] (%p4708_p4), %v3760_v46  ;;  %v3766_v48 = vld [vmem:[%s6390_s18 + $0x138] sm:$0xff] (%p4708_p4) }
 0x333   : > { %v3452_v18 = vsel %vm3441_vm6, %v3451_v33, %v6528_v26  ;;  %3453 = vst.msk [vmem:[%s234_s13] sm:$0xff] %vm300_vm1, %v3449_v41  ;;  %v3692_v26 = vld [vmem:[%s6390_s18 + $0x10] sm:$0xff] (%p4708_p4)  ;;  %3763 = vst [vmem:[%s7032_s17 + $0x428] sm:$0xff] (%p4708_p4), %v3762_v15  ;;  %v3768_v54 = vld [vmem:[%s6390_s18 + $0x140] sm:$0xff] (%p4708_p4) }
 0x334   : > { %3455 = vst.msk [vmem:[%s234_s13 + $0x8] sm:$0xf] %vm3454_vm12, %v3452_v18  ;;  %3693 = vst [vmem:[%s7032_s17 + $0x10] sm:$0xff] (%p4708_p4), %v3692_v26  ;;  %v3770_v62 = vld [vmem:[%s6390_s18 + $0x148] sm:$0xff] (%p4708_p4)  ;;  %v3772_v42 = vld [vmem:[%s6390_s18 + $0x150] sm:$0xff] (%p4708_p4) }
 0x335   : > { %3765 = vst [vmem:[%s7032_s17 + $0x430] sm:$0xff] %v3764_v10  ;;  %3767 = vst [vmem:[%s7032_s17 + $0x438] sm:$0xff] %v3766_v48  ;;  %v3774_v63 = vld [vmem:[%s6390_s18 + $0x158] sm:$0xff]  ;;  %v3776_v40 = vld [vmem:[%s6390_s18 + $0x160] sm:$0xff] }
 0x336   : > { %3769 = vst [vmem:[%s7032_s17 + $0x440] sm:$0xff] %v3768_v54  ;;  %3771 = vst [vmem:[%s7032_s17 + $0x448] sm:$0xff] %v3770_v62  ;;  %v3778_v39 = vld [vmem:[%s6390_s18 + $0x168] sm:$0xff]  ;;  %v3780_v58 = vld [vmem:[%s6390_s18 + $0x170] sm:$0xff] }
 0x337   : > { %3773 = vst [vmem:[%s7032_s17 + $0x450] sm:$0xff] %v3772_v42  ;;  %3775 = vst [vmem:[%s7032_s17 + $0x458] sm:$0xff] %v3774_v63  ;;  %v3782_v6 = vld [vmem:[%s6390_s18 + $0x178] sm:$0xff]  ;;  %v3784_v52 = vld [vmem:[%s6390_s18 + $0x180] sm:$0xff] }
 0x338   : > { %3777 = vst [vmem:[%s7032_s17 + $0x460] sm:$0xff] %v3776_v40  ;;  %3779 = vst [vmem:[%s7032_s17 + $0x468] sm:$0xff] %v3778_v39  ;;  %v3786_v3 = vld [vmem:[%s6390_s18 + $0x188] sm:$0xff]  ;;  %v3788_v11 = vld [vmem:[%s6390_s18 + $0x190] sm:$0xff] }
 0x339   : > { %3781 = vst [vmem:[%s7032_s17 + $0x470] sm:$0xff] %v3780_v58  ;;  %3783 = vst [vmem:[%s7032_s17 + $0x478] sm:$0xff] %v3782_v6  ;;  %v3790_v29 = vld [vmem:[%s6390_s18 + $0x198] sm:$0xff]  ;;  %v3792_v13 = vld [vmem:[%s6390_s18 + $0x1a0] sm:$0xff] }
 0x33a   : > { %3785 = vst [vmem:[%s7032_s17 + $0x600] sm:$0xff] %v3784_v52  ;;  %3787 = vst [vmem:[%s7032_s17 + $0x608] sm:$0xff] %v3786_v3  ;;  %v3794_v56 = vld [vmem:[%s6390_s18 + $0x1a8] sm:$0xff]  ;;  %v3796_v22 = vld [vmem:[%s6390_s18 + $0x1b0] sm:$0xff] }
 0x33b   : > { %3789 = vst [vmem:[%s7032_s17 + $0x610] sm:$0xff] %v3788_v11  ;;  %3791 = vst [vmem:[%s7032_s17 + $0x618] sm:$0xff] %v3790_v29  ;;  %v3798_v25 = vld [vmem:[%s6390_s18 + $0x1b8] sm:$0xff]  ;;  %v3800_v57 = vld [vmem:[%s6390_s18 + $0x1c0] sm:$0xff] }
 0x33c   : > { %3793 = vst [vmem:[%s7032_s17 + $0x620] sm:$0xff] %v3792_v13  ;;  %3795 = vst [vmem:[%s7032_s17 + $0x628] sm:$0xff] %v3794_v56  ;;  %v3802_v49 = vld [vmem:[%s6390_s18 + $0x1c8] sm:$0xff]  ;;  %v3804_v31 = vld [vmem:[%s6390_s18 + $0x1d0] sm:$0xff] }
 0x33d   : > { %3797 = vst [vmem:[%s7032_s17 + $0x630] sm:$0xff] %v3796_v22  ;;  %3799 = vst [vmem:[%s7032_s17 + $0x638] sm:$0xff] %v3798_v25  ;;  %v3806_v55 = vld [vmem:[%s6390_s18 + $0x1d8] sm:$0xff]  ;;  %v3808_v37 = vld [vmem:[%s6390_s18 + $0x1e0] sm:$0xff] }
 0x33e   : > { %3801 = vst [vmem:[%s7032_s17 + $0x640] sm:$0xff] %v3800_v57  ;;  %3803 = vst [vmem:[%s7032_s17 + $0x648] sm:$0xff] %v3802_v49  ;;  %v3810_v41 = vld [vmem:[%s6390_s18 + $0x1e8] sm:$0xff]  ;;  %v3812_v33 = vld [vmem:[%s6390_s18 + $0x1f0] sm:$0xff] }
 0x33f   : > { %3805 = vst [vmem:[%s7032_s17 + $0x650] sm:$0xff] %v3804_v31  ;;  %3807 = vst [vmem:[%s7032_s17 + $0x658] sm:$0xff] %v3806_v55  ;;  %v3814_v18 = vld [vmem:[%s6390_s18 + $0x1f8] sm:$0xff]  ;;  %v3816_v36 = vld [vmem:[%s6390_s18 + $0x200] sm:$0xff] }
 0x340   : > { %3809 = vst [vmem:[%s7032_s17 + $0x660] sm:$0xff] %v3808_v37  ;;  %3811 = vst [vmem:[%s7032_s17 + $0x668] sm:$0xff] %v3810_v41  ;;  %v3820_v26 = vld [vmem:[%s6390_s18 + $0x210] sm:$0xff]  ;;  %v3822_v32 = vld [vmem:[%s6390_s18 + $0x218] sm:$0xff] }
 0x341   : > { %3813 = vst [vmem:[%s7032_s17 + $0x670] sm:$0xff] %v3812_v33  ;;  %3815 = vst [vmem:[%s7032_s17 + $0x678] sm:$0xff] %v3814_v18  ;;  %v3824_v53 = vld [vmem:[%s6390_s18 + $0x220] sm:$0xff]  ;;  %v3826_v12 = vld [vmem:[%s6390_s18 + $0x228] sm:$0xff] }
 0x342   : > { %3817 = vst [vmem:[%s7032_s17 + $0x800] sm:$0xff] %v3816_v36  ;;  %3819 = vst [vmem:[%s7032_s17 + $0x808] sm:$0xff] %v3818_v27  ;;  %v3828_v21 = vld [vmem:[%s6390_s18 + $0x230] sm:$0xff]  ;;  %v3830_v34 = vld [vmem:[%s6390_s18 + $0x238] sm:$0xff] }
 0x343   : > { %3821 = vst [vmem:[%s7032_s17 + $0x810] sm:$0xff] %v3820_v26  ;;  %3823 = vst [vmem:[%s7032_s17 + $0x818] sm:$0xff] %v3822_v32  ;;  %v3832_v60 = vld [vmem:[%s6390_s18 + $0x240] sm:$0xff]  ;;  %v3834_v5 = vld [vmem:[%s6390_s18 + $0x248] sm:$0xff] }
 0x344   : > { %3825 = vst [vmem:[%s7032_s17 + $0x820] sm:$0xff] %v3824_v53  ;;  %3827 = vst [vmem:[%s7032_s17 + $0x828] sm:$0xff] %v3826_v12  ;;  %v3836_v17 = vld [vmem:[%s6390_s18 + $0x250] sm:$0xff]  ;;  %v3838_v38 = vld [vmem:[%s6390_s18 + $0x258] sm:$0xff] }
 0x345   : > { %3829 = vst [vmem:[%s7032_s17 + $0x830] sm:$0xff] %v3828_v21  ;;  %3831 = vst [vmem:[%s7032_s17 + $0x838] sm:$0xff] %v3830_v34  ;;  %v3840_v14 = vld [vmem:[%s6390_s18 + $0x260] sm:$0xff]  ;;  %v3842_v16 = vld [vmem:[%s6390_s18 + $0x268] sm:$0xff] }
 0x346   : > { %3833 = vst [vmem:[%s7032_s17 + $0x840] sm:$0xff] %v3832_v60  ;;  %3835 = vst [vmem:[%s7032_s17 + $0x848] sm:$0xff] %v3834_v5  ;;  %v3844_v4 = vld [vmem:[%s6390_s18 + $0x270] sm:$0xff]  ;;  %v3846_v44 = vld [vmem:[%s6390_s18 + $0x278] sm:$0xff] }
 0x347   : > { %3837 = vst [vmem:[%s7032_s17 + $0x850] sm:$0xff] %v3836_v17  ;;  %3839 = vst [vmem:[%s7032_s17 + $0x858] sm:$0xff] %v3838_v38  ;;  %v3848_v19 = vld [vmem:[%s6390_s18 + $0x280] sm:$0xff]  ;;  %v3850_v30 = vld [vmem:[%s6390_s18 + $0x288] sm:$0xff] }
 0x348   : > { %3841 = vst [vmem:[%s7032_s17 + $0x860] sm:$0xff] %v3840_v14  ;;  %3843 = vst [vmem:[%s7032_s17 + $0x868] sm:$0xff] %v3842_v16  ;;  %v3852_v0 = vld [vmem:[%s6390_s18 + $0x290] sm:$0xff]  ;;  %v3854_v50 = vld [vmem:[%s6390_s18 + $0x298] sm:$0xff] }
 0x349   : > { %3845 = vst [vmem:[%s7032_s17 + $0x870] sm:$0xff] %v3844_v4  ;;  %3847 = vst [vmem:[%s7032_s17 + $0x878] sm:$0xff] %v3846_v44  ;;  %v3856_v28 = vld [vmem:[%s6390_s18 + $0x2a0] sm:$0xff]  ;;  %v3858_v59 = vld [vmem:[%s6390_s18 + $0x2a8] sm:$0xff] }
 0x34a   : > { %3849 = vst [vmem:[%s7032_s17 + $0xa00] sm:$0xff] %v3848_v19  ;;  %3851 = vst [vmem:[%s7032_s17 + $0xa08] sm:$0xff] %v3850_v30  ;;  %v3860_v1 = vld [vmem:[%s6390_s18 + $0x2b0] sm:$0xff]  ;;  %v3862_v2 = vld [vmem:[%s6390_s18 + $0x2b8] sm:$0xff] }
 0x34b   : > { %3853 = vst [vmem:[%s7032_s17 + $0xa10] sm:$0xff] %v3852_v0  ;;  %3855 = vst [vmem:[%s7032_s17 + $0xa18] sm:$0xff] %v3854_v50  ;;  %v3864_v20 = vld [vmem:[%s6390_s18 + $0x2c0] sm:$0xff]  ;;  %v3866_v8 = vld [vmem:[%s6390_s18 + $0x2c8] sm:$0xff] }
 0x34c   : > { %3857 = vst [vmem:[%s7032_s17 + $0xa20] sm:$0xff] %v3856_v28  ;;  %3859 = vst [vmem:[%s7032_s17 + $0xa28] sm:$0xff] %v3858_v59  ;;  %v3868_v47 = vld [vmem:[%s6390_s18 + $0x2d0] sm:$0xff]  ;;  %v3870_v61 = vld [vmem:[%s6390_s18 + $0x2d8] sm:$0xff] }
 0x34d   : > { %3861 = vst [vmem:[%s7032_s17 + $0xa30] sm:$0xff] %v3860_v1  ;;  %3863 = vst [vmem:[%s7032_s17 + $0xa38] sm:$0xff] %v3862_v2  ;;  %v3872_v7 = vld [vmem:[%s6390_s18 + $0x2e0] sm:$0xff]  ;;  %v3874_v23 = vld [vmem:[%s6390_s18 + $0x2e8] sm:$0xff] }
 0x34e   : > { %3865 = vst [vmem:[%s7032_s17 + $0xa40] sm:$0xff] %v3864_v20  ;;  %3867 = vst [vmem:[%s7032_s17 + $0xa48] sm:$0xff] %v3866_v8  ;;  %v3876_v35 = vld [vmem:[%s6390_s18 + $0x2f0] sm:$0xff]  ;;  %v3878_v45 = vld [vmem:[%s6390_s18 + $0x2f8] sm:$0xff] }
 0x34f   : > { %3869 = vst [vmem:[%s7032_s17 + $0xa50] sm:$0xff] %v3868_v47  ;;  %3871 = vst [vmem:[%s7032_s17 + $0xa58] sm:$0xff] %v3870_v61 }
 0x350   : > { %3873 = vst [vmem:[%s7032_s17 + $0xa60] sm:$0xff] %v3872_v7  ;;  %3875 = vst [vmem:[%s7032_s17 + $0xa68] sm:$0xff] %v3874_v23 }
 0x351   : > { %3877 = vst [vmem:[%s7032_s17 + $0xa70] sm:$0xff] %v3876_v35  ;;  %3879 = vst [vmem:[%s7032_s17 + $0xa78] sm:$0xff] %v3878_v45 }
 0x352 PF: > { %p13_p9 = scmp.ge.s32.totalorder %s4698_s22, 6   ;;  %s7657_s18 = smov %s4640_s19 }
 0x353   : > { %s7658_s19 = smov %s4706_s25  ;;  %s7659_s20 = smov %s4698_s22 }
 0x354   :  { %15 = sbr.rel (!%p13_p9) target bundleno = 2 (0x2), region = 124 }

</bundles_post_ra>
